<compile_context>
chip_gen: v5e
topology: v5e:2x2
jax: 0.10.0
libtpu: 0.0.40
codegen_flags: <defaults>
</compile_context>

<pallas_src>
import functools

import numpy as np
import jax
import jax.numpy as jnp
from jax import lax
from jax.experimental import pallas as pl
from jax.experimental.pallas import tpu as pltpu

LRELU_SLOPE = 0.2
LRELU_GAIN = float(np.sqrt(2.0))


# ---------------------------------------------------------------------------
# Fused kernel: conv3x3(+mbstd channel via per-sample map) + lrelu + fc + lrelu + out
# ---------------------------------------------------------------------------
def _epilogue_kernel(xp_ref, sd_ref, mbmap_ref, wc_ref, bc_ref,
                     wfc_ref, bfc_ref, wo_ref, bo_ref, o_ref,
                     *, bt, H, W, C):
    # xp_ref   : (H+2, W+2, bt, C) f32   zero-padded activations, (h, w, b, c) layout
    # sd_ref   : (bt, 1)           f32   per-sample minibatch-std scalar
    # mbmap_ref: (H*W, 1, C)       f32   conv contribution of the (constant) mbstd channel
    # wc_ref   : (9*C, C)          bf16  tap-major main conv weight (gain-scaled)
    # bc_ref   : (1, C)            f32
    # wfc_ref  : (H*W, C, C)       bf16  fc weight as (position, cin, cout), gain-scaled
    # bfc_ref  : (1, C)            f32
    # wo_ref   : (C, out_dim)      bf16  out weight (gain-scaled)
    # bo_ref   : (1, out_dim)      f32
    # o_ref    : (bt, out_dim)     f32
    P = H * W
    R = P * bt
    mxu_dtype = wc_ref.dtype

    # Cast to MXU dtype once so every im2col slice/concat moves bf16, not f32.
    xp = xp_ref[...].astype(mxu_dtype)                        # (H+2, W+2, bt, C) bf16
    # im2col: 9 shifted views -> one (R, 9*C) patch matrix, rows ordered (h, w, b).
    taps = [xp[ky:ky + H, kx:kx + W, :, :].reshape(R, C)
            for ky in range(3) for kx in range(3)]
    patches = jnp.concatenate(taps, axis=-1)                  # (R, 9C) bf16

    conv = jnp.dot(patches, wc_ref[...],
                   preferred_element_type=jnp.float32)        # (R, C) f32
    conv = conv.reshape(P, bt, C)                             # split leading dim only

    z = (conv
         + sd_ref[...].reshape(1, bt, 1) * mbmap_ref[...]     # exact mbstd-channel conv
         + bc_ref[...].reshape(1, 1, C))
    a = (jnp.where(z >= 0.0, z, LRELU_SLOPE * z)
         * LRELU_GAIN).astype(mxu_dtype)                      # (P, bt, C) bf16

    # fc: out[b, f] = sum_{p, c} a[p, b, c] * wfc[p, c, f]
    #   == batched (over p) matmul + reduction over p (identical to flatten(1) @ W.T).
    u = lax.dot_general(a, wfc_ref[...],
                        dimension_numbers=(((2,), (1,)), ((0,), (0,))),
                        preferred_element_type=jnp.float32)   # (P, bt, F)
    h = jnp.sum(u, axis=0) + bfc_ref[...]                     # (bt, F) f32
    h = jnp.where(h >= 0.0, h, LRELU_SLOPE * h) * LRELU_GAIN

    y = jnp.dot(h.astype(wo_ref.dtype), wo_ref[...],
                preferred_element_type=jnp.float32) + bo_ref[...]
    o_ref[...] = y                                            # (bt, out_dim)


# ---------------------------------------------------------------------------
# Wrapper: plain-JAX glue (mbstd reduction, layout transpose+pad, weight prep)
# ---------------------------------------------------------------------------
def discriminator_epilogue_pallas(x_nchw, params, *, mbstd_group_size=4,
                                  mbstd_num_channels=1, batch_tile=8,
                                  mxu_dtype=jnp.bfloat16):
    assert mbstd_num_channels == 1
    N, C, H, W = x_nchw.shape
    x_nchw = x_nchw.astype(jnp.float32)

    # ---- minibatch std: tiny reduction, leave to XLA (no dedicated kernel) ----
    G = int(min(mbstd_group_size, N)) if mbstd_group_size is not None else N
    assert N % G == 0
    M = N // G
    xg = x_nchw.reshape(G, M, C, H, W)
    var = jnp.mean((xg - jnp.mean(xg, axis=0, keepdims=True)) ** 2, axis=0)
    sd = jnp.mean(jnp.sqrt(var + 1e-8), axis=(1, 2, 3))       # (M,)
    sd_n = jnp.tile(sd, (G,)).reshape(N, 1)                   # sample n -> sd[n % M]

    # ---- batch tiling (>=2 tiles when possible so v7x megacore can split them) ----
    bt = batch_tile
    if (N % bt != 0) or (bt % 8 != 0 and bt != N):
        bt = N                                                # single tile fallback
    n_tiles = N // bt

    # ---- activation layout: (H+2, W+2, N, C); spatial halo in untiled leading dims ----
    xp = jnp.pad(jnp.transpose(x_nchw, (2, 3, 0, 1)),
                 ((1, 1), (1, 1), (0, 0), (0, 0)))            # one fused XLA copy

    # ---- weight preparation (equalized-lr gains folded in) ----
    Cin = C + 1
    P = H * W
    conv_gain = 1.0 / np.sqrt(Cin * 9)
    w = params["conv_w"].astype(jnp.float32)                  # (C, C+1, 3, 3)
    wc = (jnp.transpose(w[:, :C], (2, 3, 1, 0)).reshape(9 * C, C)
          * conv_gain).astype(mxu_dtype)                      # tap-major (ky,kx,ci) x co
    wmb = jnp.transpose(w[:, C:], (2, 3, 1, 0)).reshape(9, C) * conv_gain  # (tap, co)
    # Exact (edge-aware) conv response of a spatially-constant unit image:
    ones_pad = jnp.pad(jnp.ones((H, W), jnp.float32), 1)
    tap_valid = jnp.stack([ones_pad[ky:ky + H, kx:kx + W]
                           for ky in range(3) for kx in range(3)],
                          axis=-1).reshape(P, 9)
    mbmap = (tap_valid @ wmb).reshape(P, 1, C)                # f32
    bc = params["conv_b"].reshape(1, C).astype(jnp.float32)

    F = params["fc_w"].shape[0]                               # == C
    fc_gain = 1.0 / np.sqrt(C * P)
    # torch fc weight is (F, C*H*W) with flatten order (c, h, w) -> (p, c, f) layout.
    wfc = (jnp.transpose(params["fc_w"].reshape(F, C, P), (2, 1, 0))
           * fc_gain).astype(mxu_dtype)                       # (P, C, F)
    bfc = params["fc_b"].reshape(1, F).astype(jnp.float32)

    out_dim = params["out_w"].shape[0]
    wo = (params["out_w"].T * (1.0 / np.sqrt(C))).astype(mxu_dtype)  # (C, out_dim)
    bo = params["out_b"].reshape(1, out_dim).astype(jnp.float32)

    # ---- cost estimate + explicit VMEM budget ----
    itemsize = int(np.dtype(mxu_dtype).itemsize)
    flops = int(2 * N * P * (9 * C) * C + 2 * N * (P * C) * F + 2 * N * F * out_dim)
    bytes_accessed = int(xp.size * 4 + sd_n.size * 4 + mbmap.size * 4
                         + (wc.size + wfc.size + wo.size) * itemsize
                         + (bc.size + bfc.size + bo.size) * 4 + N * out_dim * 4)
    R = P * bt
    temps = ((H + 2) * (W + 2) * bt * C * itemsize            # bf16 copy of xp block
             + 2 * R * 9 * C * itemsize                       # taps + concat patches
             + 3 * R * C * 4                                  # conv / z / act
             + P * bt * F * 4                                 # fc partials (u)
             + 4 * bt * F * 4)                                # h / y epilogue
    vmem_budget = (2 * (H + 2) * (W + 2) * bt * C * 4                 # 2x-buffered input
                   + 2 * (wc.size + wfc.size + wo.size) * itemsize    # (worst-case) weights
                   + 2 * (mbmap.size + bc.size + bfc.size + bo.size) * 4
                   + temps)
    vmem_limit = int(min(64 * 2 ** 20, max(32 * 2 ** 20, 2 * vmem_budget)))

    kernel = functools.partial(_epilogue_kernel, bt=bt, H=H, W=W, C=C)
    y = pl.pallas_call(
        kernel,
        out_shape=jax.ShapeDtypeStruct((N, out_dim), jnp.float32),
        grid=(n_tiles,),
        in_specs=[
            pl.BlockSpec((H + 2, W + 2, bt, C), lambda n: (0, 0, n, 0)),  # xp
            pl.BlockSpec((bt, 1), lambda n: (n, 0)),                      # sd
            pl.BlockSpec((P, 1, C), lambda n: (0, 0, 0)),                 # mbmap
            pl.BlockSpec((9 * C, C), lambda n: (0, 0)),                   # wc
            pl.BlockSpec((1, C), lambda n: (0, 0)),                       # bc
            pl.BlockSpec((P, C, F), lambda n: (0, 0, 0)),                 # wfc
            pl.BlockSpec((1, F), lambda n: (0, 0)),                       # bfc
            pl.BlockSpec((C, out_dim), lambda n: (0, 0)),                 # wo
            pl.BlockSpec((1, out_dim), lambda n: (0, 0)),                 # bo
        ],
        out_specs=pl.BlockSpec((bt, out_dim), lambda n: (n, 0)),
        compiler_params=pltpu.CompilerParams(
            dimension_semantics=("parallel",),
            vmem_limit_bytes=vmem_limit),
        cost_estimate=pl.CostEstimate(flops=flops, transcendentals=0,
                                      bytes_accessed=bytes_accessed),
    )(xp, sd_n, mbmap, wc, bc, wfc, bfc, wo, bo)
    return y


# ---------------------------------------------------------------------------
# Pure-JAX reference (mirrors the PyTorch forward, NCHW, f32 HIGHEST precision)
# ---------------------------------------------------------------------------
def discriminator_epilogue_reference(x, params, *, mbstd_group_size=4):
    N, C, H, W = x.shape
    G = int(min(mbstd_group_size, N))
    M = N // G
    y = x.reshape(G, M, 1, C, H, W)
    y = y - y.mean(axis=0, keepdims=True)
    y = (y ** 2).mean(axis=0)
    y = jnp.sqrt(y + 1e-8)
    y = y.mean(axis=(2, 3, 4))                                # (M, 1)
    y = y.reshape(M, 1, 1, 1)
    y = jnp.tile(y, (G, 1, H, W))                             # (N, 1, H, W)
    x = jnp.concatenate([x, y], axis=1)

    w = params["conv_w"] * (1.0 / np.sqrt((C + 1) * 9))
    x = lax.conv_general_dilated(x, w, (1, 1), [(1, 1), (1, 1)],
                                 dimension_numbers=("NCHW", "OIHW", "NCHW"),
                                 precision=lax.Precision.HIGHEST)
    x = x + params["conv_b"][None, :, None, None]
    x = jnp.where(x >= 0, x, LRELU_SLOPE * x) * LRELU_GAIN

    x = x.reshape(N, -1)                                      # torch flatten(1): (c, h, w)
    wfc = params["fc_w"] * (1.0 / np.sqrt(C * H * W))
    x = jnp.dot(x, wfc.T, precision=lax.Precision.HIGHEST) + params["fc_b"][None, :]
    x = jnp.where(x >= 0, x, LRELU_SLOPE * x) * LRELU_GAIN

    wout = params["out_w"] * (1.0 / np.sqrt(C))
    x = jnp.dot(x, wout.T, precision=lax.Precision.HIGHEST) + params["out_b"][None, :]
    return x


if __name__ == "__main__":
    # in_channels=8, resolution=8, batch=16 (4 mbstd groups of 4), out_dim=1.
    N, C, R = 16, 8, 8
    key = jax.random.PRNGKey(0)
    ks = jax.random.split(key, 6)
    x = jax.random.normal(ks[0], (N, C, R, R), dtype=jnp.float32)
    params = dict(
        conv_w=jax.random.normal(ks[1], (C, C + 1, 3, 3), dtype=jnp.float32),
        conv_b=0.1 * jax.random.normal(ks[2], (C,), dtype=jnp.float32),
        fc_w=jax.random.normal(ks[3], (C, C * R * R), dtype=jnp.float32),
        fc_b=0.1 * jax.random.normal(ks[4], (C,), dtype=jnp.float32),
        out_w=jax.random.normal(ks[5], (1, C), dtype=jnp.float32),
        out_b=jnp.zeros((1,), dtype=jnp.float32),
    )

    y = jax.block_until_ready(discriminator_epilogue_pallas(x, params))
    y_ref = jax.block_until_ready(discriminator_epilogue_reference(x, params))

    assert y.shape == (N, 1), y.shape
    # Matmuls run with bf16 MXU inputs (f32 accumulation) -> bf16-level tolerance.
    if not np.allclose(np.asarray(y), np.asarray(y_ref), atol=5e-2, rtol=5e-2):
        raise AssertionError(
            "mismatch (max abs diff = %g):\n pallas=%s\n ref=%s"
            % (float(np.max(np.abs(np.asarray(y) - np.asarray(y_ref)))),
               np.asarray(y).ravel(), np.asarray(y_ref).ravel()))
    print("KERNEL_OK")
</pallas_src>

<mosaic_0001>
module attributes {stable_mosaic.version = 11 : i64} {
  func.func @_epilogue_kernel(%arg0: i32, %arg1: memref<10x10x8x8xf32, #tpu.memory_space<vmem>>, %arg2: memref<8x1xf32, #tpu.memory_space<vmem>>, %arg3: memref<64x1x8xf32, #tpu.memory_space<vmem>>, %arg4: memref<72x8xbf16, #tpu.memory_space<vmem>>, %arg5: memref<1x8xf32, #tpu.memory_space<vmem>>, %arg6: memref<64x8x8xbf16, #tpu.memory_space<vmem>>, %arg7: memref<1x8xf32, #tpu.memory_space<vmem>>, %arg8: memref<8x1xbf16, #tpu.memory_space<vmem>>, %arg9: memref<1x1xf32, #tpu.memory_space<vmem>>, %arg10: memref<8x1xf32, #tpu.memory_space<vmem>>) attributes {dimension_semantics = [#tpu.dimension_semantics<parallel>], iteration_bounds = array<i64: 2>, scalar_prefetch = 0 : i64, scratch_operands = 0 : i64, tpu.core_type = #tpu.core_type<tc>, window_params = [{transform_indices = @transform_0, window_bounds = array<i64: 10, 10, 8, 8>}, {transform_indices = @transform_1, window_bounds = array<i64: 8, 1>}, {pipeline_mode = #tpu.pipeline_mode<synchronous>, transform_indices = @transform_2, window_bounds = array<i64: 64, 1, 8>}, {pipeline_mode = #tpu.pipeline_mode<synchronous>, transform_indices = @transform_3, window_bounds = array<i64: 72, 8>}, {pipeline_mode = #tpu.pipeline_mode<synchronous>, transform_indices = @transform_4, window_bounds = array<i64: 1, 8>}, {pipeline_mode = #tpu.pipeline_mode<synchronous>, transform_indices = @transform_5, window_bounds = array<i64: 64, 8, 8>}, {pipeline_mode = #tpu.pipeline_mode<synchronous>, transform_indices = @transform_6, window_bounds = array<i64: 1, 8>}, {pipeline_mode = #tpu.pipeline_mode<synchronous>, transform_indices = @transform_7, window_bounds = array<i64: 8, 1>}, {pipeline_mode = #tpu.pipeline_mode<synchronous>, transform_indices = @transform_8, window_bounds = array<i64: 1, 1>}, {transform_indices = @transform_9, window_bounds = array<i64: 8, 1>}]} {
    %c0 = arith.constant 0 : index
    %c0_0 = arith.constant 0 : index
    %c0_1 = arith.constant 0 : index
    %c0_2 = arith.constant 0 : index
    %0 = vector.load %arg1[%c0, %c0_0, %c0_1, %c0_2] : memref<10x10x8x8xf32, #tpu.memory_space<vmem>>, vector<10x10x8x8xf32>
    %1 = arith.truncf %0 : vector<10x10x8x8xf32> to vector<10x10x8x8xbf16>
    %2 = vector.extract_strided_slice %1 {offsets = [0, 0, 0, 0], sizes = [8, 8, 8, 8], strides = [1, 1, 1, 1]} : vector<10x10x8x8xbf16> to vector<8x8x8x8xbf16>
    %3 = vector.shape_cast %2 : vector<8x8x8x8xbf16> to vector<512x8xbf16>
    %4 = vector.extract_strided_slice %1 {offsets = [0, 1, 0, 0], sizes = [8, 8, 8, 8], strides = [1, 1, 1, 1]} : vector<10x10x8x8xbf16> to vector<8x8x8x8xbf16>
    %5 = vector.shape_cast %4 : vector<8x8x8x8xbf16> to vector<512x8xbf16>
    %6 = vector.extract_strided_slice %1 {offsets = [0, 2, 0, 0], sizes = [8, 8, 8, 8], strides = [1, 1, 1, 1]} : vector<10x10x8x8xbf16> to vector<8x8x8x8xbf16>
    %7 = vector.shape_cast %6 : vector<8x8x8x8xbf16> to vector<512x8xbf16>
    %8 = vector.extract_strided_slice %1 {offsets = [1, 0, 0, 0], sizes = [8, 8, 8, 8], strides = [1, 1, 1, 1]} : vector<10x10x8x8xbf16> to vector<8x8x8x8xbf16>
    %9 = vector.shape_cast %8 : vector<8x8x8x8xbf16> to vector<512x8xbf16>
    %10 = vector.extract_strided_slice %1 {offsets = [1, 1, 0, 0], sizes = [8, 8, 8, 8], strides = [1, 1, 1, 1]} : vector<10x10x8x8xbf16> to vector<8x8x8x8xbf16>
    %11 = vector.shape_cast %10 : vector<8x8x8x8xbf16> to vector<512x8xbf16>
    %12 = vector.extract_strided_slice %1 {offsets = [1, 2, 0, 0], sizes = [8, 8, 8, 8], strides = [1, 1, 1, 1]} : vector<10x10x8x8xbf16> to vector<8x8x8x8xbf16>
    %13 = vector.shape_cast %12 : vector<8x8x8x8xbf16> to vector<512x8xbf16>
    %14 = vector.extract_strided_slice %1 {offsets = [2, 0, 0, 0], sizes = [8, 8, 8, 8], strides = [1, 1, 1, 1]} : vector<10x10x8x8xbf16> to vector<8x8x8x8xbf16>
    %15 = vector.shape_cast %14 : vector<8x8x8x8xbf16> to vector<512x8xbf16>
    %16 = vector.extract_strided_slice %1 {offsets = [2, 1, 0, 0], sizes = [8, 8, 8, 8], strides = [1, 1, 1, 1]} : vector<10x10x8x8xbf16> to vector<8x8x8x8xbf16>
    %17 = vector.shape_cast %16 : vector<8x8x8x8xbf16> to vector<512x8xbf16>
    %18 = vector.extract_strided_slice %1 {offsets = [2, 2, 0, 0], sizes = [8, 8, 8, 8], strides = [1, 1, 1, 1]} : vector<10x10x8x8xbf16> to vector<8x8x8x8xbf16>
    %19 = vector.shape_cast %18 : vector<8x8x8x8xbf16> to vector<512x8xbf16>
    %20 = tpu.concatenate %3, %5, %7, %9, %11, %13, %15, %17, %19 in 1 : vector<512x8xbf16>, vector<512x8xbf16>, vector<512x8xbf16>, vector<512x8xbf16>, vector<512x8xbf16>, vector<512x8xbf16>, vector<512x8xbf16>, vector<512x8xbf16>, vector<512x8xbf16> -> vector<512x72xbf16>
    %c0_3 = arith.constant 0 : index
    %c0_4 = arith.constant 0 : index
    %21 = vector.load %arg4[%c0_3, %c0_4] : memref<72x8xbf16, #tpu.memory_space<vmem>>, vector<72x8xbf16>
    %cst = arith.constant dense<0.000000e+00> : vector<512x8xf32>
    %22 = tpu.matmul %20, %21, %cst {dimension_numbers = #tpu.dot_dimension_numbers<[1], [0], [0], [1], [0, 0, 1, 1], [], []>} : vector<512x72xbf16>, vector<72x8xbf16>, vector<512x8xf32> -> vector<512x8xf32>
    %23 = vector.shape_cast %22 : vector<512x8xf32> to vector<64x8x8xf32>
    %c0_5 = arith.constant 0 : index
    %c0_6 = arith.constant 0 : index
    %24 = vector.load %arg2[%c0_5, %c0_6] : memref<8x1xf32, #tpu.memory_space<vmem>>, vector<8x1xf32>
    %25 = vector.shape_cast %24 : vector<8x1xf32> to vector<1x8x1xf32>
    %c0_7 = arith.constant 0 : index
    %c0_8 = arith.constant 0 : index
    %c0_9 = arith.constant 0 : index
    %26 = vector.load %arg3[%c0_7, %c0_8, %c0_9] : memref<64x1x8xf32, #tpu.memory_space<vmem>>, vector<64x1x8xf32>
    %27 = vector.broadcast %25 : vector<1x8x1xf32> to vector<64x8x8xf32>
    %28 = vector.broadcast %26 : vector<64x1x8xf32> to vector<64x8x8xf32>
    %29 = arith.mulf %27, %28 : vector<64x8x8xf32>
    %30 = arith.addf %23, %29 : vector<64x8x8xf32>
    %c0_10 = arith.constant 0 : index
    %c0_11 = arith.constant 0 : index
    %31 = vector.load %arg5[%c0_10, %c0_11] : memref<1x8xf32, #tpu.memory_space<vmem>>, vector<1x8xf32>
    %32 = vector.shape_cast %31 : vector<1x8xf32> to vector<1x1x8xf32>
    %33 = vector.broadcast %32 : vector<1x1x8xf32> to vector<64x8x8xf32>
    %34 = arith.addf %30, %33 : vector<64x8x8xf32>
    %cst_12 = arith.constant 0.000000e+00 : f32
    %35 = vector.broadcast %cst_12 : f32 to vector<64x8x8xf32>
    %36 = arith.cmpf oge, %34, %35 : vector<64x8x8xf32>
    %cst_13 = arith.constant 2.000000e-01 : f32
    %37 = vector.broadcast %cst_13 : f32 to vector<64x8x8xf32>
    %38 = arith.mulf %37, %34 : vector<64x8x8xf32>
    %39 = arith.select %36, %34, %38 : vector<64x8x8xi1>, vector<64x8x8xf32>
    %cst_14 = arith.constant 1.41421354 : f32
    %40 = vector.broadcast %cst_14 : f32 to vector<64x8x8xf32>
    %41 = arith.mulf %39, %40 : vector<64x8x8xf32>
    %42 = arith.truncf %41 : vector<64x8x8xf32> to vector<64x8x8xbf16>
    %c0_15 = arith.constant 0 : index
    %c0_16 = arith.constant 0 : index
    %c0_17 = arith.constant 0 : index
    %43 = vector.load %arg6[%c0_15, %c0_16, %c0_17] : memref<64x8x8xbf16, #tpu.memory_space<vmem>>, vector<64x8x8xbf16>
    %cst_18 = arith.constant dense<0.000000e+00> : vector<64x8x8xf32>
    %44 = tpu.matmul %42, %43, %cst_18 {dimension_numbers = #tpu.dot_dimension_numbers<[2], [1], [1], [2], [0, 0, 0, 1, 1, 2], [0], [0]>} : vector<64x8x8xbf16>, vector<64x8x8xbf16>, vector<64x8x8xf32> -> vector<64x8x8xf32>
    %cst_19 = arith.constant dense<0.000000e+00> : vector<8x8xf32>
    %45 = vector.multi_reduction <add>, %44, %cst_19 [0] : vector<64x8x8xf32> to vector<8x8xf32>
    %c0_20 = arith.constant 0 : index
    %c0_21 = arith.constant 0 : index
    %46 = vector.load %arg7[%c0_20, %c0_21] : memref<1x8xf32, #tpu.memory_space<vmem>>, vector<1x8xf32>
    %47 = vector.broadcast %46 : vector<1x8xf32> to vector<8x8xf32>
    %48 = arith.addf %45, %47 : vector<8x8xf32>
    %cst_22 = arith.constant 0.000000e+00 : f32
    %49 = vector.broadcast %cst_22 : f32 to vector<8x8xf32>
    %50 = arith.cmpf oge, %48, %49 : vector<8x8xf32>
    %cst_23 = arith.constant 2.000000e-01 : f32
    %51 = vector.broadcast %cst_23 : f32 to vector<8x8xf32>
    %52 = arith.mulf %51, %48 : vector<8x8xf32>
    %53 = arith.select %50, %48, %52 : vector<8x8xi1>, vector<8x8xf32>
    %cst_24 = arith.constant 1.41421354 : f32
    %54 = vector.broadcast %cst_24 : f32 to vector<8x8xf32>
    %55 = arith.mulf %53, %54 : vector<8x8xf32>
    %56 = arith.truncf %55 : vector<8x8xf32> to vector<8x8xbf16>
    %c0_25 = arith.constant 0 : index
    %c0_26 = arith.constant 0 : index
    %57 = vector.load %arg8[%c0_25, %c0_26] : memref<8x1xbf16, #tpu.memory_space<vmem>>, vector<8x1xbf16>
    %cst_27 = arith.constant dense<0.000000e+00> : vector<8x1xf32>
    %58 = tpu.matmul %56, %57, %cst_27 {dimension_numbers = #tpu.dot_dimension_numbers<[1], [0], [0], [1], [0, 0, 1, 1], [], []>} : vector<8x8xbf16>, vector<8x1xbf16>, vector<8x1xf32> -> vector<8x1xf32>
    %c0_28 = arith.constant 0 : index
    %c0_29 = arith.constant 0 : index
    %59 = vector.load %arg9[%c0_28, %c0_29] : memref<1x1xf32, #tpu.memory_space<vmem>>, vector<1x1xf32>
    %60 = vector.broadcast %59 : vector<1x1xf32> to vector<8x1xf32>
    %61 = arith.addf %58, %60 : vector<8x1xf32>
    %c0_30 = arith.constant 0 : index
    %c0_31 = arith.constant 0 : index
    %62 = vector.load %arg10[%c0_30, %c0_31] : memref<8x1xf32, #tpu.memory_space<vmem>>, vector<8x1xf32>
    tpu.vector_store %arg10[%c0_30, %c0_31], %61 {strides = array<i32>} : memref<8x1xf32, #tpu.memory_space<vmem>>, vector<8x1xf32>,
    return
  }
  func.func @transform_0(%arg0: i32) -> (i32, i32, i32, i32) {
    %c0_i32 = arith.constant 0 : i32
    %c0_i32_0 = arith.constant 0 : i32
    %c0_i32_1 = arith.constant 0 : i32
    %c0_i32_2 = arith.constant 0 : i32
    return %c0_i32, %c0_i32_0, %arg0, %c0_i32_1 : i32, i32, i32, i32
  }
  func.func @transform_1(%arg0: i32) -> (i32, i32) {
    %c0_i32 = arith.constant 0 : i32
    %c0_i32_0 = arith.constant 0 : i32
    return %arg0, %c0_i32 : i32, i32
  }
  func.func @transform_2(%arg0: i32) -> (i32, i32, i32) {
    %c0_i32 = arith.constant 0 : i32
    %c0_i32_0 = arith.constant 0 : i32
    %c0_i32_1 = arith.constant 0 : i32
    %c0_i32_2 = arith.constant 0 : i32
    return %c0_i32, %c0_i32_0, %c0_i32_1 : i32, i32, i32
  }
  func.func @transform_3(%arg0: i32) -> (i32, i32) {
    %c0_i32 = arith.constant 0 : i32
    %c0_i32_0 = arith.constant 0 : i32
    %c0_i32_1 = arith.constant 0 : i32
    return %c0_i32, %c0_i32_0 : i32, i32
  }
  func.func @transform_4(%arg0: i32) -> (i32, i32) {
    %c0_i32 = arith.constant 0 : i32
    %c0_i32_0 = arith.constant 0 : i32
    %c0_i32_1 = arith.constant 0 : i32
    return %c0_i32, %c0_i32_0 : i32, i32
  }
  func.func @transform_5(%arg0: i32) -> (i32, i32, i32) {
    %c0_i32 = arith.constant 0 : i32
    %c0_i32_0 = arith.constant 0 : i32
    %c0_i32_1 = arith.constant 0 : i32
    %c0_i32_2 = arith.constant 0 : i32
    return %c0_i32, %c0_i32_0, %c0_i32_1 : i32, i32, i32
  }
  func.func @transform_6(%arg0: i32) -> (i32, i32) {
    %c0_i32 = arith.constant 0 : i32
    %c0_i32_0 = arith.constant 0 : i32
    %c0_i32_1 = arith.constant 0 : i32
    return %c0_i32, %c0_i32_0 : i32, i32
  }
  func.func @transform_7(%arg0: i32) -> (i32, i32) {
    %c0_i32 = arith.constant 0 : i32
    %c0_i32_0 = arith.constant 0 : i32
    %c0_i32_1 = arith.constant 0 : i32
    return %c0_i32, %c0_i32_0 : i32, i32
  }
  func.func @transform_8(%arg0: i32) -> (i32, i32) {
    %c0_i32 = arith.constant 0 : i32
    %c0_i32_0 = arith.constant 0 : i32
    %c0_i32_1 = arith.constant 0 : i32
    return %c0_i32, %c0_i32_0 : i32, i32
  }
  func.func @transform_9(%arg0: i32) -> (i32, i32) {
    %c0_i32 = arith.constant 0 : i32
    %c0_i32_0 = arith.constant 0 : i32
    return %arg0, %c0_i32 : i32, i32
  }
}

</mosaic_0001>

<bundles_post_ra>
// kernel: tpu_custom_call.1
= control target key start
LH: loop header
LB: loop body
LE: loop exit
PB: predicated region body
PF: predicated region fallthrough
CT: control target
= control target key end

     0   :  { %s7686_s0 = inlined_call_operand.vmem [shape: f32[10,10,16,8], index: 0, kind: input, shape index: {}]   ;;  %s7687_s1 = inlined_call_operand.vmem [shape: f32[16,1], index: 1, kind: input, shape index: {}]   ;;  %s7688_s2 = inlined_call_operand.vmem [shape: f32[64,1,8], index: 2, kind: input, shape index: {}]   ;;  %s7689_s3 = inlined_call_operand.vmem [shape: bf16[72,8], index: 3, kind: input, shape index: {}]   ;;  %s7690_s4 = inlined_call_operand.vmem [shape: f32[1,8], index: 4, kind: input, shape index: {}]   ;;  %s7691_s5 = inlined_call_operand.vmem [shape: bf16[64,8,8], index: 5, kind: input, shape index: {}]   ;;  %s7692_s6 = inlined_call_operand.vmem [shape: f32[1,8], index: 6, kind: input, shape index: {}]   ;;  %s7693_s7 = inlined_call_operand.vmem [shape: bf16[8,1], index: 7, kind: input, shape index: {}]   ;;  %s7694_s8 = inlined_call_operand.<no memory space> [shape: f32[1,1], index: 8, kind: input, shape index: {}]   ;;  %s7695_s9 = inlined_call_operand.vmem [shape: f32[16,1], index: 9, kind: output, shape index: {}]  }
   0x1   :  { %v14_v0 = vstv %s7694_s8 }
   0x2   :  { %15 = vst [vmem:[#allocation2] sm:$0x1] %v14_v0 }
   0x3   :  { %s5236_s11 = smov 0   ;;  %s5238_s12 = smov 0  }
   0x4   :  { %s5240_s13 = smov 0  }
   0x5 LB: > { %s4902_s8 = sadd.s32 4294967295, %s5172_s13   ;;  %s5253_s14 = sadd.s32 1, %s5172_s13   ;;  %s5172_s13 = sphi %s5240_s13, %s7738_s13   ;;  %s5168_s12 = sphi %s5238_s12, %s7737_s12   ;;  %s5164_s11 = sphi %s5236_s11, %s7736_s11  }
   0x6   : > { %s25_s15 = ssub.s32 %s5172_s13, %s5253_s14  ;;  %s28_s16 = sadd.s32 1, %s5168_s12 }
   0x7   : > { %p26_p0 = scmp.eq.s32.totalorder %s25_s15, 0  ;;  %p35_p1 = scmp.ne.s32.totalorder %s5168_s12, %s5164_s11 }
   0x8   : > { %p36_p2 = scmp.eq.s32.totalorder %s5172_s13, 0  ;;  %p4905_p4 = scmp.ge.s32.totalorder %s5172_s13, 2 }
   0x9   : > { %s5262_s17 = scalar_select %p26_p0, %s5168_s12, %s28_s16  }
   0xa   : > { %p37_p3 = por %p36_p2, %p35_p1  ;;  %281 = sbr.rel (%p4905_p4) target bundleno = 119 (0x77), region = 44 }
   0xf   : > { %284 = sbr.rel (!%p37_p3) target bundleno = 119 (0x77), region = 48  ;;  %s286_s18 = sand.u32 (%p37_p3), 1, %s5168_s12  }
  0x10   : > { %s4906_s19 = sshll.u32 (%p37_p3), %s5172_s13, 3  ;;  %s5044_s20 = smul.u32 (%p37_p3), 800, %s286_s18 }
  0x11   : > { %s5270_s23 = scalar_lea.vmem (%p37_p3), %s7686_s0, %s4906_s19 }
  0x12   : > { %v517_v1 = vld [vmem:[%s5270_s23] sm:$0xff] (%p37_p3)  ;;  %v519_v2 = vld [vmem:[%s5270_s23 + $0x10] sm:$0xff] (%p37_p3)  ;;  %s5275_s24 = scalar_lea.vmem (%p37_p3), [#allocation3], %s5044_s20 }
  0x13   : > { %v521_v3 = vld [vmem:[%s5270_s23 + $0x20] sm:$0xff] (%p37_p3)  ;;  %518 = vst [vmem:[%s5275_s24] sm:$0xff] (%p37_p3), %v517_v1  ;;  %v523_v4 = vld [vmem:[%s5270_s23 + $0x30] sm:$0xff] (%p37_p3) }
  0x14   : > { %520 = vst [vmem:[%s5275_s24 + $0x8] sm:$0xff] %v519_v2  ;;  %v525_v5 = vld [vmem:[%s5270_s23 + $0x40] sm:$0xff]  ;;  %v527_v6 = vld [vmem:[%s5270_s23 + $0x50] sm:$0xff] }
  0x15   : > { %522 = vst [vmem:[%s5275_s24 + $0x10] sm:$0xff] %v521_v3  ;;  %v529_v7 = vld [vmem:[%s5270_s23 + $0x60] sm:$0xff]  ;;  %v531_v8 = vld [vmem:[%s5270_s23 + $0x70] sm:$0xff] }
  0x16   : > { %524 = vst [vmem:[%s5275_s24 + $0x18] sm:$0xff] %v523_v4  ;;  %v533_v9 = vld [vmem:[%s5270_s23 + $0x80] sm:$0xff]  ;;  %v535_v10 = vld [vmem:[%s5270_s23 + $0x90] sm:$0xff] }
  0x17   : > { %526 = vst [vmem:[%s5275_s24 + $0x20] sm:$0xff] %v525_v5  ;;  %v537_v11 = vld [vmem:[%s5270_s23 + $0xa0] sm:$0xff]  ;;  %v539_v12 = vld [vmem:[%s5270_s23 + $0xb0] sm:$0xff] }
  0x18   : > { %528 = vst [vmem:[%s5275_s24 + $0x28] sm:$0xff] %v527_v6  ;;  %v541_v13 = vld [vmem:[%s5270_s23 + $0xc0] sm:$0xff]  ;;  %v543_v14 = vld [vmem:[%s5270_s23 + $0xd0] sm:$0xff] }
  0x19   : > { %530 = vst [vmem:[%s5275_s24 + $0x30] sm:$0xff] %v529_v7  ;;  %v545_v15 = vld [vmem:[%s5270_s23 + $0xe0] sm:$0xff]  ;;  %v547_v16 = vld [vmem:[%s5270_s23 + $0xf0] sm:$0xff] }
  0x1a   : > { %532 = vst [vmem:[%s5275_s24 + $0x38] sm:$0xff] %v531_v8  ;;  %v549_v17 = vld [vmem:[%s5270_s23 + $0x100] sm:$0xff]  ;;  %v551_v18 = vld [vmem:[%s5270_s23 + $0x110] sm:$0xff] }
  0x1b   : > { %534 = vst [vmem:[%s5275_s24 + $0x40] sm:$0xff] %v533_v9  ;;  %v553_v19 = vld [vmem:[%s5270_s23 + $0x120] sm:$0xff]  ;;  %v555_v20 = vld [vmem:[%s5270_s23 + $0x130] sm:$0xff] }
  0x1c   : > { %536 = vst [vmem:[%s5275_s24 + $0x48] sm:$0xff] %v535_v10  ;;  %v557_v21 = vld [vmem:[%s5270_s23 + $0x140] sm:$0xff]  ;;  %v559_v22 = vld [vmem:[%s5270_s23 + $0x150] sm:$0xff] }
  0x1d   : > { %538 = vst [vmem:[%s5275_s24 + $0x50] sm:$0xff] %v537_v11  ;;  %v561_v23 = vld [vmem:[%s5270_s23 + $0x160] sm:$0xff]  ;;  %v563_v24 = vld [vmem:[%s5270_s23 + $0x170] sm:$0xff] }
  0x1e   : > { %540 = vst [vmem:[%s5275_s24 + $0x58] sm:$0xff] %v539_v12  ;;  %v565_v25 = vld [vmem:[%s5270_s23 + $0x180] sm:$0xff]  ;;  %v567_v26 = vld [vmem:[%s5270_s23 + $0x190] sm:$0xff] }
  0x1f   : > { %542 = vst [vmem:[%s5275_s24 + $0x60] sm:$0xff] %v541_v13  ;;  %v569_v27 = vld [vmem:[%s5270_s23 + $0x1a0] sm:$0xff]  ;;  %v571_v28 = vld [vmem:[%s5270_s23 + $0x1b0] sm:$0xff] }
  0x20   : > { %544 = vst [vmem:[%s5275_s24 + $0x68] sm:$0xff] %v543_v14  ;;  %v573_v29 = vld [vmem:[%s5270_s23 + $0x1c0] sm:$0xff]  ;;  %v575_v30 = vld [vmem:[%s5270_s23 + $0x1d0] sm:$0xff] }
  0x21   : > { %546 = vst [vmem:[%s5275_s24 + $0x70] sm:$0xff] %v545_v15  ;;  %v577_v31 = vld [vmem:[%s5270_s23 + $0x1e0] sm:$0xff]  ;;  %v579_v32 = vld [vmem:[%s5270_s23 + $0x1f0] sm:$0xff] }
  0x22   : > { %548 = vst [vmem:[%s5275_s24 + $0x78] sm:$0xff] %v547_v16  ;;  %v581_v33 = vld [vmem:[%s5270_s23 + $0x200] sm:$0xff]  ;;  %v583_v34 = vld [vmem:[%s5270_s23 + $0x210] sm:$0xff] }
  0x23   : > { %550 = vst [vmem:[%s5275_s24 + $0x80] sm:$0xff] %v549_v17  ;;  %v585_v35 = vld [vmem:[%s5270_s23 + $0x220] sm:$0xff]  ;;  %v587_v36 = vld [vmem:[%s5270_s23 + $0x230] sm:$0xff] }
  0x24   : > { %552 = vst [vmem:[%s5275_s24 + $0x88] sm:$0xff] %v551_v18  ;;  %v589_v37 = vld [vmem:[%s5270_s23 + $0x240] sm:$0xff]  ;;  %v591_v38 = vld [vmem:[%s5270_s23 + $0x250] sm:$0xff] }
  0x25   : > { %554 = vst [vmem:[%s5275_s24 + $0x90] sm:$0xff] %v553_v19  ;;  %v593_v39 = vld [vmem:[%s5270_s23 + $0x260] sm:$0xff]  ;;  %v595_v40 = vld [vmem:[%s5270_s23 + $0x270] sm:$0xff] }
  0x26   : > { %556 = vst [vmem:[%s5275_s24 + $0x98] sm:$0xff] %v555_v20  ;;  %v597_v41 = vld [vmem:[%s5270_s23 + $0x280] sm:$0xff]  ;;  %v599_v42 = vld [vmem:[%s5270_s23 + $0x290] sm:$0xff] }
  0x27   : > { %558 = vst [vmem:[%s5275_s24 + $0xa0] sm:$0xff] %v557_v21  ;;  %v601_v43 = vld [vmem:[%s5270_s23 + $0x2a0] sm:$0xff]  ;;  %v603_v44 = vld [vmem:[%s5270_s23 + $0x2b0] sm:$0xff] }
  0x28   : > { %560 = vst [vmem:[%s5275_s24 + $0xa8] sm:$0xff] %v559_v22  ;;  %v605_v45 = vld [vmem:[%s5270_s23 + $0x2c0] sm:$0xff]  ;;  %v607_v46 = vld [vmem:[%s5270_s23 + $0x2d0] sm:$0xff] }
  0x29   : > { %562 = vst [vmem:[%s5275_s24 + $0xb0] sm:$0xff] %v561_v23  ;;  %v609_v47 = vld [vmem:[%s5270_s23 + $0x2e0] sm:$0xff]  ;;  %v611_v48 = vld [vmem:[%s5270_s23 + $0x2f0] sm:$0xff] }
  0x2a   : > { %564 = vst [vmem:[%s5275_s24 + $0xb8] sm:$0xff] %v563_v24  ;;  %v613_v49 = vld [vmem:[%s5270_s23 + $0x300] sm:$0xff]  ;;  %v615_v50 = vld [vmem:[%s5270_s23 + $0x310] sm:$0xff] }
  0x2b   : > { %566 = vst [vmem:[%s5275_s24 + $0xc0] sm:$0xff] %v565_v25  ;;  %v617_v51 = vld [vmem:[%s5270_s23 + $0x320] sm:$0xff]  ;;  %v619_v52 = vld [vmem:[%s5270_s23 + $0x330] sm:$0xff] }
  0x2c   : > { %568 = vst [vmem:[%s5275_s24 + $0xc8] sm:$0xff] %v567_v26  ;;  %v621_v53 = vld [vmem:[%s5270_s23 + $0x340] sm:$0xff]  ;;  %v623_v54 = vld [vmem:[%s5270_s23 + $0x350] sm:$0xff] }
  0x2d   : > { %570 = vst [vmem:[%s5275_s24 + $0xd0] sm:$0xff] %v569_v27  ;;  %v625_v55 = vld [vmem:[%s5270_s23 + $0x360] sm:$0xff]  ;;  %v627_v56 = vld [vmem:[%s5270_s23 + $0x370] sm:$0xff] }
  0x2e   : > { %572 = vst [vmem:[%s5275_s24 + $0xd8] sm:$0xff] %v571_v28  ;;  %v629_v57 = vld [vmem:[%s5270_s23 + $0x380] sm:$0xff]  ;;  %v631_v58 = vld [vmem:[%s5270_s23 + $0x390] sm:$0xff] }
  0x2f   : > { %574 = vst [vmem:[%s5275_s24 + $0xe0] sm:$0xff] %v573_v29  ;;  %v633_v59 = vld [vmem:[%s5270_s23 + $0x3a0] sm:$0xff]  ;;  %v635_v60 = vld [vmem:[%s5270_s23 + $0x3b0] sm:$0xff] }
  0x30   : > { %576 = vst [vmem:[%s5275_s24 + $0xe8] sm:$0xff] %v575_v30  ;;  %v637_v61 = vld [vmem:[%s5270_s23 + $0x3c0] sm:$0xff]  ;;  %v639_v62 = vld [vmem:[%s5270_s23 + $0x3d0] sm:$0xff] }
  0x31   : > { %578 = vst [vmem:[%s5275_s24 + $0xf0] sm:$0xff] %v577_v31  ;;  %v641_v63 = vld [vmem:[%s5270_s23 + $0x3e0] sm:$0xff]  ;;  %v643_v0 = vld [vmem:[%s5270_s23 + $0x3f0] sm:$0xff] }
  0x32   : > { %580 = vst [vmem:[%s5275_s24 + $0xf8] sm:$0xff] %v579_v32  ;;  %v645_v1 = vld [vmem:[%s5270_s23 + $0x400] sm:$0xff]  ;;  %v647_v2 = vld [vmem:[%s5270_s23 + $0x410] sm:$0xff] }
  0x33   : > { %582 = vst [vmem:[%s5275_s24 + $0x100] sm:$0xff] %v581_v33  ;;  %v649_v3 = vld [vmem:[%s5270_s23 + $0x420] sm:$0xff]  ;;  %v651_v4 = vld [vmem:[%s5270_s23 + $0x430] sm:$0xff] }
  0x34   : > { %584 = vst [vmem:[%s5275_s24 + $0x108] sm:$0xff] %v583_v34  ;;  %v653_v5 = vld [vmem:[%s5270_s23 + $0x440] sm:$0xff]  ;;  %v655_v6 = vld [vmem:[%s5270_s23 + $0x450] sm:$0xff] }
  0x35   : > { %586 = vst [vmem:[%s5275_s24 + $0x110] sm:$0xff] %v585_v35  ;;  %v657_v7 = vld [vmem:[%s5270_s23 + $0x460] sm:$0xff]  ;;  %v659_v8 = vld [vmem:[%s5270_s23 + $0x470] sm:$0xff] }
  0x36   : > { %588 = vst [vmem:[%s5275_s24 + $0x118] sm:$0xff] %v587_v36  ;;  %v661_v9 = vld [vmem:[%s5270_s23 + $0x480] sm:$0xff]  ;;  %v663_v10 = vld [vmem:[%s5270_s23 + $0x490] sm:$0xff] }
  0x37   : > { %590 = vst [vmem:[%s5275_s24 + $0x120] sm:$0xff] %v589_v37  ;;  %v665_v11 = vld [vmem:[%s5270_s23 + $0x4a0] sm:$0xff]  ;;  %v667_v12 = vld [vmem:[%s5270_s23 + $0x4b0] sm:$0xff] }
  0x38   : > { %592 = vst [vmem:[%s5275_s24 + $0x128] sm:$0xff] %v591_v38  ;;  %v669_v13 = vld [vmem:[%s5270_s23 + $0x4c0] sm:$0xff]  ;;  %v671_v14 = vld [vmem:[%s5270_s23 + $0x4d0] sm:$0xff] }
  0x39   : > { %594 = vst [vmem:[%s5275_s24 + $0x130] sm:$0xff] %v593_v39  ;;  %v673_v15 = vld [vmem:[%s5270_s23 + $0x4e0] sm:$0xff]  ;;  %v675_v16 = vld [vmem:[%s5270_s23 + $0x4f0] sm:$0xff] }
  0x3a   : > { %596 = vst [vmem:[%s5275_s24 + $0x138] sm:$0xff] %v595_v40  ;;  %v677_v17 = vld [vmem:[%s5270_s23 + $0x500] sm:$0xff]  ;;  %v679_v18 = vld [vmem:[%s5270_s23 + $0x510] sm:$0xff] }
  0x3b   : > { %598 = vst [vmem:[%s5275_s24 + $0x140] sm:$0xff] %v597_v41  ;;  %v681_v19 = vld [vmem:[%s5270_s23 + $0x520] sm:$0xff]  ;;  %v683_v20 = vld [vmem:[%s5270_s23 + $0x530] sm:$0xff] }
  0x3c   : > { %600 = vst [vmem:[%s5275_s24 + $0x148] sm:$0xff] %v599_v42  ;;  %v685_v21 = vld [vmem:[%s5270_s23 + $0x540] sm:$0xff]  ;;  %v687_v22 = vld [vmem:[%s5270_s23 + $0x550] sm:$0xff] }
  0x3d   : > { %602 = vst [vmem:[%s5275_s24 + $0x150] sm:$0xff] %v601_v43  ;;  %v689_v23 = vld [vmem:[%s5270_s23 + $0x560] sm:$0xff]  ;;  %v691_v24 = vld [vmem:[%s5270_s23 + $0x570] sm:$0xff] }
  0x3e   : > { %604 = vst [vmem:[%s5275_s24 + $0x158] sm:$0xff] %v603_v44  ;;  %v693_v25 = vld [vmem:[%s5270_s23 + $0x580] sm:$0xff]  ;;  %v695_v26 = vld [vmem:[%s5270_s23 + $0x590] sm:$0xff] }
  0x3f   : > { %606 = vst [vmem:[%s5275_s24 + $0x160] sm:$0xff] %v605_v45  ;;  %v697_v27 = vld [vmem:[%s5270_s23 + $0x5a0] sm:$0xff]  ;;  %v699_v28 = vld [vmem:[%s5270_s23 + $0x5b0] sm:$0xff] }
  0x40   : > { %608 = vst [vmem:[%s5275_s24 + $0x168] sm:$0xff] %v607_v46  ;;  %v701_v29 = vld [vmem:[%s5270_s23 + $0x5c0] sm:$0xff]  ;;  %v703_v30 = vld [vmem:[%s5270_s23 + $0x5d0] sm:$0xff] }
  0x41   : > { %610 = vst [vmem:[%s5275_s24 + $0x170] sm:$0xff] %v609_v47  ;;  %v705_v31 = vld [vmem:[%s5270_s23 + $0x5e0] sm:$0xff]  ;;  %v707_v32 = vld [vmem:[%s5270_s23 + $0x5f0] sm:$0xff] }
  0x42   : > { %612 = vst [vmem:[%s5275_s24 + $0x178] sm:$0xff] %v611_v48  ;;  %v709_v33 = vld [vmem:[%s5270_s23 + $0x600] sm:$0xff]  ;;  %v711_v34 = vld [vmem:[%s5270_s23 + $0x610] sm:$0xff] }
  0x43   : > { %614 = vst [vmem:[%s5275_s24 + $0x180] sm:$0xff] %v613_v49  ;;  %v713_v35 = vld [vmem:[%s5270_s23 + $0x620] sm:$0xff]  ;;  %v715_v36 = vld [vmem:[%s5270_s23 + $0x630] sm:$0xff] }
  0x44   : > { %616 = vst [vmem:[%s5275_s24 + $0x188] sm:$0xff] %v615_v50 }
  0x45   : > { %618 = vst [vmem:[%s5275_s24 + $0x190] sm:$0xff] %v617_v51 }
  0x46   : > { %620 = vst [vmem:[%s5275_s24 + $0x198] sm:$0xff] %v619_v52 }
  0x47   : > { %622 = vst [vmem:[%s5275_s24 + $0x1a0] sm:$0xff] %v621_v53 }
  0x48   : > { %624 = vst [vmem:[%s5275_s24 + $0x1a8] sm:$0xff] %v623_v54 }
  0x49   : > { %626 = vst [vmem:[%s5275_s24 + $0x1b0] sm:$0xff] %v625_v55 }
  0x4a   : > { %628 = vst [vmem:[%s5275_s24 + $0x1b8] sm:$0xff] %v627_v56 }
  0x4b   : > { %630 = vst [vmem:[%s5275_s24 + $0x1c0] sm:$0xff] %v629_v57 }
  0x4c   : > { %632 = vst [vmem:[%s5275_s24 + $0x1c8] sm:$0xff] %v631_v58 }
  0x4d   : > { %634 = vst [vmem:[%s5275_s24 + $0x1d0] sm:$0xff] %v633_v59 }
  0x4e   : > { %636 = vst [vmem:[%s5275_s24 + $0x1d8] sm:$0xff] %v635_v60 }
  0x4f   : > { %638 = vst [vmem:[%s5275_s24 + $0x1e0] sm:$0xff] %v637_v61 }
  0x50   : > { %640 = vst [vmem:[%s5275_s24 + $0x1e8] sm:$0xff] %v639_v62 }
  0x51   : > { %642 = vst [vmem:[%s5275_s24 + $0x1f0] sm:$0xff] %v641_v63 }
  0x52   : > { %644 = vst [vmem:[%s5275_s24 + $0x1f8] sm:$0xff] %v643_v0 }
  0x53   : > { %646 = vst [vmem:[%s5275_s24 + $0x200] sm:$0xff] %v645_v1 }
  0x54   : > { %648 = vst [vmem:[%s5275_s24 + $0x208] sm:$0xff] %v647_v2 }
  0x55   : > { %650 = vst [vmem:[%s5275_s24 + $0x210] sm:$0xff] %v649_v3 }
  0x56   : > { %652 = vst [vmem:[%s5275_s24 + $0x218] sm:$0xff] %v651_v4 }
  0x57   : > { %654 = vst [vmem:[%s5275_s24 + $0x220] sm:$0xff] %v653_v5 }
  0x58   : > { %656 = vst [vmem:[%s5275_s24 + $0x228] sm:$0xff] %v655_v6 }
  0x59   : > { %658 = vst [vmem:[%s5275_s24 + $0x230] sm:$0xff] %v657_v7 }
  0x5a   : > { %660 = vst [vmem:[%s5275_s24 + $0x238] sm:$0xff] %v659_v8 }
  0x5b   : > { %662 = vst [vmem:[%s5275_s24 + $0x240] sm:$0xff] %v661_v9 }
  0x5c   : > { %664 = vst [vmem:[%s5275_s24 + $0x248] sm:$0xff] %v663_v10 }
  0x5d   : > { %666 = vst [vmem:[%s5275_s24 + $0x250] sm:$0xff] %v665_v11 }
  0x5e   : > { %668 = vst [vmem:[%s5275_s24 + $0x258] sm:$0xff] %v667_v12 }
  0x5f   : > { %670 = vst [vmem:[%s5275_s24 + $0x260] sm:$0xff] %v669_v13 }
  0x60   : > { %672 = vst [vmem:[%s5275_s24 + $0x268] sm:$0xff] %v671_v14 }
  0x61   : > { %674 = vst [vmem:[%s5275_s24 + $0x270] sm:$0xff] %v673_v15 }
  0x62   : > { %676 = vst [vmem:[%s5275_s24 + $0x278] sm:$0xff] %v675_v16 }
  0x63   : > { %678 = vst [vmem:[%s5275_s24 + $0x280] sm:$0xff] %v677_v17 }
  0x64   : > { %680 = vst [vmem:[%s5275_s24 + $0x288] sm:$0xff] %v679_v18 }
  0x65   : > { %682 = vst [vmem:[%s5275_s24 + $0x290] sm:$0xff] %v681_v19 }
  0x66   : > { %684 = vst [vmem:[%s5275_s24 + $0x298] sm:$0xff] %v683_v20 }
  0x67   : > { %686 = vst [vmem:[%s5275_s24 + $0x2a0] sm:$0xff] %v685_v21 }
  0x68   : > { %688 = vst [vmem:[%s5275_s24 + $0x2a8] sm:$0xff] %v687_v22 }
  0x69   : > { %690 = vst [vmem:[%s5275_s24 + $0x2b0] sm:$0xff] %v689_v23 }
  0x6a   : > { %692 = vst [vmem:[%s5275_s24 + $0x2b8] sm:$0xff] %v691_v24 }
  0x6b   : > { %694 = vst [vmem:[%s5275_s24 + $0x2c0] sm:$0xff] %v693_v25 }
  0x6c   : > { %696 = vst [vmem:[%s5275_s24 + $0x2c8] sm:$0xff] %v695_v26 }
  0x6d   : > { %698 = vst [vmem:[%s5275_s24 + $0x2d0] sm:$0xff] %v697_v27 }
  0x6e   : > { %700 = vst [vmem:[%s5275_s24 + $0x2d8] sm:$0xff] %v699_v28 }
  0x6f   : > { %702 = vst [vmem:[%s5275_s24 + $0x2e0] sm:$0xff] %v701_v29 }
  0x70   : > { %704 = vst [vmem:[%s5275_s24 + $0x2e8] sm:$0xff] %v703_v30 }
  0x71   : > { %706 = vst [vmem:[%s5275_s24 + $0x2f0] sm:$0xff] %v705_v31 }
  0x72   : > { %708 = vst [vmem:[%s5275_s24 + $0x2f8] sm:$0xff] %v707_v32 }
  0x73   : > { %710 = vst [vmem:[%s5275_s24 + $0x300] sm:$0xff] %v709_v33 }
  0x74   : > { %712 = vst [vmem:[%s5275_s24 + $0x308] sm:$0xff] %v711_v34 }
  0x75   : > { %714 = vst [vmem:[%s5275_s24 + $0x310] sm:$0xff] %v713_v35 }
  0x76   : > { %716 = vst [vmem:[%s5275_s24 + $0x318] sm:$0xff] %v715_v36 }
  0x77 PF: > { %p4907_p5 = scmp.ge.s32.totalorder %s5172_s13, 1  ;;  %p728_p6 = scmp.lt.s32.totalorder %s5172_s13, 3 }
  0x79   : > { %p729_p7 = pnand %p4907_p5, %p728_p6 }
  0x7b   : > { %732 = sbr.rel (%p729_p7) target bundleno = 1448 (0x5a8), region = 90 }
  0x80   : > { %s735_s25 = sand.u32 1, %s5164_s11   ;;  %s5174_s28 = smov 40   ;;  %vm2437_vm0 = vcmask 1043456   ;;  %vm1784_vm1 = vcmask 64512   ;;  %vm1881_vm2 = vcmask 130048   ;;  %vm1946_vm3 = vcmask 195584  }
  0x81   : > { %s5045_s26 = smul.u32 800, %s735_s25  ;;  %s5175_s29 = smov 24   ;;  %vm2011_vm4 = vcmask 261120   ;;  %vm2076_vm5 = vcmask 326656   ;;  %vm2141_vm6 = vcmask 392192   ;;  %vm2206_vm7 = vcmask 457728  }
  0x82   : > { %s5176_s30 = smov 8   ;;  %s5177_s10 = smov 48   ;;  %vm2271_vm8 = vcmask 523264   ;;  %vm2372_vm9 = vcmask 588800  }
  0x83   : > { %s5477_s27 = scalar_lea.vmem [#allocation3], %s5045_s26  ;;  %s5178_s11 = smov 32  }
  0x84   : > { %v794_v37 = vld [vmem:[%s5477_s27 + $0x60] sm:$0xff]  ;;  %v795_v38 = vld [vmem:[%s5477_s27 + $0x68] sm:$0xff]  ;;  %v792_v39 = vld [vmem:[%s5477_s27 + $0x50] sm:$0xff]  ;;  %s5179_s15 = smov 16   ;;  %s5180_s16 = smov 64  }
  0x85   : > { %v894_v40 = vpack.c.bf16 %v794_v37, %v794_v37  ;;  %v895_v41 = vpack.c.bf16 %v795_v38, %v795_v38  ;;  %v793_v42 = vld [vmem:[%s5477_s27 + $0x58] sm:$0xff]  ;;  %v892_v43 = vpack.c.bf16 %v792_v39, %v792_v39  ;;  %v783_v44 = vld [vmem:[%s5477_s27 + $0x8] sm:$0xff]  ;;  %v784_v45 = vld [vmem:[%s5477_s27 + $0x10] sm:$0xff]  ;;  %s5181_s18 = smov 56   ;;  %p773_p8 = scmp.lt.s32.totalorder %s4902_s8, 1 }
  0x86   : > { %v893_v46 = vpack.c.bf16 %v793_v42, %v793_v42  ;;  %v883_v47 = vpack.c.bf16 %v783_v44, %v783_v44  ;;  %v884_v48 = vpack.c.bf16 %v784_v45, %v784_v45  ;;  %v802_v49 = vld [vmem:[%s5477_s27 + $0xa0] sm:$0xff]  ;;  %v803_v50 = vld [vmem:[%s5477_s27 + $0xa8] sm:$0xff]  ;;  %v785_v54 = vld [vmem:[%s5477_s27 + $0x18] sm:$0xff] }
  0x87   : > { %v1056_v51 = vunpack.c.l.b16 %v894_v40  ;;  %v1057_v52 = vunpack.c.l.b16 %v895_v41  ;;  %v1054_v53 = vunpack.c.l.b16 %v892_v43  ;;  %v902_v58 = vpack.c.bf16 %v802_v49, %v802_v49  ;;  %v804_v3 = vld [vmem:[%s5477_s27 + $0xb0] sm:$0xff]  ;;  %v786_v4 = vld [vmem:[%s5477_s27 + $0x20] sm:$0xff]  ;;  %v805_v5 = vld [vmem:[%s5477_s27 + $0xb8] sm:$0xff]  ;;  %s7740_s8 = smov (!%p773_p8, %s4902_s8), 1 }
  0x88   : > { %v1055_v55 = vunpack.c.l.b16 %v893_v46  ;;  %v5488_v56 = vunpack.c.l.b16 %v883_v47  ;;  %v1048_v57 = vunpack.c.l.b16 %v884_v48  ;;  %v903_v60 = vpack.c.bf16 %v803_v50, %v803_v50  ;;  %v796_v15 = vld [vmem:[%s5477_s27 + $0x70] sm:$0xff]  ;;  %v787_v16 = vld [vmem:[%s5477_s27 + $0x28] sm:$0xff]  ;;  %v806_v24 = vld [vmem:[%s5477_s27 + $0xc0] sm:$0xff]  ;;  %s4908_s21 = sshll.u32 %s7740_s8, 3 }
  0x89   : > { %v5490_v59 = vpack.c.b16 %v1057_v52, %v1056_v51  ;;  %v885_v61 = vpack.c.bf16 %v785_v54, %v785_v54  ;;  %v1062_v0 = vunpack.c.l.b16 %v902_v58  ;;  %v886_v7 = vpack.c.bf16 %v786_v4, %v786_v4  ;;  %v797_v25 = vld [vmem:[%s5477_s27 + $0x78] sm:$0xff]  ;;  %v788_v32 = vld [vmem:[%s5477_s27 + $0x30] sm:$0xff]  ;;  %v807_v34 = vld [vmem:[%s5477_s27 + $0xc8] sm:$0xff]  ;;  %s776_s23 = scalar_lea.vmem %s7687_s1, %s4908_s21  ;;  %s780_s19 = scalar_lea.vmem %s7695_s9, %s4908_s21 }
  0x8a   : > { %v5492_v62 = vpack.c.b16 %v1055_v55, %v1054_v53  ;;  %v1158_v63 = vpack.c.b16 %v1048_v57, %v5488_v56  ;;  %v1063_v1 = vunpack.c.l.b16 %v903_v60  ;;  %v5505_v8 = vpack.c.b16 %v1056_v51, %v1055_v55  ;;  %v789_v33 = vld [vmem:[%s5477_s27 + $0x38] sm:$0xff]  ;;  %v798_v43 = vld [vmem:[%s5477_s27 + $0x80] sm:$0xff]  ;;  %v799_v44 = vld [vmem:[%s5477_s27 + $0x88] sm:$0xff] }
  0x8b   : > { %1499 = vrot.lane.b32.xlu2 %v5490_v59, %s5174_s28  ;;  %v1049_v2 = vunpack.c.l.b16 %v885_v61  ;;  %v904_v10 = vpack.c.bf16 %v804_v3, %v804_v3  ;;  %v905_v11 = vpack.c.bf16 %v805_v5, %v805_v5  ;;  %v1050_v12 = vunpack.c.l.b16 %v886_v7  ;;  %v809_v53 = vld [vmem:[%s5477_s27 + $0xd8] sm:$0xff] }
  0x8c   : > { %1362 = vrot.lane.b32.xlu1 %v5492_v62, %s5175_s29  ;;  %1190 = vrot.lane.b32.xlu0 %v1158_v63, %s5176_s30  ;;  %v5503_v6 = vpack.c.b16 %v1063_v1, %v1062_v0  ;;  %v896_v18 = vpack.c.bf16 %v796_v15, %v796_v15  ;;  %v887_v21 = vpack.c.bf16 %v787_v16, %v787_v16  ;;  %v790_v63 = vld [vmem:[%s5477_s27 + $0x40] sm:$0xff]  ;;  %v791_v0 = vld [vmem:[%s5477_s27 + $0x48] sm:$0xff] }
  0x8d   : > { %v5507_v9 = vpack.c.b16 %v1049_v2, %v1048_v57  ;;  %v1064_v13 = vunpack.c.l.b16 %v904_v10  ;;  %v1065_v14 = vunpack.c.l.b16 %v905_v11  ;;  %v1159_v17 = vpack.c.b16 %v1050_v12, %v1049_v2  ;;  %v800_v10 = vld [vmem:[%s5477_s27 + $0x90] sm:$0xff]  ;;  %v801_v11 = vld [vmem:[%s5477_s27 + $0x98] sm:$0xff] }
  0x8e   : > { %v1058_v22 = vunpack.c.l.b16 %v896_v18  ;;  %v1051_v23 = vunpack.c.l.b16 %v887_v21  ;;  %v906_v27 = vpack.c.bf16 %v806_v24, %v806_v24  ;;  %v897_v29 = vpack.c.bf16 %v797_v25, %v797_v25  ;;  %v810_v18 = vld [vmem:[%s5477_s27 + $0xe0] sm:$0xff]  ;;  %v811_v21 = vld [vmem:[%s5477_s27 + $0xe8] sm:$0xff] }
  0x8f   : > { %v5517_v19 = vpack.c.b16 %v1065_v14, %v1064_v13  ;;  %v5519_v20 = vpack.c.b16 %v1064_v13, %v1063_v1  ;;  %v888_v36 = vpack.c.bf16 %v788_v32, %v788_v32  ;;  %v889_v37 = vpack.c.bf16 %v789_v33, %v789_v33  ;;  %v2344_v32 = vld [vmem:[%s7689_s3 + $0x20] sm:$0xf] }
  0x90   : > { %v5528_v26 = vpack.c.b16 %v1058_v22, %v1057_v52  ;;  %v5530_v28 = vpack.c.b16 %v1051_v23, %v1050_v12  ;;  %v1066_v30 = vunpack.c.l.b16 %v906_v27  ;;  %v1059_v31 = vunpack.c.l.b16 %v897_v29  ;;  %v808_v52 = vld [vmem:[%s5477_s27 + $0xd0] sm:$0xff] }
  0x91   : > { %v907_v38 = vpack.c.bf16 %v807_v34, %v807_v34  ;;  %v1052_v40 = vunpack.c.l.b16 %v888_v36  ;;  %v1053_v41 = vunpack.c.l.b16 %v889_v37  ;;  %v898_v46 = vpack.c.bf16 %v798_v43, %v798_v43  ;;  %v813_v36 = vld [vmem:[%s5477_s27 + $0xf8] sm:$0xff]  ;;  %v814_v37 = vld [vmem:[%s5477_s27 + $0x100] sm:$0xff] }
  0x92   : > { %v5541_v35 = vpack.c.b16 %v1066_v30, %v1065_v14  ;;  %v5543_v39 = vpack.c.b16 %v1059_v31, %v1058_v22  ;;  %v899_v47 = vpack.c.bf16 %v799_v44, %v799_v44  ;;  %v908_v55 = vpack.c.bf16 %v808_v52, %v808_v52 }
  0x93   : > { %1583 = vrot.lane.b32.xlu2 %v5503_v6, %s5177_s10  ;;  %v1067_v42 = vunpack.c.l.b16 %v907_v38  ;;  %v5553_v45 = vpack.c.b16 %v1053_v41, %v1052_v40  ;;  %v1160_v49 = vpack.c.b16 %v1052_v40, %v1051_v23  ;;  %v1060_v50 = vunpack.c.l.b16 %v898_v46  ;;  %v812_v38 = vld [vmem:[%s5477_s27 + $0xf0] sm:$0xff] }
  0x94   : > { %1432 = vrot.lane.b32.xlu1 %v5505_v8, %s5178_s11  ;;  %1278 = vrot.lane.b32.xlu0 %v5507_v9, %s5179_s15  ;;  %v1061_v51 = vunpack.c.l.b16 %v899_v47  ;;  %v909_v57 = vpack.c.bf16 %v809_v53, %v809_v53  ;;  %v1068_v60 = vunpack.c.l.b16 %v908_v55  ;;  %v890_v3 = vpack.c.bf16 %v790_v63, %v790_v63 }
  0x95   : > { %v5555_v48 = vpack.c.b16 %v1067_v42, %v1066_v30  ;;  %v5566_v58 = vpack.c.b16 %v1060_v50, %v1059_v31  ;;  %v891_v4 = vpack.c.bf16 %v791_v0, %v791_v0  ;;  %v900_v14 = vpack.c.bf16 %v800_v10, %v800_v10 }
  0x96   : > { %v5564_v54 = vpack.c.b16 %v1061_v51, %v1060_v50  ;;  %v1069_v61 = vunpack.c.l.b16 %v909_v57  ;;  %v5578_v2 = vpack.c.b16 %v1068_v60, %v1067_v42  ;;  %v1150_v5 = vunpack.c.l.b16 %v890_v3  ;;  %v5026_v57 = vld [vmem:[%s7689_s3 + $0x8] sm:$0xff]  ;;  %v816_v3 = vld [vmem:[%s5477_s27 + $0x110] sm:$0xff] }
  0x97   : > { %v1262_v7 = vunpack.c.l.b16 %v891_v4  ;;  %v901_v15 = vpack.c.bf16 %v801_v11, %v801_v11  ;;  %v1151_v16 = vunpack.c.l.b16 %v900_v14  ;;  %v910_v24 = vpack.c.bf16 %v810_v18, %v810_v18  ;;  %v817_v4 = vld [vmem:[%s5477_s27 + $0x118] sm:$0xff] }
  0x98   : > { %v5576_v1 = vpack.c.b16 %v1069_v61, %v1068_v60  ;;  %v1161_v13 = vpack.c.b16 %v1150_v5, %v1053_v41  ;;  %v911_v25 = vpack.c.bf16 %v811_v21, %v811_v21  ;;  %v2362_v33 = vunpack.c.l.b16 %v2344_v32 }
  0x99   : > { %v1270_v12 = vpack.c.b16 %v1262_v7, %v1150_v5  ;;  %v5596_v23 = vpack.c.b16 %v1151_v16, %v1061_v51  ;;  %v1152_v27 = vunpack.c.l.b16 %v910_v24  ;;  %v913_v41 = vpack.c.bf16 %v813_v36, %v813_v36  ;;  %v815_v51 = vld [vmem:[%s5477_s27 + $0x108] sm:$0xff]  ;;  %v782_v7 = vld [vmem:[%s5477_s27] sm:$0xff] }
  0x9a   : > { %v1264_v29 = vunpack.c.l.b16 %v911_v25  ;;  %v2367_v34 = vpack.c.b16 %v2362_v33, %v2362_v33  ;;  %v914_v42 = vpack.c.bf16 %v814_v37, %v814_v37  ;;  %v912_v43 = vpack.c.bf16 %v812_v38, %v812_v38  ;;  %v818_v38 = vld [vmem:[%s5477_s27 + $0x120] sm:$0xff] }
  0x9b   : > { %1192 = vrot.lane.b32.xlu2 %v1159_v17, %s5176_s30  ;;  %v1263_v17 = vunpack.c.l.b16 %v901_v15  ;;  %v5606_v31 = vpack.c.b16 %v1152_v27, %v1069_v61  ;;  %v1071_v44 = vunpack.c.l.b16 %v913_v41  ;;  %v915_v55 = vpack.c.bf16 %v815_v51, %v815_v51  ;;  %v5025_v61 = vld [vmem:[%s7689_s3] sm:$0xff] }
  0x9c   : > { %1720 = vrot.lane.b32.xlu1 %v5517_v19, %s5180_s16  ;;  %1653 = vrot.lane.b32.xlu0 %v5519_v20, %s5181_s18  ;;  %v5604_v30 = vpack.c.b16 %v1264_v29, %v1152_v27  ;;  %v2439_v40 = vsel %vm2437_vm0, %v2367_v34, 0  ;;  %v1072_v46 = vunpack.c.l.b16 %v914_v42  ;;  %v1070_v47 = vunpack.c.l.b16 %v912_v43 }
  0x9d   : > { %v5594_v22 = vpack.c.b16 %v1263_v17, %v1151_v16  ;;  %2444 = vmatpush.bf16.msra.mxu0 %v2439_v40  ;;  %5029 = vmatpush.bf16.msra.mxu1 %v2439_v40  ;;  %v1073_v60 = vunpack.c.l.b16 %v915_v55  ;;  %v916_v10 = vpack.c.bf16 %v816_v3, %v816_v3  ;;  %v917_v11 = vpack.c.bf16 %v817_v4, %v817_v4 }
  0x9e   : > { %5031 = vmatpush.bf16.msra.mxu3 %v2439_v40  ;;  %5030 = vmatpush.bf16.msra.mxu2 %v2439_v40  ;;  %v5636_v52 = vpack.c.b16 %v1072_v46, %v1071_v44  ;;  %v5638_v53 = vpack.c.b16 %v1071_v44, %v1070_v47  ;;  %v819_v40 = vld [vmem:[%s5477_s27 + $0x128] sm:$0xff] }
  0x9f   : > { %v5652_v0 = vpack.c.b16 %v1073_v60, %v1072_v46  ;;  %v1075_v14 = vunpack.c.l.b16 %v917_v11  ;;  %v918_v46 = vpack.c.bf16 %v818_v38, %v818_v38  ;;  %v919_v47 = vpack.c.bf16 %v819_v40, %v819_v40  ;;  %v824_v40 = vld [vmem:[%s5477_s27 + $0x150] sm:$0xff] }
  0xa3   : > { %1434 = vrot.lane.b32.xlu2 %v5528_v26, %s5178_s11 }
  0xa4   : > { %1364 = vrot.lane.b32.xlu1 %v5490_v59, %s5175_s29  ;;  %1280 = vrot.lane.b32.xlu0 %v5530_v28, %s5179_s15 }
  0xab   : > { %1655 = vrot.lane.b32.xlu2 %v5541_v35, %s5181_s18 }
  0xac   : > { %1585 = vrot.lane.b32.xlu1 %v5517_v19, %s5177_s10  ;;  %1501 = vrot.lane.b32.xlu0 %v5543_v39, %s5174_s28 }
  0xb3   : > { %1282 = vrot.lane.b32.xlu2 %v5553_v45, %s5179_s15 }
  0xb4   : > { %1194 = vrot.lane.b32.xlu1 %v1160_v49, %s5176_s30  ;;  %1722 = vrot.lane.b32.xlu0 %v5555_v48, %s5180_s16  ;;  %v5027_v49 = vld [vmem:[%s7689_s3 + $0x10] sm:$0xff] }
  0xbb   : > { %1503 = vrot.lane.b32.xlu2 %v5564_v54, %s5174_s28 }
  0xbc   : > { %1436 = vrot.lane.b32.xlu1 %v5566_v58, %s5178_s11  ;;  %1366 = vrot.lane.b32.xlu0 %v5543_v39, %s5175_s29 }
  0xc3   : > { %1724 = vrot.lane.b32.xlu2 %v5576_v1, %s5180_s16 }
  0xc4   : > { %1657 = vrot.lane.b32.xlu1 %v5578_v2, %s5181_s18  ;;  %1587 = vrot.lane.b32.xlu0 %v5555_v48, %s5177_s10 }
  0xcb   : > { %1368 = vrot.lane.b32.xlu2 %v5564_v54, %s5175_s29 }
  0xcc   : > { %1284 = vrot.lane.b32.xlu1 %v1270_v12, %s5179_s15  ;;  %1196 = vrot.lane.b32.xlu0 %v1161_v13, %s5176_s30  ;;  %v882_v12 = vpack.c.bf16 %v782_v7, %v782_v7  ;;  %v1074_v13 = vunpack.c.l.b16 %v916_v10 }
  0xce   : > { %v1046_v15 = vunpack.c.l.b16 %v882_v12  ;;  %v5669_v18 = vpack.c.b16 %v1075_v14, %v1074_v13  ;;  %v5671_v21 = vpack.c.b16 %v1074_v13, %v1073_v60 }
  0xd0   : > { %v1110_v24 = vpack.c.b16 %v5488_v56, %v1046_v15  ;;  %v821_v15 = vld [vmem:[%s5477_s27 + $0x138] sm:$0xff] }
  0xd3   : > { %1589 = vrot.lane.b32.xlu2 %v5576_v1, %s5177_s10 }
  0xd4   : > { %1505 = vrot.lane.b32.xlu1 %v5594_v22, %s5174_s28  ;;  %1438 = vrot.lane.b32.xlu0 %v5596_v23, %s5178_s11 }
  0xdb   : > { %1198 = vrot.lane.b32.xlu2 %v5505_v8, %s5176_s30  ;;  %v5028_v8 = vld [vmem:[%s7689_s3 + $0x18] sm:$0xff] }
  0xdc   : > { %1726 = vrot.lane.b32.xlu1 %v5604_v30, %s5180_s16  ;;  %1659 = vrot.lane.b32.xlu0 %v5606_v31, %s5181_s18 }
  0xdd   : > { %2445 = vmatpush.bf16.msra.mxu0 %v5028_v8  ;;  %5032 = vmatpush.bf16.msra.mxu1 %v5028_v8 }
  0xde   : > { %5034 = vmatpush.bf16.msra.mxu3 %v5028_v8  ;;  %5033 = vmatpush.bf16.msra.mxu2 %v5028_v8 }
  0xe1   : > { %2446 = vmatpush.bf16.msra.mxu0 %v5027_v49  ;;  %5035 = vmatpush.bf16.msra.mxu1 %v5027_v49 }
  0xe2   : > { %5037 = vmatpush.bf16.msra.mxu3 %v5027_v49  ;;  %5036 = vmatpush.bf16.msra.mxu2 %v5027_v49  ;;  %v1077_v49 = vunpack.c.l.b16 %v919_v47 }
  0xe3   : > { %1440 = vrot.lane.b32.xlu2 %v5519_v20, %s5178_s11 }
  0xe4   : > { %1370 = vrot.lane.b32.xlu1 %v5503_v6, %s5175_s29  ;;  %1286 = vrot.lane.b32.xlu0 %v5490_v59, %s5179_s15 }
  0xe5   : > { %v5633_v50 = vpop.permute.xlu2 %1499  ;;  %2447 = vmatpush.bf16.msra.mxu0 %v5026_v57  ;;  %5038 = vmatpush.bf16.msra.mxu1 %v5026_v57 }
  0xe6   : > { %5040 = vmatpush.bf16.msra.mxu3 %v5026_v57  ;;  %5039 = vmatpush.bf16.msra.mxu2 %v5026_v57 }
  0xe9   : > { %2448 = vmatpush.bf16.msra.mxu0 %v5025_v61  ;;  %5041 = vmatpush.bf16.msra.mxu1 %v5025_v61 }
  0xea   : > { %5043 = vmatpush.bf16.msra.mxu3 %v5025_v61  ;;  %5042 = vmatpush.bf16.msra.mxu2 %v5025_v61 }
  0xeb   : > { %1661 = vrot.lane.b32.xlu2 %v5636_v52, %s5181_s18 }
  0xec   : > { %1591 = vrot.lane.b32.xlu1 %v5638_v53, %s5177_s10  ;;  %1507 = vrot.lane.b32.xlu0 %v5517_v19, %s5174_s28 }
  0xed   : > { %v1584_v63 = vpop.permute.xlu2 %1583 }
  0xf3   : > { %1288 = vrot.lane.b32.xlu2 %v5543_v39, %s5179_s15 }
  0xf4   : > { %1200 = vrot.lane.b32.xlu1 %v5528_v26, %s5176_s30  ;;  %1728 = vrot.lane.b32.xlu0 %v5652_v0, %s5180_s16 }
  0xf5   : > { %v1193_v5 = vpop.permute.xlu2 %1192 }
  0xf6   : > { %v1790_v51 = vsel %vm1784_vm1, %v5507_v9, %v1193_v5  ;;  %v820_v9 = vld [vmem:[%s5477_s27 + $0x130] sm:$0xff] }
  0xf7   : > { %v920_v11 = vpack.c.bf16 %v820_v9, %v820_v9 }
  0xf9   : > { %v1153_v13 = vunpack.c.l.b16 %v920_v11 }
  0xfb   : > { %1509 = vrot.lane.b32.xlu2 %v5555_v48, %s5174_s28 }
  0xfc   : > { %1442 = vrot.lane.b32.xlu1 %v5541_v35, %s5178_s11  ;;  %1372 = vrot.lane.b32.xlu0 %v5517_v19, %s5175_s29 }
  0xfd   : > { %v1435_v26 = vpop.permute.xlu2 %1434 }
  0xfe   : > { %v1363_v16 = vpop.permute.xlu1 %1362  ;;  %v1191_v17 = vpop.permute.xlu0 %1190 }
  0xff   : > { %v1787_v27 = vsel %vm1784_vm1, %v1110_v24, %v1191_v17 }
 0x103   : > { %1730 = vrot.lane.b32.xlu2 %v5669_v18, %s5180_s16 }
 0x104   : > { %1663 = vrot.lane.b32.xlu1 %v5671_v21, %s5181_s18  ;;  %1593 = vrot.lane.b32.xlu0 %v5652_v0, %s5177_s10 }
 0x105   : > { %v1656_v25 = vpop.permute.xlu2 %1655 }
 0x106   : > { %v1433_v29 = vpop.permute.xlu1 %1432  ;;  %v1279_v56 = vpop.permute.xlu0 %1278 }
 0x107   : > { %v1883_v32 = vsel %vm1881_vm2, %v1787_v27, %v1279_v56  ;;  %v5731_v27 = vpack.c.b16 %v1153_v13, %v1077_v49 }
 0x108   : > { %v1948_v33 = vsel %vm1946_vm3, %v1883_v32, %v1363_v16 }
 0x109   : > { %v2013_v34 = vsel %vm2011_vm4, %v1948_v33, %v1433_v29  ;;  %v921_v29 = vpack.c.bf16 %v821_v15, %v821_v15 }
 0x10a   : > { %v2078_v36 = vsel %vm2076_vm5, %v2013_v34, %v5633_v50 }
 0x10b   : > { %1374 = vrot.lane.b32.xlu2 %v5555_v48, %s5175_s29  ;;  %v2143_v8 = vsel %vm2141_vm6, %v2078_v36, %v1584_v63 }
 0x10c   : > { %1290 = vrot.lane.b32.xlu1 %v5564_v54, %s5179_s15  ;;  %1202 = vrot.lane.b32.xlu0 %v5566_v58, %s5176_s30  ;;  %v1076_v58 = vunpack.c.l.b16 %v918_v46 }
 0x10d   : > { %v1283_v37 = vpop.permute.xlu2 %1282 }
 0x10e   : > { %v1721_v41 = vpop.permute.xlu1 %1720  ;;  %v1654_v42 = vpop.permute.xlu0 %1653  ;;  %v5706_v60 = vpack.c.b16 %v1077_v49, %v1076_v58  ;;  %v5708_v61 = vpack.c.b16 %v1076_v58, %v1075_v14  ;;  %v924_v58 = vpack.c.bf16 %v824_v40, %v824_v40 }
 0x10f   : > { %v2208_v43 = vsel %vm2206_vm7, %v2143_v8, %v1654_v42  ;;  %v823_v8 = vld [vmem:[%s5477_s27 + $0x148] sm:$0xff] }
 0x110   : > { %v2273_v44 = vsel %vm2271_vm8, %v2208_v43, %v1721_v41  ;;  %v825_v41 = vld [vmem:[%s5477_s27 + $0x158] sm:$0xff] }
 0x111   : > { %4926 = vmatmul.msk.bf16.vlgmr.msra.gmra.mxu0 %vm2372_vm9, %v2273_v44  ;;  %v925_v49 = vpack.c.bf16 %v825_v41, %v825_v41 }
 0x113   : > { %1595 = vrot.lane.b32.xlu2 %v5669_v18, %s5177_s10 }
 0x114   : > { %1511 = vrot.lane.b32.xlu1 %v5576_v1, %s5174_s28  ;;  %1444 = vrot.lane.b32.xlu0 %v5578_v2, %s5178_s11 }
 0x115   : > { %v1504_v50 = vpop.permute.xlu2 %1503 }
 0x116   : > { %v1365_v55 = vpop.permute.xlu1 %1364  ;;  %v1281_v57 = vpop.permute.xlu0 %1280 }
 0x117   : > { %v1885_v63 = vsel %vm1881_vm2, %v1790_v51, %v1281_v57 }
 0x118   : > { %v1950_v3 = vsel %vm1946_vm3, %v1885_v63, %v1365_v55  ;;  %v923_v55 = vpack.c.bf16 %v823_v8, %v823_v8  ;;  %v1080_v63 = vunpack.c.l.b16 %v924_v58 }
 0x119   : > { %v2015_v10 = vsel %vm2011_vm4, %v1950_v3, %v1435_v26  ;;  %v1081_v3 = vunpack.c.l.b16 %v925_v49 }
 0x11b   : > { %1204 = vrot.lane.b32.xlu2 %v5596_v23, %s5176_s30  ;;  %v5768_v11 = vpack.c.b16 %v1081_v3, %v1080_v63 }
 0x11c   : > { %1732 = vrot.lane.b32.xlu1 %v5706_v60, %s5180_s16  ;;  %1665 = vrot.lane.b32.xlu0 %v5708_v61, %s5181_s18 }
 0x11d   : > { %v1725_v4 = vpop.permute.xlu2 %1724 }
 0x11e   : > { %v1586_v5 = vpop.permute.xlu1 %1585  ;;  %v1502_v7 = vpop.permute.xlu0 %1501 }
 0x11f   : > { %v2080_v12 = vsel %vm2076_vm5, %v2015_v10, %v1502_v7 }
 0x120   : > { %v2145_v23 = vsel %vm2141_vm6, %v2080_v12, %v1586_v5 }
 0x121   : > { %v2210_v26 = vsel %vm2206_vm7, %v2145_v23, %v1656_v25  ;;  %v1265_v25 = vunpack.c.l.b16 %v921_v29 }
 0x123   : > { %1446 = vrot.lane.b32.xlu2 %v5606_v31, %s5178_s11  ;;  %v5744_v38 = vpack.c.b16 %v1265_v25, %v1153_v13  ;;  %v827_v25 = vld [vmem:[%s5477_s27 + $0x168] sm:$0xff] }
 0x124   : > { %1376 = vrot.lane.b32.xlu1 %v5576_v1, %s5175_s29  ;;  %1292 = vrot.lane.b32.xlu0 %v5594_v22, %s5179_s15  ;;  %v927_v40 = vpack.c.bf16 %v827_v25, %v827_v25 }
 0x125   : > { %v1369_v14 = vpop.permute.xlu2 %1368 }
 0x126   : > { %v1195_v16 = vpop.permute.xlu1 %1194  ;;  %v1723_v17 = vpop.permute.xlu0 %1722 }
 0x127   : > { %v2275_v24 = vsel %vm2271_vm8, %v2210_v26, %v1723_v17  ;;  %v1793_v22 = vsel %vm1784_vm1, %v5530_v28, %v1195_v16 }
 0x128   : > { %4927 = vmatmul.msk.bf16.gmra.mxu0 %vm2372_vm9, %v2275_v24  ;;  %v1887_v34 = vsel %vm1881_vm2, %v1793_v22, %v1283_v37  ;;  %v822_v37 = vld [vmem:[%s5477_s27 + $0x140] sm:$0xff] }
 0x129   : > { %v826_v22 = vld [vmem:[%s5477_s27 + $0x160] sm:$0xff] }
 0x12b   : > { %1667 = vrot.lane.b32.xlu2 %v5731_v27, %s5181_s18 }
 0x12c   : > { %1597 = vrot.lane.b32.xlu1 %v5706_v60, %s5177_s10  ;;  %1513 = vrot.lane.b32.xlu0 %v5604_v30, %s5174_s28 }
 0x12d   : > { %v1590_v56 = vpop.permute.xlu2 %1589 }
 0x12e   : > { %v1437_v32 = vpop.permute.xlu1 %1436  ;;  %v1367_v33 = vpop.permute.xlu0 %1366 }
 0x12f   : > { %v1952_v36 = vsel %vm1946_vm3, %v1887_v34, %v1367_v33 }
 0x130   : > { %v2017_v28 = vsel %vm2011_vm4, %v1952_v36, %v1437_v32 }
 0x131   : > { %v2082_v44 = vsel %vm2076_vm5, %v2017_v28, %v1504_v50  ;;  %v1079_v50 = vunpack.c.l.b16 %v923_v55  ;;  %v926_v28 = vpack.c.bf16 %v826_v22, %v826_v22 }
 0x133   : > { %1294 = vrot.lane.b32.xlu2 %v5517_v19, %s5179_s15 }
 0x134   : > { %1206 = vrot.lane.b32.xlu1 %v5519_v20, %s5176_s30  ;;  %1734 = vrot.lane.b32.xlu0 %v5744_v38, %s5180_s16  ;;  %v922_v20 = vpack.c.bf16 %v822_v37, %v822_v37 }
 0x135   : > { %v1199_v42 = vpop.permute.xlu2 %1198 }
 0x136   : > { %v1658_v43 = vpop.permute.xlu1 %1657  ;;  %v1588_v46 = vpop.permute.xlu0 %1587  ;;  %v1078_v9 = vunpack.c.l.b16 %v922_v20  ;;  %v1799_v8 = vsel %vm1784_vm1, %v5492_v62, %v1199_v42  ;;  %v828_v62 = vld [vmem:[%s5477_s27 + $0x170] sm:$0xff] }
 0x137   : > { %v2147_v47 = vsel %vm2141_vm6, %v2082_v44, %v1588_v46  ;;  %v928_v20 = vpack.c.bf16 %v828_v62, %v828_v62 }
 0x138   : > { %v2212_v51 = vsel %vm2206_vm7, %v2147_v47, %v1658_v43  ;;  %v5772_v12 = vpack.c.b16 %v1079_v50, %v1078_v9 }
 0x139   : > { %v2277_v57 = vsel %vm2271_vm8, %v2212_v51, %v1725_v4  ;;  %v5770_v4 = vpack.c.b16 %v1080_v63, %v1079_v50  ;;  %v1084_v63 = vunpack.c.l.b16 %v928_v20  ;;  %v829_v50 = vld [vmem:[%s5477_s27 + $0x178] sm:$0xff] }
 0x13a   : > { %4928 = vmatmul.msk.bf16.gmra.mxu0 %vm2372_vm9, %v2277_v57  ;;  %7710 = vst [vmem:[#allocation4_spill] sm:$0xff] %v5772_v12 }
 0x13b   : > { %1515 = vrot.lane.b32.xlu2 %v5652_v0, %s5174_s28 }
 0x13c   : > { %1448 = vrot.lane.b32.xlu1 %v5636_v52, %s5178_s11  ;;  %1378 = vrot.lane.b32.xlu0 %v5638_v53, %s5175_s29 }
 0x13d   : > { %v1441_v5 = vpop.permute.xlu2 %1440 }
 0x13e   : > { %v1285_v7 = vpop.permute.xlu1 %1284  ;;  %v1197_v10 = vpop.permute.xlu0 %1196 }
 0x13f   : > { %v1796_v23 = vsel %vm1784_vm1, %v5553_v45, %v1197_v10 }
 0x140   : > { %v1889_v13 = vsel %vm1881_vm2, %v1796_v23, %v1285_v7 }
 0x141   : > { %v1954_v26 = vsel %vm1946_vm3, %v1889_v13, %v1369_v14  ;;  %v929_v13 = vpack.c.bf16 %v829_v50, %v829_v50 }
 0x143   : > { %1736 = vrot.lane.b32.xlu2 %v5768_v11, %s5180_s16 }
 0x144   : > { %1669 = vrot.lane.b32.xlu1 %v5770_v4, %s5181_s18  ;;  %1599 = vrot.lane.b32.xlu0 %v5772_v12, %s5177_s10 }
 0x145   : > { %v1662_v15 = vpop.permute.xlu2 %1661 }
 0x146   : > { %v1506_v16 = vpop.permute.xlu1 %1505  ;;  %v1439_v17 = vpop.permute.xlu0 %1438 }
 0x147   : > { %v2019_v24 = vsel %vm2011_vm4, %v1954_v26, %v1439_v17  ;;  %v1085_v17 = vunpack.c.l.b16 %v929_v13  ;;  %v835_v13 = vld [vmem:[%s5477_s27 + $0x1a8] sm:$0xff] }
 0x148   : > { %v2084_v45 = vsel %vm2076_vm5, %v2019_v24, %v1506_v16 }
 0x149   : > { %v2149_v33 = vsel %vm2141_vm6, %v2084_v45, %v1590_v56  ;;  %v1083_v56 = vunpack.c.l.b16 %v927_v40  ;;  %v5843_v22 = vpack.c.b16 %v1085_v17, %v1084_v63 }
 0x14b   : > { %1380 = vrot.lane.b32.xlu2 %v5652_v0, %s5175_s29  ;;  %v5831_v23 = vpack.c.b16 %v1084_v63, %v1083_v56  ;;  %7711 = vst [vmem:[#allocation5_spill] sm:$0xff] %v5843_v22 }
 0x14c   : > { %1296 = vrot.lane.b32.xlu1 %v5555_v48, %s5179_s15  ;;  %1208 = vrot.lane.b32.xlu0 %v5541_v35, %s5176_s30  ;;  %v1082_v35 = vunpack.c.l.b16 %v926_v28 }
 0x14d   : > { %v1289_v29 = vpop.permute.xlu2 %1288 }
 0x14e   : > { %v1727_v32 = vpop.permute.xlu1 %1726  ;;  %v1660_v14 = vpop.permute.xlu0 %1659  ;;  %v5806_v44 = vpack.c.b16 %v1083_v56, %v1082_v35  ;;  %v5808_v46 = vpack.c.b16 %v1082_v35, %v1081_v3 }
 0x14f   : > { %v2214_v34 = vsel %vm2206_vm7, %v2149_v33, %v1660_v14  ;;  %v831_v33 = vld [vmem:[%s5477_s27 + $0x188] sm:$0xff] }
 0x150   : > { %v2279_v36 = vsel %vm2271_vm8, %v2214_v34, %v1727_v32  ;;  %v931_v35 = vpack.c.bf16 %v831_v33, %v831_v33 }
 0x151   : > { %4929 = vmatmul.msk.bf16.gmra.mxu0 %vm2372_vm9, %v2279_v36 }
 0x153   : > { %1601 = vrot.lane.b32.xlu2 %v5768_v11, %s5177_s10 }
 0x154   : > { %1517 = vrot.lane.b32.xlu1 %v5669_v18, %s5174_s28  ;;  %1450 = vrot.lane.b32.xlu0 %v5671_v21, %s5178_s11 }
 0x155   : > { %v1510_v41 = vpop.permute.xlu2 %1509 }
 0x156   : > { %v1371_v37 = vpop.permute.xlu1 %1370  ;;  %v1287_v43 = vpop.permute.xlu0 %1286 }
 0x157   : > { %v1891_v47 = vsel %vm1881_vm2, %v1799_v8, %v1287_v43  ;;  %v1266_v8 = vunpack.c.l.b16 %v931_v35 }
 0x158   : > { %v1956_v58 = vsel %vm1946_vm3, %v1891_v47, %v1371_v37 }
 0x159   : > { %v2021_v55 = vsel %vm2011_vm4, %v1956_v58, %v1441_v5 }
 0x15b   : > { %1210 = vrot.lane.b32.xlu2 %v5578_v2, %s5176_s30 }
 0x15c   : > { %1738 = vrot.lane.b32.xlu1 %v5806_v44, %s5180_s16  ;;  %1671 = vrot.lane.b32.xlu0 %v5808_v46, %s5181_s18 }
 0x15d   : > { %v1731_v42 = vpop.permute.xlu2 %1730 }
 0x15e   : > { %v1592_v49 = vpop.permute.xlu1 %1591  ;;  %v1508_v51 = vpop.permute.xlu0 %1507 }
 0x15f   : > { %v2086_v57 = vsel %vm2076_vm5, %v2021_v55, %v1508_v51  ;;  %v833_v51 = vld [vmem:[%s5477_s27 + $0x198] sm:$0xff] }
 0x160   : > { %v2151_v2 = vsel %vm2141_vm6, %v2086_v57, %v1592_v49  ;;  %v832_v49 = vld [vmem:[%s5477_s27 + $0x190] sm:$0xff]  ;;  %v933_v63 = vpack.c.bf16 %v833_v51, %v833_v51 }
 0x161   : > { %v2216_v5 = vsel %vm2206_vm7, %v2151_v2, %v1662_v15  ;;  %v932_v2 = vpack.c.bf16 %v832_v49, %v832_v49  ;;  %v845_v49 = vld [vmem:[%s5477_s27 + $0x1f8] sm:$0xff] }
 0x163   : > { %1452 = vrot.lane.b32.xlu2 %v5708_v61, %s5178_s11 }
 0x164   : > { %1382 = vrot.lane.b32.xlu1 %v5669_v18, %s5175_s29  ;;  %1298 = vrot.lane.b32.xlu0 %v5576_v1, %s5179_s15 }
 0x165   : > { %v1375_v3 = vpop.permute.xlu2 %1374 }
 0x166   : > { %v1201_v9 = vpop.permute.xlu1 %1200  ;;  %v1729_v7 = vpop.permute.xlu0 %1728 }
 0x167   : > { %v2281_v10 = vsel %vm2271_vm8, %v2216_v5, %v1729_v7  ;;  %v1802_v16 = vsel %vm1784_vm1, %v5490_v59, %v1201_v9  ;;  %v830_v59 = vld [vmem:[%s5477_s27 + $0x180] sm:$0xff]  ;;  %v1086_v7 = vunpack.c.l.b16 %v932_v2  ;;  %v1087_v5 = vunpack.c.l.b16 %v933_v63 }
 0x168   : > { %4930 = vmatmul.msk.bf16.gmra.mxu0 %vm2372_vm9, %v2281_v10  ;;  %v1893_v45 = vsel %vm1881_vm2, %v1802_v16, %v1289_v29  ;;  %v930_v40 = vpack.c.bf16 %v830_v59, %v830_v59  ;;  %v935_v59 = vpack.c.bf16 %v835_v13, %v835_v13 }
 0x16b   : > { %1673 = vrot.lane.b32.xlu2 %v5831_v23, %s5181_s18 }
 0x16c   : > { %1603 = vrot.lane.b32.xlu1 %v5806_v44, %s5177_s10  ;;  %1519 = vrot.lane.b32.xlu0 %v5706_v60, %s5174_s28 }
 0x16d   : > { %v1596_v15 = vpop.permute.xlu2 %1595 }
 0x16e   : > { %v1443_v26 = vpop.permute.xlu1 %1442  ;;  %v1373_v24 = vpop.permute.xlu0 %1372 }
 0x16f   : > { %v1958_v25 = vsel %vm1946_vm3, %v1893_v45, %v1373_v24  ;;  %v5896_v45 = vpack.c.b16 %v1087_v5, %v1086_v7 }
 0x170   : > { %v2023_v32 = vsel %vm2011_vm4, %v1958_v25, %v1443_v26 }
 0x171   : > { %v2088_v29 = vsel %vm2076_vm5, %v2023_v32, %v1510_v41 }
 0x173   : > { %1300 = vrot.lane.b32.xlu2 %v5604_v30, %s5179_s15 }
 0x174   : > { %1212 = vrot.lane.b32.xlu1 %v5606_v31, %s5176_s30  ;;  %1740 = vrot.lane.b32.xlu0 %v5843_v22, %s5180_s16  ;;  %v1154_v31 = vunpack.c.l.b16 %v930_v40 }
 0x175   : > { %v1205_v14 = vpop.permute.xlu2 %1204 }
 0x176   : > { %v1664_v34 = vpop.permute.xlu1 %1663  ;;  %v1594_v36 = vpop.permute.xlu0 %1593  ;;  %v5866_v47 = vpack.c.b16 %v1266_v8, %v1154_v31  ;;  %v5868_v58 = vpack.c.b16 %v1154_v31, %v1085_v17 }
 0x177   : > { %v2153_v28 = vsel %vm2141_vm6, %v2088_v29, %v1594_v36 }
 0x178   : > { %v2218_v56 = vsel %vm2206_vm7, %v2153_v28, %v1664_v34  ;;  %7712 = vst [vmem:[#allocation6_spill] sm:$0xff] %v5866_v47  ;;  %v1808_v34 = vsel %vm1784_vm1, %v5564_v54, %v1205_v14  ;;  %v836_v54 = vld [vmem:[%s5477_s27 + $0x1b0] sm:$0xff] }
 0x179   : > { %v2283_v30 = vsel %vm2271_vm8, %v2218_v56, %v1731_v42  ;;  %7713 = vst [vmem:[#allocation7_spill] sm:$0xff] %v5868_v58 }
 0x17a   : > { %4931 = vmatmul.msk.bf16.gmra.mxu0 %vm2372_vm9, %v2283_v30 }
 0x17b   : > { %1521 = vrot.lane.b32.xlu2 %v5744_v38, %s5174_s28 }
 0x17c   : > { %1454 = vrot.lane.b32.xlu1 %v5731_v27, %s5178_s11  ;;  %1384 = vrot.lane.b32.xlu0 %v5706_v60, %s5175_s29 }
 0x17d   : > { %v1447_v41 = vpop.permute.xlu2 %1446 }
 0x17e   : > { %v1291_v37 = vpop.permute.xlu1 %1290  ;;  %v1203_v43 = vpop.permute.xlu0 %1202 }
 0x17f   : > { %v1805_v62 = vsel %vm1784_vm1, %v5543_v39, %v1203_v43 }
 0x180   : > { %v1895_v42 = vsel %vm1881_vm2, %v1805_v62, %v1291_v37  ;;  %v936_v37 = vpack.c.bf16 %v836_v54, %v836_v54 }
 0x181   : > { %v1960_v39 = vsel %vm1946_vm3, %v1895_v42, %v1375_v3  ;;  %v834_v3 = vld [vmem:[%s5477_s27 + $0x1a0] sm:$0xff]  ;;  %v844_v42 = vld [vmem:[%s5477_s27 + $0x1f0] sm:$0xff] }
 0x182   : > { %v934_v32 = vpack.c.bf16 %v834_v3, %v834_v3  ;;  %v1090_v62 = vunpack.c.l.b16 %v936_v37  ;;  %v944_v63 = vpack.c.bf16 %v844_v42, %v844_v42 }
 0x183   : > { %1742 = vrot.lane.b32.xlu2 %v5866_v47, %s5180_s16 }
 0x184   : > { %1675 = vrot.lane.b32.xlu1 %v5868_v58, %s5181_s18  ;;  %1605 = vrot.lane.b32.xlu0 %v5843_v22, %s5177_s10  ;;  %v1096_v13 = vunpack.c.l.b16 %v944_v63 }
 0x185   : > { %v1668_v55 = vpop.permute.xlu2 %1667 }
 0x186   : > { %v1512_v20 = vpop.permute.xlu1 %1511  ;;  %v1445_v57 = vpop.permute.xlu0 %1444 }
 0x187   : > { %v2025_v50 = vsel %vm2011_vm4, %v1960_v39, %v1445_v57 }
 0x188   : > { %v2090_v9 = vsel %vm2076_vm5, %v2025_v50, %v1512_v20  ;;  %v843_v20 = vld [vmem:[%s5477_s27 + $0x1e8] sm:$0xff]  ;;  %v945_v50 = vpack.c.bf16 %v845_v49, %v845_v49 }
 0x189   : > { %v2155_v17 = vsel %vm2141_vm6, %v2090_v9, %v1596_v15  ;;  %v1089_v15 = vunpack.c.l.b16 %v935_v59  ;;  %v943_v3 = vpack.c.bf16 %v843_v20, %v843_v20  ;;  %v852_v59 = vld [vmem:[%s5477_s27 + $0x230] sm:$0xff]  ;;  %v863_v49 = vld [vmem:[%s5477_s27 + $0x288] sm:$0xff]  ;;  %v862_v20 = vld [vmem:[%s5477_s27 + $0x280] sm:$0xff] }
 0x18a   : > { %v952_v54 = vpack.c.bf16 %v852_v59, %v852_v59 }
 0x18b   : > { %1386 = vrot.lane.b32.xlu2 %v5772_v12, %s5175_s29  ;;  %v5942_v7 = vpack.c.b16 %v1090_v62, %v1089_v15 }
 0x18c   : > { %1302 = vrot.lane.b32.xlu1 %v5652_v0, %s5179_s15  ;;  %1214 = vrot.lane.b32.xlu0 %v5636_v52, %s5176_s30  ;;  %v1088_v52 = vunpack.c.l.b16 %v934_v32  ;;  %v855_v32 = vld [vmem:[%s5477_s27 + $0x248] sm:$0xff]  ;;  %v1102_v42 = vunpack.c.l.b16 %v952_v54 }
 0x18d   : > { %v5890_v10 = vpop.permute.xlu2 %1294 }
 0x18e   : > { %v1733_v16 = vpop.permute.xlu1 %1732  ;;  %v1666_v26 = vpop.permute.xlu0 %1665  ;;  %v5910_v28 = vpack.c.b16 %v1089_v15, %v1088_v52  ;;  %v5912_v40 = vpack.c.b16 %v1088_v52, %v1087_v5 }
 0x18f   : > { %v2220_v24 = vsel %vm2206_vm7, %v2155_v17, %v1666_v26  ;;  %v853_v17 = vld [vmem:[%s5477_s27 + $0x238] sm:$0xff] }
 0x190   : > { %v2285_v25 = vsel %vm2271_vm8, %v2220_v24, %v1733_v16  ;;  %v5945_v16 = vunpack.c.l.b16 %v945_v50 }
 0x191   : > { %4932 = vmatmul.msk.bf16.gmra.mxu0 %vm2372_vm9, %v2285_v25  ;;  %v5959_v25 = vunpack.c.l.b16 %v943_v3 }
 0x193   : > { %1607 = vrot.lane.b32.xlu2 %v5896_v45, %s5177_s10 }
 0x194   : > { %1523 = vrot.lane.b32.xlu1 %v5768_v11, %s5174_s28  ;;  %1456 = vrot.lane.b32.xlu0 %v5770_v4, %s5178_s11 }
 0x195   : > { %v5906_v33 = vpop.permute.xlu2 %1515 }
 0x196   : > { %v1377_v29 = vpop.permute.xlu1 %1376  ;;  %v1293_v36 = vpop.permute.xlu0 %1292 }
 0x197   : > { %v1897_v35 = vsel %vm1881_vm2, %v1808_v34, %v1293_v36 }
 0x198   : > { %v1962_v56 = vsel %vm1946_vm3, %v1897_v35, %v1377_v29  ;;  %v5966_v29 = vpack.c.b16 %v5945_v16, %v1096_v13 }
 0x199   : > { %v2027_v8 = vsel %vm2011_vm4, %v1962_v56, %v1447_v41  ;;  %v837_v41 = vld [vmem:[%s5477_s27 + $0x1b8] sm:$0xff]  ;;  %v955_v56 = vpack.c.bf16 %v855_v32, %v855_v32 }
 0x19a   : > { %v937_v5 = vpack.c.bf16 %v837_v41, %v837_v41  ;;  %v864_v41 = vld [vmem:[%s5477_s27 + $0x290] sm:$0xff] }
 0x19b   : > { %1216 = vrot.lane.b32.xlu2 %v5671_v21, %s5176_s30 }
 0x19c   : > { %1744 = vrot.lane.b32.xlu1 %v5910_v28, %s5180_s16  ;;  %1677 = vrot.lane.b32.xlu0 %v5912_v40, %s5181_s18  ;;  %v5955_v24 = vunpack.c.l.b16 %v937_v5 }
 0x19d   : > { %v5923_v14 = vpop.permute.xlu2 %1736 }
 0x19e   : > { %v1598_v30 = vpop.permute.xlu1 %1597  ;;  %v1514_v31 = vpop.permute.xlu0 %1513 }
 0x19f   : > { %v2092_v21 = vsel %vm2076_vm5, %v2027_v8, %v1514_v31  ;;  %v5975_v8 = vpack.c.b16 %v1096_v13, %v5959_v25  ;;  %v963_v13 = vpack.c.bf16 %v863_v49, %v863_v49 }
 0x1a0   : > { %v2157_v43 = vsel %vm2141_vm6, %v2092_v21, %v1598_v30  ;;  %v5971_v30 = vpack.c.b16 %v5955_v24, %v1090_v62 }
 0x1a1   : > { %v2222_v2 = vsel %vm2206_vm7, %v2157_v43, %v1668_v55  ;;  %v854_v55 = vld [vmem:[%s5477_s27 + $0x240] sm:$0xff]  ;;  %v1105_v43 = vunpack.c.l.b16 %v955_v56 }
 0x1a2   : > { %v954_v35 = vpack.c.bf16 %v854_v55, %v854_v55  ;;  %v962_v55 = vpack.c.bf16 %v862_v20, %v862_v20 }
 0x1a3   : > { %1458 = vrot.lane.b32.xlu2 %v5808_v46, %s5178_s11 }
 0x1a4   : > { %1388 = vrot.lane.b32.xlu1 %v5768_v11, %s5175_s29  ;;  %1304 = vrot.lane.b32.xlu0 %v5669_v18, %s5179_s15  ;;  %v1350_v59 = vunpack.c.l.b16 %v962_v55 }
 0x1a5   : > { %v5936_v51 = vpop.permute.xlu2 %1380 }
 0x1a6   : > { %v1207_v57 = vpop.permute.xlu1 %1206  ;;  %v1735_v39 = vpop.permute.xlu0 %1734 }
 0x1a7   : > { %v2287_v9 = vsel %vm2271_vm8, %v2222_v2, %v1735_v39  ;;  %v1811_v26 = vsel %vm1784_vm1, %v5503_v6, %v1207_v57  ;;  %v953_v6 = vpack.c.bf16 %v853_v17, %v853_v17  ;;  %v964_v17 = vpack.c.bf16 %v864_v41, %v864_v41  ;;  %v857_v41 = vld [vmem:[%s5477_s27 + $0x258] sm:$0xff] }
 0x1a8   : > { %4933 = vmatmul.msk.bf16.gmra.mxu0 %vm2372_vm9, %v2287_v9  ;;  %v1899_v36 = vsel %vm1881_vm2, %v1811_v26, %v5890_v10  ;;  %v1104_v10 = vunpack.c.l.b16 %v954_v35 }
 0x1a9   : > { %v1103_v37 = vunpack.c.l.b16 %v953_v6  ;;  %v1352_v32 = vunpack.c.l.b16 %v964_v17  ;;  %v865_v6 = vld [vmem:[%s5477_s27 + $0x298] sm:$0xff] }
 0x1aa   : > { %v5992_v50 = vpack.c.b16 %v1105_v43, %v1104_v10 }
 0x1ab   : > { %1679 = vrot.lane.b32.xlu2 %v5942_v7, %s5181_s18  ;;  %v5994_v9 = vpack.c.b16 %v1104_v10, %v1103_v37  ;;  %v5996_v5 = vpack.c.b16 %v1103_v37, %v1102_v42 }
 0x1ac   : > { %1609 = vrot.lane.b32.xlu1 %v5910_v28, %s5177_s10  ;;  %1525 = vrot.lane.b32.xlu0 %v5806_v44, %s5174_s28 }
 0x1ad   : > { %v5963_v52 = vpop.permute.xlu2 %1601  ;;  %7714 = vst [vmem:[#allocation8_spill] sm:$0xff] %v5996_v5 }
 0x1ae   : > { %v1449_v15 = vpop.permute.xlu1 %1448  ;;  %v1379_v34 = vpop.permute.xlu0 %1378 }
 0x1af   : > { %v1964_v31 = vsel %vm1946_vm3, %v1899_v36, %v1379_v34  ;;  %v856_v34 = vld [vmem:[%s5477_s27 + $0x250] sm:$0xff] }
 0x1b0   : > { %v2029_v21 = vsel %vm2011_vm4, %v1964_v31, %v1449_v15  ;;  %v956_v54 = vpack.c.bf16 %v856_v34, %v856_v34  ;;  %v965_v31 = vpack.c.bf16 %v865_v6, %v865_v6  ;;  %v874_v6 = vld [vmem:[%s5477_s27 + $0x2e0] sm:$0xff] }
 0x1b1   : > { %v2094_v39 = vsel %vm2076_vm5, %v2029_v21, %v5906_v33  ;;  %v1351_v33 = vunpack.c.l.b16 %v963_v13 }
 0x1b2   : > { %v1106_v10 = vunpack.c.l.b16 %v956_v54  ;;  %v1353_v42 = vunpack.c.l.b16 %v965_v31  ;;  %v867_v54 = vld [vmem:[%s5477_s27 + $0x2a8] sm:$0xff] }
 0x1b3   : > { %1326 = vrot.lane.b32.xlu2 %v5966_v29, %s5179_s15  ;;  %v6012_v35 = vpack.c.b16 %v1352_v32, %v1351_v33  ;;  %v6014_v56 = vpack.c.b16 %v1351_v33, %v1350_v59 }
 0x1b4   : > { %1238 = vrot.lane.b32.xlu1 %v5975_v8, %s5176_s30  ;;  %1746 = vrot.lane.b32.xlu0 %v5971_v30, %s5180_s16 }
 0x1b5   : > { %v5984_v62 = vpop.permute.xlu2 %1210 }
 0x1b6   : > { %v1670_v57 = vpop.permute.xlu1 %1669  ;;  %v1600_v2 = vpop.permute.xlu0 %1599  ;;  %v1817_v31 = vsel %vm1784_vm1, %v5555_v48, %v5984_v62  ;;  %v838_v62 = vld [vmem:[%s5477_s27 + $0x1c0] sm:$0xff] }
 0x1b7   : > { %v2159_v63 = vsel %vm2141_vm6, %v2094_v39, %v1600_v2  ;;  %v957_v39 = vpack.c.bf16 %v857_v41, %v857_v41  ;;  %v6031_v2 = vpack.c.b16 %v1106_v10, %v1105_v43  ;;  %v866_v43 = vld [vmem:[%s5477_s27 + $0x2a0] sm:$0xff] }
 0x1b8   : > { %v2224_v3 = vsel %vm2206_vm7, %v2159_v63, %v1670_v57  ;;  %v6033_v63 = vpack.c.b16 %v1353_v42, %v1352_v32  ;;  %v966_v34 = vpack.c.bf16 %v866_v43, %v866_v43 }
 0x1b9   : > { %v2289_v26 = vsel %vm2271_vm8, %v2224_v3, %v5923_v14  ;;  %7715 = vst [vmem:[#allocation9_spill] sm:$0xff] %v6031_v2  ;;  %v6038_v13 = vunpack.c.l.b16 %v957_v39 }
 0x1ba   : > { %4934 = vmatmul.msk.bf16.gmra.mxu0 %vm2372_vm9, %v2289_v26 }
 0x1bb   : > { %1547 = vrot.lane.b32.xlu2 %v5992_v50, %s5174_s28  ;;  %v6051_v32 = vpack.c.b16 %v6038_v13, %v1106_v10  ;;  %v974_v10 = vpack.c.bf16 %v874_v6, %v874_v6 }
 0x1bc   : > { %1480 = vrot.lane.b32.xlu1 %v5994_v9, %s5178_s11  ;;  %1410 = vrot.lane.b32.xlu0 %v5996_v5, %s5175_s29 }
 0x1bd   : > { %v6008_v15 = vpop.permute.xlu2 %1452 }
 0x1be   : > { %v1297_v14 = vpop.permute.xlu1 %1296  ;;  %v1209_v36 = vpop.permute.xlu0 %1208 }
 0x1bf   : > { %v1814_v37 = vsel %vm1784_vm1, %v5517_v19, %v1209_v36 }
 0x1c0   : > { %v1901_v21 = vsel %vm1881_vm2, %v1814_v37, %v1297_v14  ;;  %v875_v14 = vld [vmem:[%s5477_s27 + $0x2e8] sm:$0xff] }
 0x1c1   : > { %v1966_v19 = vsel %vm1946_vm3, %v1901_v21, %v5936_v51  ;;  %v975_v41 = vpack.c.bf16 %v875_v14, %v875_v14 }
 0x1c3   : > { %1218 = vrot.lane.b32.xlu2 %v5708_v61, %s5176_s30  ;;  %v1574_v39 = vunpack.c.l.b16 %v975_v41  ;;  %v846_v41 = vld [vmem:[%s5477_s27 + $0x200] sm:$0xff] }
 0x1c4   : > { %1701 = vrot.lane.b32.xlu1 %v6012_v35, %s5181_s18  ;;  %1631 = vrot.lane.b32.xlu0 %v6014_v56, %s5177_s10 }
 0x1c5   : > { %v6025_v49 = vpop.permute.xlu2 %1673 }
 0x1c6   : > { %v1518_v20 = vpop.permute.xlu1 %1517  ;;  %v1451_v57 = vpop.permute.xlu0 %1450 }
 0x1c7   : > { %v2031_v61 = vsel %vm2011_vm4, %v1966_v19, %v1451_v57  ;;  %v967_v57 = vpack.c.bf16 %v867_v54, %v867_v54 }
 0x1c8   : > { %v2096_v3 = vsel %vm2076_vm5, %v2031_v61, %v1518_v20  ;;  %v6074_v61 = vunpack.c.l.b16 %v974_v10 }
 0x1c9   : > { %v2161_v55 = vsel %vm2141_vm6, %v2096_v3, %v5963_v52  ;;  %v1354_v52 = vunpack.c.l.b16 %v966_v34  ;;  %v6081_v48 = vunpack.c.l.b16 %v967_v57  ;;  %v938_v34 = vpack.c.bf16 %v838_v62, %v838_v62  ;;  %v847_v57 = vld [vmem:[%s5477_s27 + $0x208] sm:$0xff] }
 0x1cb   : > { %1306 = vrot.lane.b32.xlu2 %v5706_v60, %s5179_s15  ;;  %v6069_v20 = vpack.c.b16 %v1354_v52, %v1353_v42  ;;  %v839_v42 = vld [vmem:[%s5477_s27 + $0x1c8] sm:$0xff]  ;;  %v6095_v54 = vpack.c.b16 %v6081_v48, %v1354_v52 }
 0x1cc   : > { %1248 = vrot.lane.b32.xlu1 %v6031_v2, %s5176_s30  ;;  %1768 = vrot.lane.b32.xlu0 %v6033_v63, %s5180_s16  ;;  %v939_v6 = vpack.c.bf16 %v839_v42, %v839_v42 }
 0x1cd   : > { %v6044_v51 = vpop.permute.xlu2 %1300 }
 0x1ce   : > { %v1739_v17 = vpop.permute.xlu1 %1738  ;;  %v1672_v26 = vpop.permute.xlu0 %1671  ;;  %v6100_v10 = vunpack.c.l.b16 %v939_v6 }
 0x1cf   : > { %v2226_v33 = vsel %vm2206_vm7, %v2161_v55, %v1672_v26 }
 0x1d0   : > { %v2291_v59 = vsel %vm2271_vm8, %v2226_v33, %v1739_v17  ;;  %v876_v17 = vld [vmem:[%s5477_s27 + $0x2f0] sm:$0xff] }
 0x1d1   : > { %4935 = vmatmul.msk.bf16.gmra.mxu0 %vm2372_vm9, %v2291_v59  ;;  %v6091_v59 = vpack.c.b16 %v1574_v39, %v6074_v61 }
 0x1d3   : > { %1420 = vrot.lane.b32.xlu2 %v6033_v63, %s5175_s29 }
 0x1d4   : > { %1390 = vrot.lane.b32.xlu1 %v5806_v44, %s5175_s29  ;;  %1336 = vrot.lane.b32.xlu0 %v6051_v32, %s5179_s15 }
 0x1d5   : > { %v6063_v36 = vpop.permute.xlu2 %1521 }
 0x1d6   : > { %v1383_v37 = vpop.permute.xlu1 %1382  ;;  %v1299_v21 = vpop.permute.xlu0 %1298 }
 0x1d7   : > { %v1903_v19 = vsel %vm1881_vm2, %v1817_v31, %v1299_v21  ;;  %v976_v31 = vpack.c.bf16 %v876_v17, %v876_v17  ;;  %v1092_v21 = vunpack.c.l.b16 %v938_v34 }
 0x1d8   : > { %v1968_v3 = vsel %vm1946_vm3, %v1903_v19, %v1383_v37  ;;  %v877_v19 = vld [vmem:[%s5477_s27 + $0x2f8] sm:$0xff] }
 0x1d9   : > { %v2033_v33 = vsel %vm2011_vm4, %v1968_v3, %v6008_v15  ;;  %v1575_v15 = vunpack.c.l.b16 %v976_v31  ;;  %v6119_v6 = vpack.c.b16 %v1092_v21, %v5955_v24 }
 0x1db   : > { %1527 = vrot.lane.b32.xlu2 %v5843_v22, %s5174_s28  ;;  %v1650_v34 = vpack.c.b16 %v1575_v15, %v1574_v39 }
 0x1dc   : > { %1490 = vrot.lane.b32.xlu1 %v6069_v20, %s5178_s11  ;;  %1460 = vrot.lane.b32.xlu0 %v5831_v23, %s5178_s11 }
 0x1dd   : > { %v6085_v43 = vpop.permute.xlu2 %1742 }
 0x1de   : > { %v1604_v55 = vpop.permute.xlu1 %1603  ;;  %v1520_v26 = vpop.permute.xlu0 %1519 }
 0x1df   : > { %v2098_v14 = vsel %vm2076_vm5, %v2033_v33, %v1520_v26  ;;  %v946_v26 = vpack.c.bf16 %v846_v41, %v846_v41  ;;  %v947_v33 = vpack.c.bf16 %v847_v57, %v847_v57 }
 0x1e0   : > { %v2163_v37 = vsel %vm2141_vm6, %v2098_v14, %v1604_v55  ;;  %v6115_v55 = vpack.c.b16 %v6100_v10, %v1092_v21  ;;  %v977_v14 = vpack.c.bf16 %v877_v19, %v877_v19 }
 0x1e1   : > { %v2228_v42 = vsel %vm2206_vm7, %v2163_v37, %v6025_v49  ;;  %v1098_v31 = vunpack.c.l.b16 %v946_v26  ;;  %v6123_v12 = vunpack.c.l.b16 %v947_v33 }
 0x1e2   : > { %7716 = vst [vmem:[#allocation10_spill] sm:$0xff] %v6115_v55  ;;  %v6130_v39 = vunpack.c.l.b16 %v977_v14 }
 0x1e3   : > { %1641 = vrot.lane.b32.xlu2 %v6091_v59, %s5177_s10  ;;  %v6135_v57 = vpack.c.b16 %v6123_v12, %v1098_v31  ;;  %v6139_v19 = vpack.c.b16 %v1098_v31, %v5945_v16 }
 0x1e4   : > { %1611 = vrot.lane.b32.xlu1 %v5971_v30, %s5177_s10  ;;  %1557 = vrot.lane.b32.xlu0 %v6095_v54, %s5174_s28 }
 0x1e5   : > { %v6108_v52 = vpop.permute.xlu2 %1386 }
 0x1e6   : > { %v1213_v3 = vpop.permute.xlu1 %1212  ;;  %v1741_v62 = vpop.permute.xlu0 %1740 }
 0x1e7   : > { %v2293_v17 = vsel %vm2271_vm8, %v2228_v42, %v1741_v62  ;;  %v1820_v49 = vsel %vm1784_vm1, %v5576_v1, %v1213_v3  ;;  %v6142_v3 = vpack.c.b16 %v6130_v39, %v1575_v15  ;;  %v849_v42 = vld [vmem:[%s5477_s27 + $0x218] sm:$0xff] }
 0x1e8   : > { %4936 = vmatmul.msk.bf16.gmra.mxu0 %vm2372_vm9, %v2293_v17  ;;  %v1905_v41 = vsel %vm1881_vm2, %v1820_v49, %v6044_v51  ;;  %v850_v17 = vld [vmem:[%s5477_s27 + $0x220] sm:$0xff]  ;;  %v949_v14 = vpack.c.bf16 %v849_v42, %v849_v42 }
 0x1e9   : > { %v950_v31 = vpack.c.bf16 %v850_v17, %v850_v17 }
 0x1eb   : > { %1748 = vrot.lane.b32.xlu2 %v6115_v55, %s5180_s16 }
 0x1ec   : > { %1711 = vrot.lane.b32.xlu1 %v1650_v34, %s5181_s18  ;;  %1681 = vrot.lane.b32.xlu0 %v6119_v6, %s5181_s18 }
 0x1ed   : > { %v1608_v24 = vpop.permute.xlu2 %1607 }
 0x1ee   : > { %v1455_v37 = vpop.permute.xlu1 %1454  ;;  %v1385_v21 = vpop.permute.xlu0 %1384 }
 0x1ef   : > { %v1970_v1 = vsel %vm1946_vm3, %v1905_v41, %v1385_v21  ;;  %v851_v41 = vld [vmem:[%s5477_s27 + $0x228] sm:$0xff] }
 0x1f0   : > { %v2035_v62 = vsel %vm2011_vm4, %v1970_v1, %v1455_v37  ;;  %v1156_v37 = vunpack.c.l.b16 %v950_v31  ;;  %v951_v42 = vpack.c.bf16 %v851_v41, %v851_v41 }
 0x1f1   : > { %v2100_v15 = vsel %vm2076_vm5, %v2035_v62, %v6063_v36  ;;  %v6168_v36 = vunpack.c.l.b16 %v949_v14 }
 0x1f3   : > { %1328 = vrot.lane.b32.xlu2 %v6135_v57, %s5179_s15  ;;  %v6174_v62 = vpack.c.b16 %v1156_v37, %v6168_v36 }
 0x1f4   : > { %1240 = vrot.lane.b32.xlu1 %v6139_v19, %s5176_s30  ;;  %1778 = vrot.lane.b32.xlu0 %v6142_v3, %s5180_s16 }
 0x1f5   : > { %v6151_v51 = vpop.permute.xlu2 %1216  ;;  %7717 = vst [vmem:[#allocation11_spill] sm:$0xff] %v6174_v62 }
 0x1f6   : > { %v1676_v16 = vpop.permute.xlu1 %1675  ;;  %v1606_v26 = vpop.permute.xlu0 %1605 }
 0x1f7   : > { %v2165_v33 = vsel %vm2141_vm6, %v2100_v15, %v1606_v26  ;;  %v1268_v15 = vunpack.c.l.b16 %v951_v42  ;;  %v858_v26 = vld [vmem:[%s5477_s27 + $0x260] sm:$0xff] }
 0x1f8   : > { %v2230_v34 = vsel %vm2206_vm7, %v2165_v33, %v1676_v16  ;;  %v859_v33 = vld [vmem:[%s5477_s27 + $0x268] sm:$0xff] }
 0x1f9   : > { %v2295_v49 = vsel %vm2271_vm8, %v2230_v34, %v6085_v43  ;;  %v959_v41 = vpack.c.bf16 %v859_v33, %v859_v33 }
 0x1fa   : > { %4937 = vmatmul.msk.bf16.gmra.mxu0 %vm2372_vm9, %v2295_v49  ;;  %v958_v49 = vpack.c.bf16 %v858_v26, %v858_v26 }
 0x1fb   : > { %1549 = vrot.lane.b32.xlu2 %v6051_v32, %s5174_s28 }
 0x1fc   : > { %1482 = vrot.lane.b32.xlu1 %v6031_v2, %s5178_s11  ;;  %1412 = vrot.lane.b32.xlu0 %v5992_v50, %s5175_s29  ;;  %v1109_v2 = vunpack.c.l.b16 %v959_v41 }
 0x1fd   : > { %v6170_v21 = vpop.permute.xlu2 %1458 }
 0x1fe   : > { %v1303_v43 = vpop.permute.xlu1 %1302  ;;  %v1215_v1 = vpop.permute.xlu0 %1214 }
 0x1ff   : > { %v1823_v17 = vsel %vm1784_vm1, %v5638_v53, %v1215_v1  ;;  %v6189_v53 = vpop.f32.mrf.mxu0  ;;  %v6194_v1 = vpack.c.b16 %v1268_v15, %v1156_v37 }
 0x200   : > { %v1907_v16 = vsel %vm1881_vm2, %v1823_v17, %v1303_v43  ;;  %7718 = vst [vmem:[#allocation12_spill] sm:$0xff] %v6189_v53  ;;  %v1108_v17 = vunpack.c.l.b16 %v958_v49  ;;  %v879_v53 = vld [vmem:[%s5477_s27 + $0x308] sm:$0xff] }
 0x201   : > { %7719 = vst [vmem:[#allocation13_spill] sm:$0xff] %v6194_v1 }
 0x202   : > { %v6212_v49 = vpack.c.b16 %v1108_v17, %v6038_v13  ;;  %v1826_v13 = vsel %vm1784_vm1, %v5652_v0, %v6151_v51  ;;  %v868_v0 = vld [vmem:[%s5477_s27 + $0x2b0] sm:$0xff]  ;;  %v869_v51 = vld [vmem:[%s5477_s27 + $0x2b8] sm:$0xff] }
 0x203   : > { %1703 = vrot.lane.b32.xlu2 %v6069_v20, %s5181_s18  ;;  %v1972_v20 = vsel %vm1946_vm3, %v1907_v16, %v6108_v52  ;;  %v860_v52 = vld [vmem:[%s5477_s27 + $0x270] sm:$0xff] }
 0x204   : > { %1244 = vrot.lane.b32.xlu1 %v6174_v62, %s5176_s30  ;;  %1633 = vrot.lane.b32.xlu0 %v6033_v63, %s5177_s10 }
 0x205   : > { %v6187_v34 = vpop.permute.xlu2 %1679 }
 0x206   : > { %v1524_v14 = vpop.permute.xlu1 %1523  ;;  %v1457_v31 = vpop.permute.xlu0 %1456 }
 0x207   : > { %v2037_v43 = vsel %vm2011_vm4, %v1972_v20, %v1457_v31  ;;  %v960_v31 = vpack.c.bf16 %v860_v52, %v860_v52  ;;  %v6214_v41 = vpop.f32.mrf.mxu0 }
 0x208   : > { %v2102_v42 = vsel %vm2076_vm5, %v2037_v43, %v1524_v14  ;;  %v6208_v14 = vpack.c.b16 %v1109_v2, %v1108_v17  ;;  %7720 = vst [vmem:[#allocation14_spill] sm:$0xff] %v6214_v41 }
 0x209   : > { %v2167_v37 = vsel %vm2141_vm6, %v2102_v42, %v1608_v24  ;;  %v861_v24 = vld [vmem:[%s5477_s27 + $0x278] sm:$0xff] }
 0x20b   : > { %1770 = vrot.lane.b32.xlu2 %v6095_v54, %s5180_s16 }
 0x20c   : > { %1332 = vrot.lane.b32.xlu1 %v6194_v1, %s5179_s15  ;;  %1220 = vrot.lane.b32.xlu0 %v5731_v27, %s5176_s30  ;;  %v1157_v27 = vunpack.c.l.b16 %v960_v31 }
 0x20d   : > { %v6204_v16 = vpop.permute.xlu2 %1326 }
 0x20e   : > { %v1745_v26 = vpop.permute.xlu1 %1744  ;;  %v1678_v15 = vpop.permute.xlu0 %1677  ;;  %v6229_v52 = vpack.c.b16 %v1157_v27, %v1109_v2 }
 0x20f   : > { %v2232_v33 = vsel %vm2206_vm7, %v2167_v37, %v1678_v15  ;;  %v6241_v2 = vpop.f32.mrf.mxu0 }
 0x210   : > { %v2297_v20 = vsel %vm2271_vm8, %v2232_v33, %v1745_v26  ;;  %v961_v26 = vpack.c.bf16 %v861_v24, %v861_v24  ;;  %7721 = vst [vmem:[#allocation15_spill] sm:$0xff] %v6241_v2 }
 0x211   : > { %4938 = vmatmul.msk.bf16.gmra.mxu0 %vm2372_vm9, %v2297_v20 }
 0x213   : > { %1416 = vrot.lane.b32.xlu2 %v6208_v14, %s5175_s29 }
 0x214   : > { %1308 = vrot.lane.b32.xlu1 %v5744_v38, %s5179_s15  ;;  %1250 = vrot.lane.b32.xlu0 %v6212_v49, %s5176_s30  ;;  %v1269_v38 = vunpack.c.l.b16 %v961_v26 }
 0x215   : > { %v6224_v43 = vpop.permute.xlu2 %1547 }
 0x216   : > { %v1389_v42 = vpop.permute.xlu1 %1388  ;;  %v1305_v17 = vpop.permute.xlu0 %1304 }
 0x217   : > { %v1909_v37 = vsel %vm1881_vm2, %v1826_v13, %v1305_v17  ;;  %v6247_v13 = vpack.c.b16 %v1269_v38, %v1157_v27  ;;  %v969_v17 = vpack.c.bf16 %v869_v51, %v869_v51  ;;  %v870_v27 = vld [vmem:[%s5477_s27 + $0x2c0] sm:$0xff] }
 0x218   : > { %v1974_v15 = vsel %vm1946_vm3, %v1909_v37, %v1389_v42  ;;  %v968_v42 = vpack.c.bf16 %v868_v0, %v868_v0  ;;  %v842_v37 = vld [vmem:[%s5477_s27 + $0x1e0] sm:$0xff] }
 0x219   : > { %v2039_v24 = vsel %vm2011_vm4, %v1974_v15, %v6170_v21  ;;  %v1357_v5 = vunpack.c.l.b16 %v969_v17  ;;  %v942_v21 = vpack.c.bf16 %v842_v37, %v842_v37 }
 0x21a   : > { %v1356_v2 = vunpack.c.l.b16 %v968_v42  ;;  %v6266_v42 = vpop.f32.mrf.mxu0 }
 0x21b   : > { %1486 = vrot.lane.b32.xlu2 %v6229_v52, %s5178_s11  ;;  %7722 = vst [vmem:[#allocation16_spill] sm:$0xff] %v6266_v42  ;;  %v1094_v17 = vunpack.c.l.b16 %v942_v21 }
 0x21c   : > { %1392 = vrot.lane.b32.xlu1 %v5843_v22, %s5175_s29  ;;  %1338 = vrot.lane.b32.xlu0 %v6208_v14, %s5179_s15 }
 0x21d   : > { %v6243_v33 = vpop.permute.xlu2 %1218 }
 0x21e   : > { %v1610_v31 = vpop.permute.xlu1 %1609  ;;  %v1526_v20 = vpop.permute.xlu0 %1525 }
 0x21f   : > { %v2104_v26 = vsel %vm2076_vm5, %v2039_v24, %v1526_v20  ;;  %v6264_v20 = vpack.c.b16 %v1357_v5, %v1356_v2  ;;  %v970_v24 = vpack.c.bf16 %v870_v27, %v870_v27 }
 0x220   : > { %v2169_v41 = vsel %vm2141_vm6, %v2104_v26, %v1610_v31  ;;  %v6270_v26 = vpack.c.b16 %v1356_v2, %v6081_v48  ;;  %v840_v48 = vld [vmem:[%s5477_s27 + $0x1d0] sm:$0xff] }
 0x221   : > { %v2234_v0 = vsel %vm2206_vm7, %v2169_v41, %v6187_v34  ;;  %v1427_v37 = vunpack.c.l.b16 %v970_v24  ;;  %v6275_v34 = vpack.c.b16 %v5959_v25, %v1094_v17  ;;  %v871_v41 = vld [vmem:[%s5477_s27 + $0x2c8] sm:$0xff] }
 0x223   : > { %1553 = vrot.lane.b32.xlu2 %v6247_v13, %s5174_s28 }
 0x224   : > { %1462 = vrot.lane.b32.xlu1 %v5868_v58, %s5178_s11  ;;  %1422 = vrot.lane.b32.xlu0 %v6095_v54, %s5175_s29 }
 0x225   : > { %v6259_v38 = vpop.permute.xlu2 %1306 }
 0x226   : > { %v1239_v15 = vpop.permute.xlu1 %1238  ;;  %v1747_v51 = vpop.permute.xlu0 %1746 }
 0x227   : > { %v2299_v31 = vsel %vm2271_vm8, %v2234_v0, %v1747_v51  ;;  %v6285_v0 = vpack.c.b16 %v1427_v37, %v1357_v5  ;;  %v971_v51 = vpack.c.bf16 %v871_v41, %v871_v41  ;;  %v1859_v25 = vsel %vm1784_vm1, %v6275_v34, %v1239_v15  ;;  %v878_v41 = vld [vmem:[%s5477_s27 + $0x300] sm:$0xff] }
 0x228   : > { %4939 = vmatmul.msk.bf16.gmra.mxu0 %vm2372_vm9, %v2299_v31  ;;  %v940_v31 = vpack.c.bf16 %v840_v48, %v840_v48  ;;  %v1931_v24 = vsel %vm1881_vm2, %v1859_v25, %v6204_v16  ;;  %v841_v48 = vld [vmem:[%s5477_s27 + $0x1d8] sm:$0xff] }
 0x229   : > { %v1497_v17 = vunpack.c.l.b16 %v971_v51  ;;  %v978_v51 = vpack.c.bf16 %v878_v41, %v878_v41  ;;  %v941_v58 = vpack.c.bf16 %v841_v48, %v841_v48 }
 0x22a   : > { %v1155_v5 = vunpack.c.l.b16 %v940_v31 }
 0x22b   : > { %1637 = vrot.lane.b32.xlu2 %v6264_v20, %s5177_s10  ;;  %v6302_v1 = vpack.c.b16 %v1497_v17, %v1427_v37 }
 0x22c   : > { %1529 = vrot.lane.b32.xlu1 %v5866_v47, %s5174_s28  ;;  %1492 = vrot.lane.b32.xlu0 %v6270_v26, %s5178_s11 }
 0x22d   : > { %v6282_v21 = vpop.permute.xlu2 %1420 }
 0x22e   : > { %v1481_v2 = vpop.permute.xlu1 %1480  ;;  %v1411_v27 = vpop.permute.xlu0 %1410 }
 0x22f   : > { %v1996_v42 = vsel %vm1946_vm3, %v1931_v24, %v1411_v27  ;;  %v979_v27 = vpack.c.bf16 %v879_v53, %v879_v53  ;;  %v6305_v24 = vpack.c.b16 %v1155_v5, %v6100_v10  ;;  %v1267_v10 = vunpack.c.l.b16 %v941_v58  ;;  %v848_v53 = vld [vmem:[%s5477_s27 + $0x210] sm:$0xff] }
 0x230   : > { %v2061_v25 = vsel %vm2011_vm4, %v1996_v42, %v1481_v2  ;;  %v948_v48 = vpack.c.bf16 %v848_v53, %v848_v53  ;;  %v6354_v53 = vpop.f32.mrf.mxu0 }
 0x231   : > { %v2126_v31 = vsel %vm2076_vm5, %v2061_v25, %v6224_v43  ;;  %v6312_v22 = vunpack.c.l.b16 %v979_v27 }
 0x232   : > { %v1100_v58 = vunpack.c.l.b16 %v948_v48 }
 0x233   : > { %1707 = vrot.lane.b32.xlu2 %v6285_v0, %s5181_s18 }
 0x234   : > { %1613 = vrot.lane.b32.xlu1 %v6115_v55, %s5177_s10  ;;  %1559 = vrot.lane.b32.xlu0 %v6264_v20, %s5174_s28  ;;  %v1577_v55 = vunpack.c.l.b16 %v978_v51  ;;  %v6334_v51 = vpack.c.b16 %v6168_v36, %v1100_v58 }
 0x235   : > { %v1528_v15 = vpop.permute.xlu2 %1527 }
 0x236   : > { %v1702_v62 = vpop.permute.xlu1 %1701  ;;  %v1632_v16 = vpop.permute.xlu0 %1631  ;;  %v6322_v41 = vpack.c.b16 %v6312_v22, %v1577_v55  ;;  %v1651_v25 = vpack.c.b16 %v1577_v55, %v6130_v39 }
 0x237   : > { %v2191_v47 = vsel %vm2141_vm6, %v2126_v31, %v1632_v16  ;;  %v6325_v16 = vpack.c.b16 %v1267_v10, %v1155_v5  ;;  %v6337_v5 = vpack.c.b16 %v1100_v58, %v6123_v12  ;;  %v1829_v12 = vsel %vm1784_vm1, %v5669_v18, %v6243_v33 }
 0x238   : > { %v2256_v43 = vsel %vm2206_vm7, %v2191_v47, %v1702_v62 }
 0x23b   : > { %1774 = vrot.lane.b32.xlu2 %v6302_v1, %s5180_s16 }
 0x23c   : > { %1683 = vrot.lane.b32.xlu1 %v6305_v24, %s5181_s18  ;;  %1643 = vrot.lane.b32.xlu0 %v6142_v3, %s5177_s10 }
 0x23d   : > { %v1642_v42 = vpop.permute.xlu2 %1641 }
 0x23e   : > { %v1249_v37 = vpop.permute.xlu1 %1248  ;;  %v1769_v2 = vpop.permute.xlu0 %1768 }
 0x23f   : > { %v2321_v17 = vsel %vm2271_vm8, %v2256_v43, %v1769_v2  ;;  %v1911_v2 = vsel %vm1881_vm2, %v1829_v12, %v6259_v38 }
 0x240   : > { %4950 = vmatmul.msk.bf16.vlgmr.msra.gmra.mxu1 %vm2372_vm9, %v2321_v17  ;;  %v1874_v17 = vsel %vm1784_vm1, %v5992_v50, %v1249_v37 }
 0x243   : > { %1780 = vrot.lane.b32.xlu2 %v6322_v41, %s5180_s16 }
 0x244   : > { %1750 = vrot.lane.b32.xlu1 %v6325_v16, %s5180_s16  ;;  %1713 = vrot.lane.b32.xlu0 %v1651_v25, %s5181_s18 }
 0x245   : > { %v1749_v47 = vpop.permute.xlu2 %1748 }
 0x246   : > { %v1391_v3 = vpop.permute.xlu1 %1390  ;;  %v1337_v62 = vpop.permute.xlu0 %1336 }
 0x247   : > { %v1941_v18 = vsel %vm1881_vm2, %v1874_v17, %v1337_v62  ;;  %v5182_v62 = vmov 0  }
 0x248   : > { %v2006_v37 = vsel %vm1946_vm3, %v1941_v18, %v6282_v21  ;;  %5080 = vset.pattern.permute.xlu0 %v5182_v62  ;;  %5079 = vset.pattern.permute.xlu2 %v5182_v62 }
 0x24b   : > { %1414 = vrot.lane.b32.xlu2 %v6051_v32, %s5175_s29 }
 0x24c   : > { %1330 = vrot.lane.b32.xlu1 %v6334_v51, %s5179_s15  ;;  %1242 = vrot.lane.b32.xlu0 %v6337_v5, %s5176_s30 }
 0x24d   : > { %v1329_v55 = vpop.permute.xlu2 %1328 }
 0x24e   : > { %v1491_v39 = vpop.permute.xlu1 %1490  ;;  %v1461_v27 = vpop.permute.xlu0 %1460 }
 0x253   : > { %1635 = vrot.lane.b32.xlu2 %v6095_v54, %s5177_s10  ;;  %v1976_v54 = vsel %vm1946_vm3, %v1911_v2, %v1391_v3 }
 0x254   : > { %1551 = vrot.lane.b32.xlu1 %v6208_v14, %s5174_s28  ;;  %1484 = vrot.lane.b32.xlu0 %v6212_v49, %s5178_s11  ;;  %v2041_v43 = vsel %vm2011_vm4, %v1976_v54, %v1461_v27  ;;  %v2071_v27 = vsel %vm2011_vm4, %v2006_v37, %v1491_v39 }
 0x255   : > { %v1550_v36 = vpop.permute.xlu2 %1549  ;;  %v2106_v33 = vsel %vm2076_vm5, %v2041_v43, %v1528_v15 }
 0x256   : > { %v1612_v31 = vpop.permute.xlu1 %1611  ;;  %v1558_v10 = vpop.permute.xlu0 %1557 }
 0x257   : > { %v2171_v48 = vsel %vm2141_vm6, %v2106_v33, %v1612_v31  ;;  %v2136_v15 = vsel %vm2076_vm5, %v2071_v27, %v1558_v10 }
 0x258   : > { %v2201_v21 = vsel %vm2141_vm6, %v2136_v15, %v1642_v42 }
 0x25b   : > { %1222 = vrot.lane.b32.xlu2 %v5770_v4, %s5176_s30 }
 0x25c   : > { %1705 = vrot.lane.b32.xlu1 %v6270_v26, %s5181_s18  ;;  %1246 = vrot.lane.b32.xlu0 %v5994_v9, %s5176_s30  ;;  %v6375_v26 = vpop.f32.mrf.mxu0 }
 0x25d   : > { %v1704_v38 = vpop.permute.xlu2 %1703 }
 0x25e   : > { %v1712_v25 = vpop.permute.xlu1 %1711  ;;  %v1682_v58 = vpop.permute.xlu0 %1681 }
 0x25f   : > { %v2236_v4 = vsel %vm2206_vm7, %v2171_v48, %v1682_v58  ;;  %v2266_v39 = vsel %vm2206_vm7, %v2201_v21, %v1712_v25  ;;  %v872_v48 = vld [vmem:[%s5477_s27 + $0x2d0] sm:$0xff]  ;;  %v873_v25 = vld [vmem:[%s5477_s27 + $0x2d8] sm:$0xff] }
 0x260   : > { %v2301_v3 = vsel %vm2271_vm8, %v2236_v4, %v1749_v47 }
 0x261   : > { %4940 = vmatmul.msk.bf16.gmra.mxu0 %vm2372_vm9, %v2301_v3  ;;  %v973_v3 = vpack.c.bf16 %v873_v25, %v873_v25 }
 0x263   : > { %1252 = vrot.lane.b32.xlu2 %v6229_v52, %s5176_s30  ;;  %v1572_v15 = vunpack.c.l.b16 %v973_v3 }
 0x264   : > { %1772 = vrot.lane.b32.xlu1 %v6264_v20, %s5180_s16  ;;  %1334 = vrot.lane.b32.xlu0 %v5992_v50, %s5179_s15 }
 0x265   : > { %v1771_v47 = vpop.permute.xlu2 %1770 }
 0x266   : > { %v1241_v12 = vpop.permute.xlu1 %1240  ;;  %v1779_v31 = vpop.permute.xlu0 %1778 }
 0x267   : > { %v2331_v10 = vsel %vm2271_vm8, %v2266_v39, %v1779_v31  ;;  %v1862_v2 = vsel %vm1784_vm1, %v5966_v29, %v1241_v12  ;;  %v2610_v39 = vld [vmem:[%s776_s23] sm:$0xff]  ;;  %v1649_v31 = vpack.c.b16 %v6074_v61, %v1572_v15 }
 0x268   : > { %4955 = vmatmul.msk.bf16.vlgmr.msra.gmra.mxu3 %vm2372_vm9, %v2331_v10  ;;  %v1933_v17 = vsel %vm1881_vm2, %v1862_v2, %v1329_v55  ;;  %v881_v61 = vld [vmem:[%s5477_s27 + $0x318] sm:$0xff] }
 0x26b   : > { %1340 = vrot.lane.b32.xlu2 %v6247_v13, %s5179_s15 }
 0x26c   : > { %1418 = vrot.lane.b32.xlu1 %v6014_v56, %s5175_s29  ;;  %1310 = vrot.lane.b32.xlu0 %v5768_v11, %s5179_s15 }
 0x26d   : > { %v1417_v42 = vpop.permute.xlu2 %1416 }
 0x26e   : > { %v1483_v54 = vpop.permute.xlu1 %1482  ;;  %v1413_v43 = vpop.permute.xlu0 %1412 }
 0x26f   : > { %v1998_v18 = vsel %vm1946_vm3, %v1933_v17, %v1413_v43  ;;  %v880_v17 = vld [vmem:[%s5477_s27 + $0x310] sm:$0xff] }
 0x270   : > { %v2063_v33 = vsel %vm2011_vm4, %v1998_v18, %v1483_v54  ;;  %v980_v25 = vpack.c.bf16 %v880_v17, %v880_v17 }
 0x271   : > { %v2128_v55 = vsel %vm2076_vm5, %v2063_v33, %v1550_v36 }
 0x273   : > { %1424 = vrot.lane.b32.xlu2 %v6264_v20, %s5175_s29 }
 0x274   : > { %1488 = vrot.lane.b32.xlu1 %v6012_v35, %s5178_s11  ;;  %1394 = vrot.lane.b32.xlu0 %v5896_v45, %s5175_s29  ;;  %v972_v35 = vpack.c.bf16 %v872_v48, %v872_v48 }
 0x275   : > { %v1487_v56 = vpop.permute.xlu2 %1486 }
 0x276   : > { %v1245_v58 = vpop.permute.xlu1 %1244  ;;  %v1634_v4 = vpop.permute.xlu0 %1633  ;;  %v1571_v36 = vunpack.c.l.b16 %v972_v35 }
 0x277   : > { %v2193_v20 = vsel %vm2141_vm6, %v2128_v55, %v1634_v4  ;;  %v1868_v10 = vsel %vm1784_vm1, %v6334_v51, %v1245_v58  ;;  %v981_v58 = vpack.c.bf16 %v881_v61, %v881_v61 }
 0x278   : > { %v2258_v37 = vsel %vm2206_vm7, %v2193_v20, %v1704_v38 }
 0x279   : > { %v2323_v27 = vsel %vm2271_vm8, %v2258_v37, %v1771_v47  ;;  %v1579_v47 = vpack.c.b16 %v1572_v15, %v1571_v36  ;;  %v1718_v4 = vunpack.c.l.b16 %v981_v58  ;;  %v6460_v36 = vpop.f32.mrf.mxu0 }
 0x27a   : > { %4951 = vmatmul.msk.bf16.gmra.mxu1 %vm2372_vm9, %v2323_v27 }
 0x27b   : > { %1494 = vrot.lane.b32.xlu2 %v6285_v0, %s5178_s11 }
 0x27c   : > { %1555 = vrot.lane.b32.xlu1 %v6033_v63, %s5174_s28  ;;  %1464 = vrot.lane.b32.xlu0 %v5912_v40, %s5178_s11 }
 0x27d   : > { %v1554_v62 = vpop.permute.xlu2 %1553 }
 0x27e   : > { %v1333_v38 = vpop.permute.xlu1 %1332  ;;  %v1221_v21 = vpop.permute.xlu0 %1220 }
 0x27f   : > { %v1937_v2 = vsel %vm1881_vm2, %v1868_v10, %v1333_v38 }
 0x280   : > { %v2002_v54 = vsel %vm1946_vm3, %v1937_v2, %v1417_v42  ;;  %v1832_v2 = vsel %vm1784_vm1, %v5706_v60, %v1221_v21 }
 0x281   : > { %v2067_v48 = vsel %vm2011_vm4, %v2002_v54, %v1487_v56 }
 0x282   : > { %v2132_v55 = vsel %vm2076_vm5, %v2067_v48, %v1554_v62 }
 0x283   : > { %2677 = vperm.xlu2 %5079, %v2610_v39  }
 0x284   : > { %1639 = vrot.lane.b32.xlu1 %v1579_v47, %s5177_s10  ;;  %1531 = vrot.lane.b32.xlu0 %v5910_v28, %s5174_s28 }
 0x285   : > { %v1638_v63 = vpop.permute.xlu2 %1637 }
 0x286   : > { %v1309_v0 = vpop.permute.xlu1 %1308  ;;  %v1251_v12 = vpop.permute.xlu0 %1250  ;;  %v2197_v20 = vsel %vm2141_vm6, %v2132_v55, %v1638_v63 }
 0x287   : > { %v1913_v54 = vsel %vm1881_vm2, %v1832_v2, %v1309_v0 }
 0x28b   : > { %1709 = vrot.lane.b32.xlu2 %v1649_v31, %s5181_s18 }
 0x28c   : > { %1615 = vrot.lane.b32.xlu1 %v6275_v34, %s5177_s10  ;;  %1561 = vrot.lane.b32.xlu0 %v6302_v1, %s5174_s28  ;;  %v1648_v1 = vunpack.c.l.b16 %v980_v25 }
 0x28d   : > { %v1708_v43 = vpop.permute.xlu2 %1707 }
 0x28e   : > { %v1393_v18 = vpop.permute.xlu1 %1392  ;;  %v1339_v33 = vpop.permute.xlu0 %1338  ;;  %v2262_v42 = vsel %vm2206_vm7, %v2197_v20, %v1708_v43  ;;  %v1652_v27 = vpack.c.b16 %v1648_v1, %v6312_v22  ;;  %v1877_v43 = vsel %vm1784_vm1, %v6051_v32, %v1251_v12 }
 0x28f   : > { %v6472_v22 = vpop.f32.mrf.mxu0  ;;  %v1978_v17 = vsel %vm1946_vm3, %v1913_v54, %v1393_v18  ;;  %v1943_v61 = vsel %vm1881_vm2, %v1877_v43, %v1339_v33 }
 0x293   : > { %1776 = vrot.lane.b32.xlu2 %v6091_v59, %s5180_s16  ;;  %v1719_v59 = vpack.c.b16 %v1718_v4, %v1648_v1 }
 0x294   : > { %1685 = vrot.lane.b32.xlu1 %v5975_v8, %s5181_s18  ;;  %1645 = vrot.lane.b32.xlu0 %v6322_v41, %s5177_s10 }
 0x295   : > { %v1775_v56 = vpop.permute.xlu2 %1774 }
 0x296   : > { %v1463_v37 = vpop.permute.xlu1 %1462  ;;  %v1423_v35 = vpop.permute.xlu0 %1422  ;;  %v2327_v3 = vsel %vm2271_vm8, %v2262_v42, %v1775_v56  ;;  %v7723_v56 = vld [vmem:[#allocation5_spill] sm:$0xff] }
 0x297   : > { %4953 = vmatmul.msk.bf16.vlgmr.msra.gmra.mxu2 %vm2372_vm9, %v2327_v3  ;;  %v6480_v63 = vpop.f32.mrf.mxu0  ;;  %v2043_v48 = vsel %vm2011_vm4, %v1978_v17, %v1463_v37  ;;  %v2008_v25 = vsel %vm1946_vm3, %v1943_v61, %v1423_v35  ;;  %v7725_v17 = vld [vmem:[#allocation6_spill] sm:$0xff]  ;;  %v7726_v61 = vld [vmem:[#allocation7_spill] sm:$0xff] }
 0x29b   : > { %1782 = vrot.lane.b32.xlu2 %v1719_v59, %s5180_s16 }
 0x29c   : > { %1752 = vrot.lane.b32.xlu1 %v5966_v29, %s5180_s16  ;;  %1715 = vrot.lane.b32.xlu0 %v1652_v27, %s5181_s18 }
 0x29d   : > { %v1781_v41 = vpop.permute.xlu2 %1780 }
 0x29e   : > { %v1530_v15 = vpop.permute.xlu1 %1529  ;;  %v1493_v62 = vpop.permute.xlu0 %1492 }
 0x29f   : > { %v2108_v58 = vsel %vm2076_vm5, %v2043_v48, %v1530_v15  ;;  %v2073_v60 = vsel %vm2011_vm4, %v2008_v25, %v1493_v62  ;;  %v6507_v4 = vpop.f32.mrf.mxu0 }
 0x2a3   : > { %1396 = vrot.lane.b32.xlu2 %v5910_v28, %s5175_s29 }
 0x2a4   : > { %1224 = vrot.lane.b32.xlu0 %v5808_v46, %s5176_s30  ;;  %1312 = vrot.lane.b32.xlu1 %v5806_v44, %s5179_s15 }
 0x2a5   : > { %v1415_v38 = vpop.permute.xlu2 %1414 }
 0x2a6   : > { %v1614_v47 = vpop.permute.xlu1 %1613  ;;  %v1560_v39 = vpop.permute.xlu0 %1559 }
 0x2a7   : > { %v2173_v21 = vsel %vm2141_vm6, %v2108_v58, %v1614_v47  ;;  %v2138_v0 = vsel %vm2076_vm5, %v2073_v60, %v1560_v39  ;;  %v6520_v59 = vpop.f32.mrf.mxu0 }
 0x2ab   : > { %1617 = vrot.lane.b32.xlu2 %v5966_v29, %s5177_s10 }
 0x2ac   : > { %1466 = vrot.lane.b32.xlu0 %v5942_v7, %s5178_s11  ;;  %1533 = vrot.lane.b32.xlu1 %v5971_v30, %s5174_s28 }
 0x2ad   : > { %v6482_v46 = vpop.permute.xlu2 %1635 }
 0x2ae   : > { %v1684_v31 = vpop.permute.xlu1 %1683  ;;  %v1644_v10 = vpop.permute.xlu0 %1643 }
 0x2af   : > { %v2238_v18 = vsel %vm2206_vm7, %v2173_v21, %v1684_v31  ;;  %v6538_v2 = vpop.f32.mrf.mxu0 }
 0x2b3   : > { %1226 = vrot.lane.b32.xlu2 %v5831_v23, %s5176_s30  ;;  %v2203_v23 = vsel %vm2141_vm6, %v2138_v0, %v1644_v10  ;;  %v3388_v10 = vld [vmem:[%s7691_s5] sm:$0xf] }
 0x2b4   : > { %1687 = vrot.lane.b32.xlu0 %v6139_v19, %s5181_s18  ;;  %1754 = vrot.lane.b32.xlu1 %v6135_v57, %s5180_s16  ;;  %v3456_v54 = vsel %vm2437_vm0, %v3388_v10, 0 }
 0x2b5   : > { %v6503_v12 = vpop.permute.xlu2 %1222  ;;  %3465 = vmatpush.bf16.msrb.mxu1 %v3456_v54  ;;  %v5088_v54 = vld [vmem:[%s7688_s2 + $0x3] ss:$0 sm:$0xff] }
 0x2b6   : > { %v1751_v33 = vpop.permute.xlu1 %1750  ;;  %v1714_v55 = vpop.permute.xlu0 %1713 }
 0x2b7   : > { %v2303_v20 = vsel %vm2271_vm8, %v2238_v18, %v1751_v33  ;;  %v2268_v1 = vsel %vm2206_vm7, %v2203_v23, %v1714_v55  ;;  %v6554_v0 = vpop.f32.mrf.mxu0 }
 0x2b8   : > { %4941 = vmatmul.msk.bf16.gmra.mxu0 %vm2372_vm9, %v2303_v20  ;;  %v2333_v42 = vsel %vm2271_vm8, %v2268_v1, %v1781_v41  ;;  %v7724_v41 = vld [vmem:[#allocation10_spill] sm:$0xff] }
 0x2b9   : > { %4956 = vmatmul.msk.bf16.gmra.mxu3 %vm2372_vm9, %v2333_v42  ;;  %v3391_v42 = vld [vmem:[%s7691_s5 + $0xc] sm:$0xf] }
 0x2bb   : > { %1468 = vrot.lane.b32.xlu2 %v6119_v6, %s5178_s11 }
 0x2bc   : > { %1314 = vrot.lane.b32.xlu0 %v7723_v56, %s5179_s15  ;;  %1398 = vrot.lane.b32.xlu1 %v5971_v30, %s5175_s29 }
 0x2bd   : > { %v1253_v37 = vpop.permute.xlu2 %1252 }
 0x2be   : > { %v1331_v35 = vpop.permute.xlu1 %1330  ;;  %v1243_v3 = vpop.permute.xlu0 %1242  ;;  %v1880_v27 = vsel %vm1784_vm1, %v6208_v14, %v1253_v37  ;;  %v3513_v37 = vsel %vm2437_vm0, %v3391_v42, 0 }
 0x2bf   : > { %v1865_v31 = vsel %vm1784_vm1, %v6135_v57, %v1243_v3  ;;  %3522 = vmatpush.bf16.msra.mxu1 %v3513_v37  ;;  %v7727_v3 = vld [vmem:[#allocation13_spill] sm:$0xff] }
 0x2c0   : > { %v1935_v43 = vsel %vm1881_vm2, %v1865_v31, %v1331_v35  ;;  %v6577_v35 = vpop.f32.mrf.mxu0  ;;  %v6592_v31 = vld [vmem:[%s7690_s4] ss:$0 sm:$0xff] }
 0x2c1   : > { %v2000_v25 = vsel %vm1946_vm3, %v1935_v43, %v1415_v38  ;;  %v7729_v43 = vld [vmem:[#allocation12_spill] sm:$0xff] }
 0x2c3   : > { %1689 = vrot.lane.b32.xlu2 %v6337_v5, %s5181_s18 }
 0x2c4   : > { %1535 = vrot.lane.b32.xlu0 %v7724_v41, %s5174_s28  ;;  %1619 = vrot.lane.b32.xlu1 %v6135_v57, %s5177_s10 }
 0x2c5   : > { %v1341_v15 = vpop.permute.xlu2 %1340 }
 0x2c6   : > { %v1552_v62 = vpop.permute.xlu1 %1551  ;;  %v6531_v47 = vsel %vm1881_vm2, %v1880_v27, %v1341_v15  ;;  %v1485_v39 = vpop.permute.xlu0 %1484  ;;  %v7728_v27 = vld [vmem:[#allocation11_spill] sm:$0xff] }
 0x2c7   : > { %v2065_v21 = vsel %vm2011_vm4, %v2000_v25, %v1485_v39 }
 0x2c8   : > { %v2130_v18 = vsel %vm2076_vm5, %v2065_v21, %v1552_v62 }
 0x2c9   : > { %v2195_v38 = vsel %vm2141_vm6, %v2130_v18, %v6482_v46  ;;  %v5085_v46 = vld [vmem:[%s7688_s2] ss:$0 sm:$0xff] }
 0x2cb   : > { %1316 = vrot.lane.b32.xlu2 %v7725_v17, %s5179_s15 }
 0x2cc   : > { %1756 = vrot.lane.b32.xlu0 %v6334_v51, %s5180_s16  ;;  %1228 = vrot.lane.b32.xlu1 %v7726_v61, %s5176_s30 }
 0x2cd   : > { %v6548_v48 = vpop.permute.xlu2 %1424 }
 0x2ce   : > { %v1706_v58 = vpop.permute.xlu1 %1705  ;;  %v6551_v60 = vpop.permute.xlu0 %1246 }
 0x2cf   : > { %v2260_v33 = vsel %vm2206_vm7, %v2195_v38, %v1706_v58  ;;  %v6601_v58 = vpop.f32.mrf.mxu0 }
 0x2d3   : > { %1537 = vrot.lane.b32.xlu2 %v6325_v16, %s5174_s28 }
 0x2d4   : > { %1400 = vrot.lane.b32.xlu0 %v7724_v41, %s5175_s29  ;;  %1470 = vrot.lane.b32.xlu1 %v6305_v24, %s5178_s11 }
 0x2d5   : > { %v6565_v23 = vpop.permute.xlu2 %1494 }
 0x2d6   : > { %v1773_v55 = vpop.permute.xlu1 %1772  ;;  %v1335_v20 = vpop.permute.xlu0 %1334 }
 0x2d7   : > { %v2325_v1 = vsel %vm2271_vm8, %v2260_v33, %v1773_v55 }
 0x2d8   : > { %4952 = vmatmul.msk.bf16.gmra.mxu1 %vm2372_vm9, %v2325_v1  ;;  %v7730_v1 = vld [vmem:[#allocation16_spill] sm:$0xff] }
 0x2db   : > { %1758 = vrot.lane.b32.xlu2 %v7727_v3, %s5180_s16 }
 0x2dc   : > { %1621 = vrot.lane.b32.xlu0 %v6334_v51, %s5177_s10  ;;  %1691 = vrot.lane.b32.xlu1 %v7728_v27, %s5181_s18 }
 0x2dd   : > { %v6585_v15 = vpop.permute.xlu2 %2677 }
 0x2de   : > { %v1419_v62 = vpop.permute.xlu1 %1418  ;;  %v6587_v39 = vpop.permute.xlu0 %1310  ;;  %v2872_v10 = vmul.f32 %v5085_v46, %v6585_v15  ;;  %v2875_v25 = vmul.f32 %v5088_v54, %v6585_v15 }
 0x2e0   : > { %v2936_v17 = vadd.f32 %v2872_v10, %v7729_v43  ;;  %v2939_v42 = vadd.f32 %v2875_v25, %v7730_v1  ;;  %v3394_v10 = vld [vmem:[%s7691_s5 + $0x18] sm:$0xf] }
 0x2e1   : > { %v3570_v43 = vsel %vm2437_vm0, %v3394_v10, 0 }
 0x2e2   : > { %v3004_v61 = vadd.f32 %v6592_v31, %v2936_v17  ;;  %v3007_v54 = vadd.f32 %v6592_v31, %v2939_v42  ;;  %v7731_v17 = vld [vmem:[#allocation8_spill] sm:$0xff] }
 0x2e3   : > { %1402 = vrot.lane.b32.xlu2 %v6275_v34, %s5175_s29  ;;  %v3389_v34 = vld [vmem:[%s7691_s5 + $0x4] sm:$0xf] }
 0x2e4   : > { %1230 = vrot.lane.b32.xlu0 %v5912_v40, %s5176_s30  ;;  %1318 = vrot.lane.b32.xlu1 %v5910_v28, %s5179_s15  ;;  %vm3068_vm10 = vcmp.ge.f32.partialorder %v3004_v61, 0.0  ;;  %v3132_v21 = vmul.f32 0.2, %v3004_v61  ;;  %v3475_v40 = vsel %vm2437_vm0, %v3389_v34, 0  ;;  %v3135_v42 = vmul.f32 0.2, %v3007_v54 }
 0x2e5   : > { %v1710_v18 = vpop.permute.xlu2 %1709  ;;  %3484 = vmatpush.bf16.msrb.mxu2 %v3475_v40  ;;  %vm3071_vm11 = vcmp.ge.f32.partialorder %v3007_v54, 0.0  ;;  %v1871_v34 = vsel %vm1784_vm1, %v7731_v17, %v6551_v60 }
 0x2e6   : > { %v1489_v38 = vpop.permute.xlu1 %1488  ;;  %v6609_v33 = vpop.permute.xlu0 %1394  ;;  %v3196_v55 = vsel %vm3068_vm10, %v3004_v61, %v3132_v21  ;;  %v5090_v21 = vld [vmem:[%s7688_s2 + $0x1] ss:$0 sm:$0xff]  ;;  %v1939_v10 = vsel %vm1881_vm2, %v1871_v34, %v1335_v20 }
 0x2e7   : > { %v3260_v37 = vmul.f32 1.4142135, %v3196_v55  ;;  %v6628_v61 = vpop.f32.mrf.mxu0 }
 0x2e9   : > { %v3324_v46 = vpack.c.bf16 %v3260_v37, %v3260_v37  ;;  %v5091_v37 = vld [vmem:[%s7688_s2 + $0x6] ss:$0 sm:$0xff] }
 0x2ea   : > { %v2878_v40 = vmul.f32 %v5091_v37, %v6585_v15 }
 0x2eb   : > { %4958 = vmatmul.msk.bf16.vlgmr.msrb.gmra.mxu1 %vm1784_vm1, %v3324_v46  ;;  %1623 = vrot.lane.b32.xlu2 %v7731_v17, %s5177_s10  ;;  %v3199_v46 = vsel %vm3071_vm11, %v3007_v54, %v3135_v42  ;;  %v7732_v17 = vld [vmem:[#allocation14_spill] sm:$0xff] }
 0x2ec   : > { %1472 = vrot.lane.b32.xlu0 %v5975_v8, %s5178_s11  ;;  %1539 = vrot.lane.b32.xlu1 %v5966_v29, %s5174_s28  ;;  %v2873_v8 = vmul.f32 %v5090_v21, %v6585_v15  ;;  %v3263_v54 = vmul.f32 1.4142135, %v3199_v46 }
 0x2ed   : > { %v1777_v25 = vpop.permute.xlu2 %1776  ;;  %3579 = vmatpush.bf16.msrb.mxu1 %v3570_v43  ;;  %v2004_v43 = vsel %vm1946_vm3, %v1939_v10, %v1419_v62  ;;  %v2942_v62 = vadd.f32 %v2878_v40, %v6460_v36  ;;  %v3390_v36 = vld [vmem:[%s7691_s5 + $0x8] sm:$0xf] }
 0x2ee   : > { %v1556_v55 = vpop.permute.xlu1 %1555  ;;  %v6633_v1 = vpop.permute.xlu0 %1464  ;;  %v2069_v60 = vsel %vm2011_vm4, %v2004_v43, %v1489_v38  ;;  %v2937_v42 = vadd.f32 %v2873_v8, %v7732_v17  ;;  %v3392_v38 = vld [vmem:[%s7691_s5 + $0x10] sm:$0xf]  ;;  %v3327_v8 = vpack.c.bf16 %v3263_v54, %v3263_v54  ;;  %v5092_v54 = vld [vmem:[%s7688_s2 + $0x4] ss:$0 sm:$0xff] }
 0x2ef   : > { %v6651_v21 = vpop.f32.mrf.mxu0  ;;  %v2134_v20 = vsel %vm2076_vm5, %v2069_v60, %v1556_v55  ;;  %v3397_v55 = vld [vmem:[%s7691_s5 + $0x24] sm:$0xf]  ;;  %v3532_v40 = vsel %vm2437_vm0, %v3392_v38, 0 }
 0x2f0   : > { %v3005_v43 = vadd.f32 %v6592_v31, %v2937_v42  ;;  %v3627_v60 = vsel %vm2437_vm0, %v3397_v55, 0  ;;  %3541 = vmatpush.bf16.msra.mxu2 %v3532_v40  ;;  %v7733_v55 = vld [vmem:[#allocation9_spill] sm:$0xff]  ;;  %v5095_v40 = vld [vmem:[%s7688_s2 + $0x2] ss:$0 sm:$0xff] }
 0x2f2   : > { %v3133_v17 = vmul.f32 0.2, %v3005_v43  ;;  %vm3069_vm12 = vcmp.ge.f32.partialorder %v3005_v43, 0.0 }
 0x2f3   : > { %1232 = vrot.lane.b32.xlu2 %v5942_v7, %s5176_s30 }
 0x2f4   : > { %1693 = vrot.lane.b32.xlu0 %v5994_v9, %s5181_s18  ;;  %1760 = vrot.lane.b32.xlu1 %v5992_v50, %s5180_s16 }
 0x2f5   : > { %v6655_v37 = vpop.permute.xlu2 %1782 }
 0x2f6   : > { %v1640_v7 = vpop.permute.xlu1 %1639  ;;  %v6658_v34 = vpop.permute.xlu0 %1531 }
 0x2f7   : > { %v2199_v9 = vsel %vm2141_vm6, %v2134_v20, %v1640_v7 }
 0x2f8   : > { %v2264_v10 = vsel %vm2206_vm7, %v2199_v9, %v1710_v18  ;;  %v3010_v18 = vadd.f32 %v6592_v31, %v2942_v62  ;;  %v5094_v62 = vld [vmem:[%s7688_s2 + $0x9] ss:$0 sm:$0xff]  ;;  %v6694_v9 = vpop.f32.mrf.mxu0 }
 0x2f9   : > { %v2329_v46 = vsel %vm2271_vm8, %v2264_v10, %v1777_v25  ;;  %v3494_v25 = vsel %vm2437_vm0, %v3390_v36, 0  ;;  %v2876_v10 = vmul.f32 %v5092_v54, %v6585_v15 }
 0x2fa   : > { %4954 = vmatmul.msk.bf16.gmra.mxu2 %vm2372_vm9, %v2329_v46  ;;  %3503 = vmatpush.bf16.msrb.mxu3 %v3494_v25  ;;  %vm3074_vm13 = vcmp.ge.f32.partialorder %v3010_v18, 0.0  ;;  %v2881_v46 = vmul.f32 %v5094_v62, %v6585_v15 }
 0x2fb   : > { %4961 = vmatmul.msk.bf16.vlgmr.msra.gmra.mxu1 %vm1784_vm1, %v3327_v8  ;;  %1474 = vrot.lane.b32.xlu2 %v6139_v19, %s5178_s11  ;;  %v3138_v19 = vmul.f32 0.2, %v3010_v18  ;;  %v2940_v8 = vadd.f32 %v2876_v10, %v6354_v53  ;;  %v2874_v10 = vmul.f32 %v5095_v40, %v6585_v15 }
 0x2fc   : > { %1320 = vrot.lane.b32.xlu0 %v5971_v30, %s5179_s15  ;;  %1404 = vrot.lane.b32.xlu1 %v5966_v29, %s5175_s29  ;;  %v3197_v29 = vsel %vm3069_vm12, %v3005_v43, %v3133_v17  ;;  %v2945_v53 = vadd.f32 %v2881_v46, %v6507_v4 }
 0x2fd   : > { %v6689_v42 = vpop.permute.xlu2 %1396  ;;  %3636 = vmatpush.bf16.msra.mxu1 %v3627_v60  ;;  %v3202_v38 = vsel %vm3074_vm13, %v3010_v18, %v3138_v19  ;;  %v3261_v36 = vmul.f32 1.4142135, %v3197_v29  ;;  %v3008_v17 = vadd.f32 %v6592_v31, %v2940_v8  ;;  %v7734_v19 = vld [vmem:[#allocation4_spill] sm:$0xff]  ;;  %v2010_v29 = vsel %vm1946_vm3, %v6531_v47, %v6548_v48 }
 0x2fe   : > { %v1616_v20 = vpop.permute.xlu1 %1615  ;;  %v1562_v7 = vpop.permute.xlu0 %1561  ;;  %v3266_v43 = vmul.f32 1.4142135, %v3202_v38  ;;  %v3013_v46 = vadd.f32 %v6592_v31, %v2945_v53  ;;  %v5097_v47 = vld [vmem:[%s7688_s2 + $0x7] ss:$0 sm:$0xff]  ;;  %v2075_v48 = vsel %vm2011_vm4, %v2010_v29, %v6565_v23  ;;  %v3400_v23 = vld [vmem:[%s7691_s5 + $0x30] sm:$0xf] }
 0x2ff   : > { %v3325_v62 = vpack.c.bf16 %v3261_v36, %v3261_v36  ;;  %vm3072_vm14 = vcmp.ge.f32.partialorder %v3008_v17, 0.0  ;;  %v3395_v36 = vld [vmem:[%s7691_s5 + $0x1c] sm:$0xf] }
 0x300   : > { %v6711_v54 = vpop.f32.mrf.mxu0  ;;  %vm3077_vm15 = vcmp.ge.f32.partialorder %v3013_v46, 0.0 }
 0x303   : > { %1695 = vrot.lane.b32.xlu2 %v7733_v55, %s5181_s18  ;;  %v3330_v55 = vpack.c.bf16 %v3266_v43, %v3266_v43  ;;  %v3589_v43 = vsel %vm2437_vm0, %v3395_v36, 0 }
 0x304   : > { %1541 = vrot.lane.b32.xlu0 %v6135_v57, %s5174_s28  ;;  %1625 = vrot.lane.b32.xlu1 %v5992_v50, %s5177_s10  ;;  %v1835_v50 = vsel %vm1784_vm1, %v7734_v19, %v6503_v12  ;;  %v3393_v19 = vld [vmem:[%s7691_s5 + $0x14] sm:$0xf] }
 0x305   : > { %v6708_v18 = vpop.permute.xlu2 %1617  ;;  %v1915_v38 = vsel %vm1881_vm2, %v1835_v50, %v6587_v39 }
 0x306   : > { %v1686_v60 = vpop.permute.xlu1 %1685  ;;  %v1646_v25 = vpop.permute.xlu0 %1645  ;;  %v1980_v4 = vsel %vm1946_vm3, %v1915_v38, %v6609_v33  ;;  %v3136_v33 = vmul.f32 0.2, %v3008_v17  ;;  %v3141_v38 = vmul.f32 0.2, %v3013_v46 }
 0x307   : > { %v2045_v12 = vsel %vm2011_vm4, %v1980_v4, %v6633_v1  ;;  %v7735_v1 = vld [vmem:[#allocation15_spill] sm:$0xff] }
 0x308   : > { %v2110_v39 = vsel %vm2076_vm5, %v2045_v12, %v6658_v34  ;;  %v2938_v8 = vadd.f32 %v2874_v10, %v7735_v1  ;;  %v2140_v34 = vsel %vm2076_vm5, %v2075_v48, %v1562_v7  ;;  %v3551_v7 = vsel %vm2437_vm0, %v3393_v19, 0  ;;  %v6772_v48 = vpop.f32.mrf.mxu0 }
 0x309   : > { %v2175_v40 = vsel %vm2141_vm6, %v2110_v39, %v1616_v20  ;;  %v5098_v20 = vld [vmem:[%s7688_s2 + $0xc] ss:$0 sm:$0xff]  ;;  %3560 = vmatpush.bf16.msra.mxu3 %v3551_v7  ;;  %v2879_v12 = vmul.f32 %v5097_v47, %v6585_v15  ;;  %v3200_v39 = vsel %vm3072_vm14, %v3008_v17, %v3136_v33  ;;  %v3205_v1 = vsel %vm3077_vm15, %v3013_v46, %v3141_v38  ;;  %v5099_v17 = vld [vmem:[%s7688_s2 + $0x5] ss:$0 sm:$0xff]  ;;  %v5101_v38 = vld [vmem:[%s7688_s2 + $0xa] ss:$0 sm:$0xff] }
 0x30a   : > { %4959 = vmatmul.msk.bf16.vlgmr.msrb.gmra.mxu2 %vm1784_vm1, %v3325_v62  ;;  %v2240_v50 = vsel %vm2206_vm7, %v2175_v40, %v1686_v60  ;;  %v2205_v62 = vsel %vm2141_vm6, %v2140_v34, %v1646_v25  ;;  %v3006_v25 = vadd.f32 %v6592_v31, %v2938_v8  ;;  %v2884_v36 = vmul.f32 %v5098_v20, %v6585_v15 }
 0x30b   : > { %4964 = vmatmul.msk.bf16.vlgmr.msrb.gmra.mxu1 %vm1784_vm1, %v3330_v55  ;;  %1322 = vrot.lane.b32.xlu2 %v7724_v41, %s5179_s15  ;;  %v2943_v8 = vadd.f32 %v2879_v12, %v6472_v22  ;;  %v3269_v46 = vmul.f32 1.4142135, %v3205_v1 }
 0x30c   : > { %1762 = vrot.lane.b32.xlu0 %v6051_v32, %s5180_s16  ;;  %1234 = vrot.lane.b32.xlu1 %v6119_v6, %s5176_s30  ;;  %v3684_v6 = vsel %vm2437_vm0, %v3400_v23, 0  ;;  %v3134_v47 = vmul.f32 0.2, %v3006_v25  ;;  %vm3070_vm10 = vcmp.ge.f32.partialorder %v3006_v25, 0.0  ;;  %v2948_v34 = vadd.f32 %v2884_v36, %v6554_v0  ;;  %v3403_v36 = vld [vmem:[%s7691_s5 + $0x3c] sm:$0xf] }
 0x30d   : > { %v6753_v53 = vpop.permute.xlu2 %1226  ;;  %3598 = vmatpush.bf16.msrb.mxu2 %v3589_v43  ;;  %3693 = vmatpush.bf16.msrb.mxu1 %v3684_v6  ;;  %v2877_v6 = vmul.f32 %v5099_v17, %v6585_v15 }
 0x30e   : > { %v1753_v10 = vpop.permute.xlu1 %1752  ;;  %v1716_v29 = vpop.permute.xlu0 %1715  ;;  %v3198_v43 = vsel %vm3070_vm10, %v3006_v25, %v3134_v47 }
 0x30f   : > { %v2305_v55 = vsel %vm2271_vm8, %v2240_v50, %v1753_v10  ;;  %v2270_v4 = vsel %vm2206_vm7, %v2205_v62, %v1716_v29  ;;  %v3333_v50 = vpack.c.bf16 %v3269_v46, %v3269_v46  ;;  %v3016_v62 = vadd.f32 %v6592_v31, %v2948_v34  ;;  %v5105_v34 = vld [vmem:[%s7688_s2 + $0x8] ss:$0 sm:$0xff] }
 0x310   : > { %4942 = vmatmul.msk.bf16.gmra.mxu0 %vm2372_vm9, %v2305_v55  ;;  %v2335_v60 = vsel %vm2271_vm8, %v2270_v4, %v6655_v37  ;;  %v3264_v37 = vmul.f32 1.4142135, %v3200_v39  ;;  %v6792_v19 = vpop.f32.mrf.mxu0  ;;  %v3262_v10 = vmul.f32 1.4142135, %v3198_v43  ;;  %v2941_v29 = vadd.f32 %v2877_v6, %v6375_v26  ;;  %v5103_v4 = vld [vmem:[%s7688_s2 + $0xf] ss:$0 sm:$0xff] }
 0x311   : > { %4957 = vmatmul.msk.bf16.gmra.mxu3 %vm2372_vm9, %v2335_v60  ;;  %v3144_v55 = vmul.f32 0.2, %v3016_v62  ;;  %vm3080_vm12 = vcmp.ge.f32.partialorder %v3016_v62, 0.0 }
 0x312   : > { %v3326_v60 = vpack.c.bf16 %v3262_v10, %v3262_v10  ;;  %v3009_v39 = vadd.f32 %v6592_v31, %v2941_v29 }
 0x313   : > { %1543 = vrot.lane.b32.xlu2 %v6334_v51, %s5174_s28  ;;  %v3208_v47 = vsel %vm3080_vm12, %v3016_v62, %v3144_v55  ;;  %v5107_v55 = vld [vmem:[%s7688_s2 + $0xd] ss:$0 sm:$0xff] }
 0x314   : > { %1406 = vrot.lane.b32.xlu0 %v6135_v57, %s5175_s29  ;;  %1476 = vrot.lane.b32.xlu1 %v6337_v5, %s5178_s11  ;;  %v3328_v57 = vpack.c.bf16 %v3264_v37, %v3264_v37  ;;  %v3011_v5 = vadd.f32 %v6592_v31, %v2943_v8  ;;  %v2882_v37 = vmul.f32 %v5101_v38, %v6585_v15  ;;  %vm3073_vm13 = vcmp.ge.f32.partialorder %v3009_v39, 0.0 }
 0x315   : > { %v6787_v33 = vpop.permute.xlu2 %1468  ;;  %v2887_v8 = vmul.f32 %v5103_v4, %v6585_v15 }
 0x316   : > { %v1225_v23 = vpop.permute.xlu0 %1224  ;;  %v1313_v40 = vpop.permute.xlu1 %1312  ;;  %vm3075_vm11 = vcmp.ge.f32.partialorder %v3011_v5, 0.0  ;;  %v2946_v43 = vadd.f32 %v2882_v37, %v6520_v59 }
 0x317   : > { %v1838_v22 = vsel %vm1784_vm1, %v5768_v11, %v1225_v23  ;;  %v3139_v11 = vmul.f32 0.2, %v3011_v5 }
 0x318   : > { %v1917_v0 = vsel %vm1881_vm2, %v1838_v22, %v1313_v40  ;;  %v6830_v17 = vpop.f32.mrf.mxu0  ;;  %v3137_v40 = vmul.f32 0.2, %v3009_v39  ;;  %v2951_v22 = vadd.f32 %v2887_v8, %v6628_v61  ;;  %v3014_v61 = vadd.f32 %v6592_v31, %v2946_v43  ;;  %v5109_v43 = vld [vmem:[%s7688_s2 + $0xb] ss:$0 sm:$0xff] }
 0x319   : > { %v3203_v12 = vsel %vm3075_vm11, %v3011_v5, %v3139_v11  ;;  %v2885_v8 = vmul.f32 %v5107_v55, %v6585_v15  ;;  %v5111_v55 = vld [vmem:[%s7688_s2 + $0x10] ss:$0 sm:$0xff] }
 0x31a   : > { %4962 = vmatmul.msk.bf16.vlgmr.msra.gmra.mxu2 %vm1784_vm1, %v3328_v57  ;;  %v3267_v23 = vmul.f32 1.4142135, %v3203_v12  ;;  %v3272_v57 = vmul.f32 1.4142135, %v3208_v47  ;;  %v3019_v29 = vadd.f32 %v6592_v31, %v2951_v22  ;;  %vm3078_vm14 = vcmp.ge.f32.partialorder %v3014_v61, 0.0 }
 0x31b   : > { %4967 = vmatmul.msk.bf16.vlgmr.msra.gmra.mxu1 %vm1784_vm1, %v3333_v50  ;;  %1764 = vrot.lane.b32.xlu2 %v6208_v14, %s5180_s16  ;;  %v3142_v4 = vmul.f32 0.2, %v3014_v61 }
 0x31c   : > { %1627 = vrot.lane.b32.xlu0 %v6051_v32, %s5177_s10  ;;  %1697 = vrot.lane.b32.xlu1 %v6212_v49, %s5181_s18  ;;  %v1982_v32 = vsel %vm1946_vm3, %v1917_v0, %v6689_v42  ;;  %v3398_v49 = vld [vmem:[%s7691_s5 + $0x28] sm:$0xf]  ;;  %v3741_v42 = vsel %vm2437_vm0, %v3403_v36, 0  ;;  %v3331_v50 = vpack.c.bf16 %v3267_v23, %v3267_v23  ;;  %v3201_v0 = vsel %vm3073_vm13, %v3009_v39, %v3137_v40  ;;  %v6891_v36 = vpop.f32.mrf.mxu1 }
 0x31d   : > { %v6818_v26 = vpop.permute.xlu2 %1689  ;;  %v3646_v1 = vsel %vm2437_vm0, %v3398_v49, 0  ;;  %3750 = vmatpush.bf16.msra.mxu1 %v3741_v42  ;;  %v3336_v11 = vpack.c.bf16 %v3272_v57, %v3272_v57  ;;  %v3147_v49 = vmul.f32 0.2, %v3019_v29  ;;  %vm3083_vm15 = vcmp.ge.f32.partialorder %v3019_v29, 0.0 }
 0x31e   : > { %v1467_v20 = vpop.permute.xlu0 %1466  ;;  %v1534_v7 = vpop.permute.xlu1 %1533  ;;  %3655 = vmatpush.bf16.msra.mxu2 %v3646_v1  ;;  %v3206_v37 = vsel %vm3078_vm14, %v3014_v61, %v3142_v4 }
 0x31f   : > { %v2047_v25 = vsel %vm2011_vm4, %v1982_v32, %v1467_v20  ;;  %v3265_v20 = vmul.f32 1.4142135, %v3201_v0  ;;  %v5108_v32 = vld [vmem:[%s7688_s2 + $0x12] ss:$0 sm:$0xff]  ;;  %v2883_v0 = vmul.f32 %v5109_v43, %v6585_v15 }
 0x320   : > { %v2112_v46 = vsel %vm2076_vm5, %v2047_v25, %v1534_v7  ;;  %v6859_v38 = vpop.f32.mrf.mxu0  ;;  %v2890_v23 = vmul.f32 %v5108_v32, %v6585_v15 }
 0x321   : > { %4960 = vmatmul.msk.bf16.vlgmr.msrb.gmra.mxu3 %vm1784_vm1, %v3326_v60  ;;  %v2177_v5 = vsel %vm2141_vm6, %v2112_v46, %v6708_v18  ;;  %v2880_v18 = vmul.f32 %v5105_v34, %v6585_v15  ;;  %v3329_v25 = vpack.c.bf16 %v3265_v20, %v3265_v20  ;;  %v3211_v46 = vsel %vm3083_vm15, %v3019_v29, %v3147_v49 }
 0x322   : > { %v3270_v34 = vmul.f32 1.4142135, %v3206_v37  ;;  %v2947_v29 = vadd.f32 %v2883_v0, %v6538_v2  ;;  %v5114_v37 = vld [vmem:[%s7688_s2 + $0xe] ss:$0 sm:$0xff] }
 0x323   : > { %1408 = vrot.lane.b32.xlu2 %v6334_v51, %s5175_s29  ;;  %v2944_v7 = vadd.f32 %v2880_v18, %v6480_v63  ;;  %v3401_v63 = vld [vmem:[%s7691_s5 + $0x34] sm:$0xf] }
 0x324   : > { %1236 = vrot.lane.b32.xlu0 %v6305_v24, %s5176_s30  ;;  %1324 = vrot.lane.b32.xlu1 %v6325_v16, %s5179_s15  ;;  %v3396_v16 = vld [vmem:[%s7691_s5 + $0x20] sm:$0xf]  ;;  %v3703_v12 = vsel %vm2437_vm0, %v3401_v63, 0 }
 0x325   : > { %v6850_v62 = vpop.permute.xlu2 %1316  ;;  %v3608_v59 = vsel %vm2437_vm0, %v3396_v16, 0  ;;  %v3334_v16 = vpack.c.bf16 %v3270_v34, %v3270_v34  ;;  %v3404_v63 = vld [vmem:[%s7691_s5 + $0x40] sm:$0xf] }
 0x326   : > { %v1688_v6 = vpop.permute.xlu0 %1687  ;;  %v1755_v51 = vpop.permute.xlu1 %1754  ;;  %3617 = vmatpush.bf16.msrb.mxu3 %v3608_v59 }
 0x327   : > { %v2242_v24 = vsel %vm2206_vm7, %v2177_v5, %v1688_v6  ;;  %v3275_v6 = vmul.f32 1.4142135, %v3211_v46 }
 0x328   : > { %v2307_v10 = vsel %vm2271_vm8, %v2242_v24, %v1755_v51  ;;  %v6908_v5 = vpop.f32.mrf.mxu0  ;;  %v2949_v51 = vadd.f32 %v2885_v8, %v6577_v35 }
 0x329   : > { %4943 = vmatmul.msk.bf16.gmra.mxu0 %vm2372_vm9, %v2307_v10  ;;  %v3339_v59 = vpack.c.bf16 %v3275_v6, %v3275_v6 }
 0x32a   : > { %4965 = vmatmul.msk.bf16.vlgmr.msrb.gmra.mxu2 %vm1784_vm1, %v3331_v50  ;;  %v2954_v50 = vadd.f32 %v2890_v23, %v6711_v54  ;;  %v3017_v18 = vadd.f32 %v6592_v31, %v2949_v51 }
 0x32b   : > { %4970 = vmatmul.msk.bf16.vlgmr.msrb.gmra.mxu1 %vm1784_vm1, %v3336_v11  ;;  %1629 = vrot.lane.b32.xlu2 %v6208_v14, %s5177_s10  ;;  %v1841_v14 = vsel %vm1784_vm1, %v5806_v44, %v6753_v53  ;;  %v3399_v44 = vld [vmem:[%s7691_s5 + $0x2c] sm:$0xf]  ;;  %v3012_v53 = vadd.f32 %v6592_v31, %v2944_v7  ;;  %v6919_v11 = vpop.f32.mrf.mxu1 }
 0x32c   : > { %1478 = vrot.lane.b32.xlu0 %v7728_v27, %s5178_s11  ;;  %1545 = vrot.lane.b32.xlu1 %v7727_v3, %s5174_s28  ;;  %v3406_v3 = vld [vmem:[%s7691_s5 + $0x48] sm:$0xf]  ;;  %v3665_v1 = vsel %vm2437_vm0, %v3399_v44, 0  ;;  %v3022_v35 = vadd.f32 %v6592_v31, %v2954_v50  ;;  %v3145_v7 = vmul.f32 0.2, %v3017_v18  ;;  %vm3081_vm11 = vcmp.ge.f32.partialorder %v3017_v18, 0.0 }
 0x32d   : > { %v3798_v39 = vsel %vm2437_vm0, %v3406_v3, 0  ;;  %3712 = vmatpush.bf16.msrb.mxu2 %v3703_v12  ;;  %v6896_v47 = vpop.permute.xlu2 %1537  ;;  %v3140_v57 = vmul.f32 0.2, %v3012_v53  ;;  %vm3076_vm10 = vcmp.ge.f32.partialorder %v3012_v53, 0.0  ;;  %v3015_v3 = vadd.f32 %v6592_v31, %v2947_v29 }
 0x32e   : > { %v1315_v27 = vpop.permute.xlu0 %1314  ;;  %v1399_v60 = vpop.permute.xlu1 %1398  ;;  %3807 = vmatpush.bf16.msrb.mxu1 %v3798_v39  ;;  %vm3086_vm12 = vcmp.ge.f32.partialorder %v3022_v35, 0.0  ;;  %v3209_v39 = vsel %vm3081_vm11, %v3017_v18, %v3145_v7  ;;  %v2888_v44 = vmul.f32 %v5111_v55, %v6585_v15  ;;  %v2886_v50 = vmul.f32 %v5114_v37, %v6585_v15 }
 0x32f   : > { %v1919_v42 = vsel %vm1881_vm2, %v1841_v14, %v1315_v27  ;;  %v3204_v10 = vsel %vm3076_vm10, %v3012_v53, %v3140_v57  ;;  %v3150_v27 = vmul.f32 0.2, %v3022_v35  ;;  %v3273_v46 = vmul.f32 1.4142135, %v3209_v39 }
 0x330   : > { %v1984_v40 = vsel %vm1946_vm3, %v1919_v42, %v1399_v60  ;;  %v6926_v20 = vpop.f32.mrf.mxu0  ;;  %v5112_v60 = vld [vmem:[%s7688_s2 + $0x15] ss:$0 sm:$0xff]  ;;  %v3143_v23 = vmul.f32 0.2, %v3015_v3  ;;  %vm3079_vm13 = vcmp.ge.f32.partialorder %v3015_v3, 0.0  ;;  %v2952_v57 = vadd.f32 %v2888_v44, %v6651_v21 }
 0x331   : > { %4963 = vmatmul.msk.bf16.vlgmr.msra.gmra.mxu3 %vm1784_vm1, %v3329_v25  ;;  %v3760_v25 = vsel %vm2437_vm0, %v3404_v63, 0  ;;  %v3214_v53 = vsel %vm3086_vm12, %v3022_v35, %v3150_v27  ;;  %v2950_v29 = vadd.f32 %v2886_v50, %v6601_v58 }
 0x332   : > { %3674 = vmatpush.bf16.msra.mxu3 %v3665_v1  ;;  %v2893_v1 = vmul.f32 %v5112_v60, %v6585_v15  ;;  %v3020_v0 = vadd.f32 %v6592_v31, %v2952_v57 }
 0x333   : > { %v6950_v42 = vpop.f32.mrf.mxu1 }
 0x334   : > { %1699 = vrot.lane.b32.xlu0 %v6229_v52, %s5181_s18  ;;  %1766 = vrot.lane.b32.xlu1 %v6247_v13, %s5180_s16  ;;  %v2049_v52 = vsel %vm2011_vm4, %v1984_v40, %v6787_v33  ;;  %v3268_v33 = vmul.f32 1.4142135, %v3204_v10  ;;  %v3278_v40 = vmul.f32 1.4142135, %v3214_v53  ;;  %v2957_v51 = vadd.f32 %v2893_v1, %v6830_v17  ;;  %v3407_v17 = vld [vmem:[%s7691_s5 + $0x4c] sm:$0xf] }
 0x335   : > { %v6923_v61 = vpop.permute.xlu2 %1758  ;;  %v3148_v55 = vmul.f32 0.2, %v3020_v0  ;;  %vm3084_vm14 = vcmp.ge.f32.partialorder %v3020_v0, 0.0 }
 0x336   : > { %v1536_v22 = vpop.permute.xlu0 %1535  ;;  %v1620_v24 = vpop.permute.xlu1 %1619  ;;  %v3332_v49 = vpack.c.bf16 %v3268_v33, %v3268_v33  ;;  %v3342_v10 = vpack.c.bf16 %v3278_v40, %v3278_v40  ;;  %v3025_v18 = vadd.f32 %v6592_v31, %v2957_v51 }
 0x337   : > { %v2114_v13 = vsel %vm2076_vm5, %v2049_v52, %v1536_v22  ;;  %v3212_v44 = vsel %vm3084_vm14, %v3020_v0, %v3148_v55 }
 0x338   : > { %v2179_v54 = vsel %vm2141_vm6, %v2114_v13, %v1620_v24  ;;  %v6961_v22 = vpop.f32.mrf.mxu0  ;;  %v3337_v13 = vpack.c.bf16 %v3273_v46, %v3273_v46  ;;  %v3153_v60 = vmul.f32 0.2, %v3025_v18  ;;  %vm3089_vm15 = vcmp.ge.f32.partialorder %v3025_v18, 0.0 }
 0x339   : > { %v2244_v4 = vsel %vm2206_vm7, %v2179_v54, %v6818_v26  ;;  %v3409_v26 = vld [vmem:[%s7691_s5 + $0x54] sm:$0xf] }
 0x33a   : > { %4968 = vmatmul.msk.bf16.vlgmr.msra.gmra.mxu2 %vm1784_vm1, %v3334_v16  ;;  %v3855_v12 = vsel %vm2437_vm0, %v3409_v26, 0  ;;  %v3207_v16 = vsel %vm3079_vm13, %v3015_v3, %v3143_v23  ;;  %v3217_v1 = vsel %vm3089_vm15, %v3025_v18, %v3153_v60  ;;  %v5117_v23 = vld [vmem:[%s7688_s2 + $0x11] ss:$0 sm:$0xff] }
 0x33b   : > { %4973 = vmatmul.msk.bf16.vlgmr.msra.gmra.mxu1 %vm1784_vm1, %v3339_v59  ;;  %3769 = vmatpush.bf16.msra.mxu2 %v3760_v25  ;;  %v3412_v59 = vld [vmem:[%s7691_s5 + $0x60] sm:$0xf]  ;;  %v3271_v33 = vmul.f32 1.4142135, %v3207_v16  ;;  %v6985_v7 = vpop.f32.mrf.mxu1  ;;  %v3018_v25 = vadd.f32 %v6592_v31, %v2950_v29  ;;  %v2889_v50 = vmul.f32 %v5117_v23, %v6585_v15 }
 0x33c   : > { %3864 = vmatpush.bf16.msra.mxu1 %v3855_v12  ;;  %v3912_v35 = vsel %vm2437_vm0, %v3412_v59, 0  ;;  %v5118_v59 = vld [vmem:[%s7688_s2 + $0x16] ss:$0 sm:$0xff] }
 0x33d   : > { %v6957_v34 = vpop.permute.xlu2 %1402  ;;  %v3335_v63 = vpack.c.bf16 %v3271_v33, %v3271_v33  ;;  %v3146_v46 = vmul.f32 0.2, %v3018_v25  ;;  %vm3082_vm10 = vcmp.ge.f32.partialorder %v3018_v25, 0.0 }
 0x33e   : > { %v1757_v32 = vpop.permute.xlu0 %1756  ;;  %v1229_v14 = vpop.permute.xlu1 %1228 }
 0x33f   : > { %v2309_v2 = vsel %vm2271_vm8, %v2244_v4, %v1757_v32  ;;  %v1844_v8 = vsel %vm1784_vm1, %v7723_v56, %v1229_v14  ;;  %v3402_v56 = vld [vmem:[%s7691_s5 + $0x38] sm:$0xf]  ;;  %v5115_v4 = vld [vmem:[%s7688_s2 + $0x13] ss:$0 sm:$0xff] }
 0x340   : > { %4944 = vmatmul.msk.bf16.gmra.mxu0 %vm2372_vm9, %v2309_v2  ;;  %v1921_v24 = vsel %vm1881_vm2, %v1844_v8, %v6850_v62  ;;  %v3722_v21 = vsel %vm2437_vm0, %v3402_v56, 0  ;;  %v3817_v62 = vsel %vm2437_vm0, %v3407_v17, 0  ;;  %v5116_v2 = vld [vmem:[%s7688_s2 + $0x18] ss:$0 sm:$0xff]  ;;  %v6995_v58 = vpop.f32.mrf.mxu0  ;;  %v2891_v53 = vmul.f32 %v5115_v4, %v6585_v15  ;;  %v5119_v4 = vld [vmem:[%s7688_s2 + $0x1b] ss:$0 sm:$0xff] }
 0x341   : > { %4966 = vmatmul.msk.bf16.vlgmr.msrb.gmra.mxu3 %vm1784_vm1, %v3332_v49  ;;  %v2896_v37 = vmul.f32 %v5116_v2, %v6585_v15  ;;  %v3276_v8 = vmul.f32 1.4142135, %v3212_v44  ;;  %v3210_v56 = vsel %vm3082_vm10, %v3018_v25, %v3146_v46 }
 0x342   : > { %3731 = vmatpush.bf16.msrb.mxu3 %v3722_v21  ;;  %v2955_v57 = vadd.f32 %v2891_v53, %v6772_v48 }
 0x343   : > { %v2960_v51 = vadd.f32 %v2896_v37, %v6926_v20  ;;  %v3415_v20 = vld [vmem:[%s7691_s5 + $0x6c] sm:$0xf] }
 0x344   : > { %v3023_v48 = vadd.f32 %v6592_v31, %v2955_v57 }
 0x345   : > { %v6998_v26 = vpop.permute.xlu2 %1623  ;;  %v3028_v0 = vadd.f32 %v6592_v31, %v2960_v51 }
 0x346   : > { %v1401_v43 = vpop.permute.xlu0 %1400  ;;  %v1471_v6 = vpop.permute.xlu1 %1470  ;;  %vm3087_vm11 = vcmp.ge.f32.partialorder %v3023_v48, 0.0 }
 0x347   : > { %v1986_v52 = vsel %vm1946_vm3, %v1921_v24, %v1401_v43  ;;  %v3340_v24 = vpack.c.bf16 %v3276_v8, %v3276_v8  ;;  %v3156_v55 = vmul.f32 0.2, %v3028_v0  ;;  %vm3092_vm12 = vcmp.ge.f32.partialorder %v3028_v0, 0.0 }
 0x348   : > { %v2051_v54 = vsel %vm2011_vm4, %v1986_v52, %v1471_v6  ;;  %v3410_v52 = vld [vmem:[%s7691_s5 + $0x58] sm:$0xf] }
 0x349   : > { %v2116_v32 = vsel %vm2076_vm5, %v2051_v54, %v6896_v47  ;;  %v3405_v47 = vld [vmem:[%s7691_s5 + $0x44] sm:$0xf]  ;;  %v3151_v54 = vmul.f32 0.2, %v3023_v48 }
 0x34a   : > { %4971 = vmatmul.msk.bf16.vlgmr.msrb.gmra.mxu2 %vm1784_vm1, %v3337_v13  ;;  %v3779_v12 = vsel %vm2437_vm0, %v3405_v47, 0  ;;  %v2517_v13 = vpop.f32.mrf.mxu0  ;;  %v3220_v47 = vsel %vm3092_vm12, %v3028_v0, %v3156_v55  ;;  %v5123_v0 = vld [vmem:[%s7688_s2 + $0x19] ss:$0 sm:$0xff] }
 0x34b   : > { %4976 = vmatmul.msk.bf16.vlgmr.msrb.gmra.mxu1 %vm1784_vm1, %v3342_v10  ;;  %3826 = vmatpush.bf16.msrb.mxu2 %v3817_v62  ;;  %v3874_v10 = vsel %vm2437_vm0, %v3410_v52, 0  ;;  %v3969_v62 = vsel %vm2437_vm0, %v3415_v20, 0 }
 0x34c   : > { %3921 = vmatpush.bf16.msrb.mxu1 %v3912_v35  ;;  %v2953_v35 = vadd.f32 %v2889_v50, %v6694_v9 }
 0x34d   : > { %v7025_v17 = vpop.permute.xlu2 %1232 }
 0x34e   : > { %v1622_v14 = vpop.permute.xlu0 %1621  ;;  %v1692_v27 = vpop.permute.xlu1 %1691  ;;  %v3021_v2 = vadd.f32 %v6592_v31, %v2953_v35 }
 0x34f   : > { %v2181_v49 = vsel %vm2141_vm6, %v2116_v32, %v1622_v14 }
 0x350   : > { %v2246_v3 = vsel %vm2206_vm7, %v2181_v49, %v1692_v27  ;;  %v2894_v27 = vmul.f32 %v5118_v59, %v6585_v15  ;;  %v3149_v53 = vmul.f32 0.2, %v3021_v2  ;;  %vm3085_vm13 = vcmp.ge.f32.partialorder %v3021_v2, 0.0 }
 0x351   : > { %v2311_v39 = vsel %vm2271_vm8, %v2246_v3, %v6923_v61  ;;  %4969 = vmatmul.msk.bf16.vlgmr.msra.gmra.mxu3 %vm1784_vm1, %v3335_v63  ;;  %v3281_v61 = vmul.f32 1.4142135, %v3217_v1  ;;  %v3215_v63 = vsel %vm3087_vm11, %v3023_v48, %v3151_v54  ;;  %v2899_v3 = vmul.f32 %v5119_v4, %v6585_v15  ;;  %v3413_v54 = vld [vmem:[%s7691_s5 + $0x64] sm:$0xf] }
 0x352   : > { %4945 = vmatmul.msk.bf16.gmra.mxu0 %vm2372_vm9, %v2311_v39  ;;  %3788 = vmatpush.bf16.msra.mxu3 %v3779_v12  ;;  %v7051_v49 = vpop.f32.mrf.mxu0  ;;  %v2958_v12 = vadd.f32 %v2894_v27, %v6859_v38  ;;  %v5121_v39 = vld [vmem:[%s7688_s2 + $0x14] ss:$0 sm:$0xff]  ;;  %v3279_v44 = vmul.f32 1.4142135, %v3215_v63  ;;  %v3284_v1 = vmul.f32 1.4142135, %v3220_v47  ;;  %v2897_v27 = vmul.f32 %v5123_v0, %v6585_v15 }
 0x353   : > { %v3345_v21 = vpack.c.bf16 %v3281_v61, %v3281_v61  ;;  %v2963_v23 = vadd.f32 %v2899_v3, %v2517_v13  ;;  %v3408_v38 = vld [vmem:[%s7691_s5 + $0x50] sm:$0xf]  ;;  %v3931_v4 = vsel %vm2437_vm0, %v3413_v54, 0 }
 0x354   : > { %v3026_v57 = vadd.f32 %v6592_v31, %v2958_v12  ;;  %v3348_v50 = vpack.c.bf16 %v3284_v1, %v3284_v1 }
 0x355   : > { %v7015_v40 = vpop.f32.mrf.mxu1  ;;  %v7056_v25 = vpop.permute.xlu2 %1474  ;;  %v3031_v52 = vadd.f32 %v6592_v31, %v2963_v23  ;;  %v3411_v23 = vld [vmem:[%s7691_s5 + $0x5c] sm:$0xf] }
 0x356   : > { %v1231_v43 = vpop.permute.xlu0 %1230  ;;  %v1319_v6 = vpop.permute.xlu1 %1318  ;;  %v3154_v48 = vmul.f32 0.2, %v3026_v57  ;;  %vm3090_vm14 = vcmp.ge.f32.partialorder %v3026_v57, 0.0 }
 0x357   : > { %v1847_v16 = vsel %vm1784_vm1, %v5896_v45, %v1231_v43  ;;  %v3274_v45 = vmul.f32 1.4142135, %v3210_v56  ;;  %v2892_v43 = vmul.f32 %v5121_v39, %v6585_v15  ;;  %v3213_v56 = vsel %vm3085_vm13, %v3021_v2, %v3149_v53 }
 0x358   : > { %v1923_v18 = vsel %vm1881_vm2, %v1847_v16, %v1319_v6  ;;  %v7079_v16 = vpop.f32.mrf.mxu2  ;;  %vm3095_vm15 = vcmp.ge.f32.partialorder %v3031_v52, 0.0 }
 0x359   : > { %v1988_v32 = vsel %vm1946_vm3, %v1923_v18, %v6957_v34  ;;  %v3338_v14 = vpack.c.bf16 %v3274_v45, %v3274_v45  ;;  %v3159_v18 = vmul.f32 0.2, %v3031_v52 }
 0x35a   : > { %4974 = vmatmul.msk.bf16.vlgmr.msra.gmra.mxu2 %vm1784_vm1, %v3340_v24  ;;  %v3343_v24 = vpack.c.bf16 %v3279_v44, %v3279_v44  ;;  %v7077_v13 = vpop.f32.mrf.mxu0  ;;  %v2961_v44 = vadd.f32 %v2897_v27, %v6961_v22  ;;  %v5129_v27 = vld [vmem:[%s7688_s2 + $0x1a] ss:$0 sm:$0xff] }
 0x35b   : > { %4979 = vmatmul.msk.bf16.vlgmr.msra.gmra.mxu1 %vm1784_vm1, %v3345_v21  ;;  %3883 = vmatpush.bf16.msra.mxu2 %v3874_v10  ;;  %v3277_v21 = vmul.f32 1.4142135, %v3213_v56  ;;  %v2956_v10 = vadd.f32 %v2892_v43, %v6792_v19  ;;  %v3418_v19 = vld [vmem:[%s7691_s5 + $0x78] sm:$0xf] }
 0x35c   : > { %3978 = vmatpush.bf16.msra.mxu1 %v3969_v62  ;;  %v1850_v62 = vsel %vm1784_vm1, %v5910_v28, %v7025_v17  ;;  %v3218_v17 = vsel %vm3090_vm14, %v3026_v57, %v3154_v48 }
 0x35d   : > { %v7047_v60 = vpop.f32.mrf.mxu1  ;;  %v1696_v20 = vpop.permute.xlu2 %1695  ;;  %v3341_v35 = vpack.c.bf16 %v3277_v21, %v3277_v21  ;;  %v3024_v55 = vadd.f32 %v6592_v31, %v2956_v10  ;;  %v3282_v63 = vmul.f32 1.4142135, %v3218_v17  ;;  %v5081_v10 = vld [vmem:[%s7688_s2 + $0x1c] ss:$0 sm:$0xff] }
 0x35e   : > { %v1473_v33 = vpop.permute.xlu0 %1472  ;;  %v1540_v29 = vpop.permute.xlu1 %1539 }
 0x35f   : > { %v2053_v9 = vsel %vm2011_vm4, %v1988_v32, %v1473_v33  ;;  %v7095_v33 = vpop.f32.mrf.mxu3  ;;  %v4026_v32 = vsel %vm2437_vm0, %v3418_v19, 0  ;;  %v3152_v31 = vmul.f32 0.2, %v3024_v55  ;;  %vm3088_vm10 = vcmp.ge.f32.partialorder %v3024_v55, 0.0 }
 0x360   : > { %v2118_v34 = vsel %vm2076_vm5, %v2053_v9, %v1540_v29  ;;  %v5100_v29 = vld [vmem:[%s7688_s2 + $0x1e] ss:$0 sm:$0xff]  ;;  %v3223_v9 = vsel %vm3095_vm15, %v3031_v52, %v3159_v18  ;;  %v7111_v12 = vpop.f32.mrf.mxu2 }
 0x361   : > { %4972 = vmatmul.msk.bf16.vlgmr.msrb.gmra.mxu3 %vm1784_vm1, %v3338_v14  ;;  %v2183_v37 = vsel %vm2141_vm6, %v2118_v34, %v6998_v26  ;;  %v3836_v26 = vsel %vm2437_vm0, %v3408_v38, 0  ;;  %v2902_v47 = vmul.f32 %v5100_v29, %v6585_v15  ;;  %v5125_v34 = vld [vmem:[%s7688_s2 + $0x17] ss:$0 sm:$0xff]  ;;  %v3287_v39 = vmul.f32 1.4142135, %v3223_v9 }
 0x362   : > { %3845 = vmatpush.bf16.msrb.mxu3 %v3836_v26  ;;  %v2525_v2 = vpop.f32.mrf.mxu0  ;;  %v3216_v43 = vsel %vm3088_vm10, %v3024_v55, %v3152_v31  ;;  %v2895_v22 = vmul.f32 %v5125_v34, %v6585_v15 }
 0x363   : > { %v2966_v53 = vadd.f32 %v2902_v47, %v2525_v2  ;;  %v3280_v21 = vmul.f32 1.4142135, %v3216_v43 }
 0x364   : > { %v2959_v48 = vadd.f32 %v2895_v22, %v6908_v5  ;;  %v3416_v5 = vld [vmem:[%s7691_s5 + $0x70] sm:$0xf] }
 0x365   : > { %v1323_v38 = vpop.permute.xlu2 %1322  ;;  %v3344_v19 = vpack.c.bf16 %v3280_v21, %v3280_v21  ;;  %v3988_v17 = vsel %vm2437_vm0, %v3416_v5, 0 }
 0x366   : > { %v1694_v8 = vpop.permute.xlu0 %1693  ;;  %v1761_v46 = vpop.permute.xlu1 %1760 }
 0x367   : > { %v2248_v61 = vsel %vm2206_vm7, %v2183_v37, %v1694_v8  ;;  %v7130_v26 = vpop.f32.mrf.mxu3 }
 0x368   : > { %v2313_v6 = vsel %vm2271_vm8, %v2248_v61, %v1761_v46  ;;  %v7071_v51 = vpop.f32.mrf.mxu1  ;;  %v3346_v46 = vpack.c.bf16 %v3282_v63, %v3282_v63 }
 0x369   : > { %4946 = vmatmul.msk.bf16.gmra.mxu0 %vm2372_vm9, %v2313_v6  ;;  %v3893_v6 = vsel %vm2437_vm0, %v3411_v23, 0 }
 0x36a   : > { %4977 = vmatmul.msk.bf16.vlgmr.msrb.gmra.mxu2 %vm1784_vm1, %v3343_v24  ;;  %v3351_v24 = vpack.c.bf16 %v3287_v39, %v3287_v39  ;;  %v2527_v31 = vpop.f32.mrf.mxu0 }
 0x36b   : > { %4982 = vmatmul.msk.bf16.vlgmr.msrb.gmra.mxu1 %vm1784_vm1, %v3348_v50  ;;  %3940 = vmatpush.bf16.msrb.mxu2 %v3931_v4 }
 0x36c   : > { %4035 = vmatpush.bf16.msrb.mxu1 %v4026_v32 }
 0x36e   : > { %v1321_v45 = vpop.permute.xlu0 %1320  ;;  %v1405_v59 = vpop.permute.xlu1 %1404 }
 0x36f   : > { %v1925_v14 = vsel %vm1881_vm2, %v1850_v62, %v1321_v45  ;;  %v7152_v32 = vpop.f32.mrf.mxu3 }
 0x370   : > { %v3469_v28 = vpop.f32.mrf.mxu1  ;;  %v1990_v3 = vsel %vm1946_vm3, %v1925_v14, %v1405_v59  ;;  %v1544_v14 = vpop.permute.xlu2 %1543 }
 0x371   : > { %4975 = vmatmul.msk.bf16.vlgmr.msra.gmra.mxu3 %vm1784_vm1, %v3341_v35  ;;  %v2055_v8 = vsel %vm2011_vm4, %v1990_v3, %v7056_v25  ;;  %v7127_v25 = vld [vmem:[%s7690_s4] ss:$0 sm:$0xff] }
 0x372   : > { %v3029_v56 = vadd.f32 %v7127_v25, %v2961_v44  ;;  %3902 = vmatpush.bf16.msra.mxu3 %v3893_v6  ;;  %v3034_v50 = vadd.f32 %v7127_v25, %v2966_v53  ;;  %v3027_v28 = vadd.f32 %v7127_v25, %v2959_v48  ;;  %v3414_v53 = vld [vmem:[%s7691_s5 + $0x68] sm:$0xf] }
 0x374   : > { %v3157_v62 = vmul.f32 0.2, %v3029_v56  ;;  %v3162_v45 = vmul.f32 0.2, %v3034_v50  ;;  %vm3093_vm11 = vcmp.ge.f32.partialorder %v3029_v56, 0.0  ;;  %vm3098_vm12 = vcmp.ge.f32.partialorder %v3034_v50, 0.0 }
 0x375   : > { %v3155_v63 = vmul.f32 0.2, %v3027_v28  ;;  %vm3091_vm13 = vcmp.ge.f32.partialorder %v3027_v28, 0.0 }
 0x376   : > { %v1542_v1 = vpop.permute.xlu0 %1541  ;;  %v1626_v37 = vpop.permute.xlu1 %1625  ;;  %v3221_v55 = vsel %vm3093_vm11, %v3029_v56, %v3157_v62  ;;  %v3226_v4 = vsel %vm3098_vm12, %v3034_v50, %v3162_v45  ;;  %v4668_v62 = vsel %vm1784_vm1, %v7071_v51, 0.0  ;;  %v5127_v51 = vld [vmem:[%s7688_s2 + $0x21] ss:$0 sm:$0xff] }
 0x377   : > { %v2120_v61 = vsel %vm2076_vm5, %v2055_v8, %v1542_v1  ;;  %v3285_v2 = vmul.f32 1.4142135, %v3221_v55  ;;  %v3290_v3 = vmul.f32 1.4142135, %v3226_v4  ;;  %v3421_v1 = vld [vmem:[%s7691_s5 + $0x84] sm:$0xf]  ;;  %v2898_v8 = vmul.f32 %v5129_v27, %v6585_v15  ;;  %v7179_v56 = vpop.f32.mrf.mxu3 }
 0x378   : > { %v7120_v57 = vpop.f32.mrf.mxu1  ;;  %v2185_v52 = vsel %vm2141_vm6, %v2120_v61, %v1626_v37  ;;  %v3950_v37 = vsel %vm2437_vm0, %v3414_v53, 0  ;;  %v3219_v43 = vsel %vm3091_vm13, %v3027_v28, %v3155_v63  ;;  %v1765_v50 = vpop.permute.xlu2 %1764  ;;  %v5083_v27 = vld [vmem:[%s7688_s2 + $0x1d] ss:$0 sm:$0xff] }
 0x379   : > { %v2250_v59 = vsel %vm2206_vm7, %v2185_v52, %v1696_v20  ;;  %v2900_v20 = vmul.f32 %v5081_v10, %v6585_v15  ;;  %v3349_v61 = vpack.c.bf16 %v3285_v2, %v3285_v2  ;;  %v3354_v22 = vpack.c.bf16 %v3290_v3, %v3290_v3 }
 0x37a   : > { %4980 = vmatmul.msk.bf16.vlgmr.msra.gmra.mxu2 %vm1784_vm1, %v3346_v46  ;;  %v2962_v52 = vadd.f32 %v2898_v8, %v6995_v58 }
 0x37b   : > { %4985 = vmatmul.msk.bf16.vlgmr.msra.gmra.mxu1 %vm1784_vm1, %v3351_v24  ;;  %3997 = vmatpush.bf16.msra.mxu2 %v3988_v17  ;;  %v2964_v47 = vadd.f32 %v2900_v20, %v7051_v49  ;;  %v4083_v49 = vsel %vm2437_vm0, %v3421_v1, 0  ;;  %v3283_v24 = vmul.f32 1.4142135, %v3219_v43  ;;  %v3419_v20 = vld [vmem:[%s7691_s5 + $0x7c] sm:$0xf] }
 0x37c   : > { %4092 = vmatpush.bf16.msra.mxu1 %v4083_v49  ;;  %v3030_v17 = vadd.f32 %v7127_v25, %v2962_v52  ;;  %v2901_v49 = vmul.f32 %v5083_v27, %v6585_v15  ;;  %v3422_v52 = vld [vmem:[%s7691_s5 + $0x88] sm:$0xf] }
 0x37d   : > { %v7140_v0 = vpop.f32.mrf.mxu2  ;;  %v3032_v6 = vadd.f32 %v7127_v25, %v2964_v47  ;;  %v3347_v5 = vpack.c.bf16 %v3283_v24, %v3283_v24  ;;  %v2905_v47 = vmul.f32 %v5127_v51, %v6585_v15 }
 0x37e   : > { %v1763_v18 = vpop.permute.xlu0 %1762  ;;  %v1235_v35 = vpop.permute.xlu1 %1234  ;;  %v3158_v3 = vmul.f32 0.2, %v3030_v17  ;;  %vm3094_vm15 = vcmp.ge.f32.partialorder %v3030_v17, 0.0 }
 0x37f   : > { %v2315_v54 = vsel %vm2271_vm8, %v2250_v59, %v1763_v18  ;;  %v1853_v9 = vsel %vm1784_vm1, %v5971_v30, %v1235_v35  ;;  %v3160_v21 = vmul.f32 0.2, %v3032_v6  ;;  %vm3096_vm14 = vcmp.ge.f32.partialorder %v3032_v6, 0.0 }
 0x380   : > { %4947 = vmatmul.msk.bf16.gmra.mxu0 %vm2372_vm9, %v2315_v54  ;;  %v3526_v29 = vpop.f32.mrf.mxu1  ;;  %v1927_v30 = vsel %vm1881_vm2, %v1853_v9, %v1323_v38  ;;  %v5104_v54 = vld [vmem:[%s7688_s2 + $0x1f] ss:$0 sm:$0xff]  ;;  %v3222_v43 = vsel %vm3094_vm15, %v3030_v17, %v3158_v3 }
 0x381   : > { %4978 = vmatmul.msk.bf16.vlgmr.msrb.gmra.mxu3 %vm1784_vm1, %v3344_v19  ;;  %v3224_v55 = vsel %vm3096_vm14, %v3032_v6, %v3160_v21  ;;  %v2903_v9 = vmul.f32 %v5104_v54, %v6585_v15  ;;  %v3417_v6 = vld [vmem:[%s7691_s5 + $0x74] sm:$0xf]  ;;  %v2965_v21 = vadd.f32 %v2901_v49, %v7077_v13 }
 0x382   : > { %3959 = vmatpush.bf16.msrb.mxu3 %v3950_v37  ;;  %v3288_v2 = vmul.f32 1.4142135, %v3224_v55 }
 0x384   : > { %v3352_v8 = vpack.c.bf16 %v3288_v2, %v3288_v2 }
 0x385   : > { %v7160_v34 = vpop.f32.mrf.mxu2 }
 0x386   : > { %v1407_v39 = vpop.permute.xlu0 %1406  ;;  %v1477_v44 = vpop.permute.xlu1 %1476 }
 0x387   : > { %v1992_v46 = vsel %vm1946_vm3, %v1927_v30, %v1407_v39  ;;  %v2967_v39 = vadd.f32 %v2903_v9, %v2527_v31 }
 0x388   : > { %v7173_v23 = vpop.f32.mrf.mxu1  ;;  %v2057_v38 = vsel %vm2011_vm4, %v1992_v46, %v1477_v44 }
 0x389   : > { %v2122_v45 = vsel %vm2076_vm5, %v2057_v38, %v1544_v14  ;;  %v4045_v14 = vsel %vm2437_vm0, %v3419_v20, 0  ;;  %v3035_v31 = vadd.f32 %v7127_v25, %v2967_v39  ;;  %v1409_v38 = vpop.permute.xlu2 %1408 }
 0x38a   : > { %4983 = vmatmul.msk.bf16.vlgmr.msrb.gmra.mxu2 %vm1784_vm1, %v3349_v61 }
 0x38b   : > { %4988 = vmatmul.msk.bf16.vlgmr.msrb.gmra.mxu1 %vm1784_vm1, %v3354_v22  ;;  %4054 = vmatpush.bf16.msrb.mxu2 %v4045_v14  ;;  %vm3099_vm11 = vcmp.ge.f32.partialorder %v3035_v31, 0.0 }
 0x38d   : > { %v7182_v48 = vpop.f32.mrf.mxu0  ;;  %v3486_v10 = vpop.f32.mrf.mxu2 }
 0x38e   : > { %v4669_v59 = vsel %vm1784_vm1, %v3486_v10, 0.0  ;;  %v1628_v18 = vpop.permute.xlu0 %1627  ;;  %v1698_v35 = vpop.permute.xlu1 %1697  ;;  %v3286_v10 = vmul.f32 1.4142135, %v3222_v43 }
 0x38f   : > { %v7191_v19 = vadd.f32 %v4669_v59, %v4668_v62  ;;  %v2187_v58 = vsel %vm2141_vm6, %v2122_v45, %v1628_v18  ;;  %v4102_v62 = vsel %vm2437_vm0, %v3422_v52, 0  ;;  %v3163_v18 = vmul.f32 0.2, %v3035_v31 }
 0x390   : > { %v2252_v29 = vsel %vm2206_vm7, %v2187_v58, %v1698_v35  ;;  %v3583_v28 = vpop.f32.mrf.mxu1  ;;  %v3350_v51 = vpack.c.bf16 %v3286_v10, %v3286_v10 }
 0x391   : > { %v2317_v4 = vsel %vm2271_vm8, %v2252_v29, %v1765_v50  ;;  %4981 = vmatmul.msk.bf16.vlgmr.msra.gmra.mxu3 %vm1784_vm1, %v3347_v5  ;;  %v4007_v50 = vsel %vm2437_vm0, %v3417_v6, 0  ;;  %v3033_v29 = vadd.f32 %v7127_v25, %v2965_v21  ;;  %v3227_v55 = vsel %vm3099_vm11, %v3035_v31, %v3163_v18  ;;  %v1630_v9 = vpop.permute.xlu2 %1629 }
 0x392   : > { %4948 = vmatmul.msk.bf16.gmra.mxu0 %vm2372_vm9, %v2317_v4  ;;  %4016 = vmatpush.bf16.msra.mxu3 %v4007_v50  ;;  %v5130_v4 = vld [vmem:[%s7688_s2 + $0x22] ss:$0 sm:$0xff]  ;;  %v3291_v2 = vmul.f32 1.4142135, %v3227_v55 }
 0x393   : > { %v3161_v14 = vmul.f32 0.2, %v3033_v29 }
 0x394   : > { %v7210_v63 = vpop.f32.mrf.mxu3 }
 0x395   : > { %v2532_v44 = vpop.f32.mrf.mxu0  ;;  %v3488_v53 = vpop.f32.mrf.mxu2 }
 0x396   : > { %v2969_v1 = vadd.f32 %v2905_v47, %v2532_v44  ;;  %v1237_v30 = vpop.permute.xlu0 %1236  ;;  %v1325_v37 = vpop.permute.xlu1 %1324  ;;  %v2906_v44 = vmul.f32 %v5130_v4, %v6585_v15  ;;  %v5124_v53 = vld [vmem:[%s7688_s2 + $0x20] ss:$0 sm:$0xff] }
 0x397   : > { %v1856_v22 = vsel %vm1784_vm1, %v7724_v41, %v1237_v30  ;;  %v2904_v10 = vmul.f32 %v5124_v53, %v6585_v15 }
 0x398   : > { %v3037_v46 = vadd.f32 %v7127_v25, %v2969_v1  ;;  %v7215_v61 = vpop.f32.mrf.mxu1  ;;  %v1929_v41 = vsel %vm1881_vm2, %v1856_v22, %v1325_v37  ;;  %vm3097_vm2 = vcmp.ge.f32.partialorder %v3033_v29, 0.0  ;;  %v3420_v22 = vld [vmem:[%s7691_s5 + $0x80] sm:$0xf] }
 0x399   : > { %v1994_v13 = vsel %vm1946_vm3, %v1929_v41, %v1409_v38  ;;  %v3355_v38 = vpack.c.bf16 %v3291_v2, %v3291_v2  ;;  %v2968_v41 = vadd.f32 %v2904_v10, %v7182_v48 }
 0x39a   : > { %vm3101_vm10 = vcmp.ge.f32.partialorder %v3037_v46, 0.0  ;;  %v3165_v24 = vmul.f32 0.2, %v3037_v46  ;;  %4986 = vmatmul.msk.bf16.vlgmr.msra.gmra.mxu2 %vm1784_vm1, %v3352_v8  ;;  %v3225_v8 = vsel %vm3097_vm2, %v3033_v29, %v3161_v14  ;;  %v3423_v29 = vld [vmem:[%s7691_s5 + $0x8c] sm:$0xf] }
 0x39b   : > { %4111 = vmatpush.bf16.msra.mxu2 %v4102_v62 }
 0x39c   : > { %v3229_v45 = vsel %vm3101_vm10, %v3037_v46, %v3165_v24  ;;  %v7231_v59 = vpop.f32.mrf.mxu3  ;;  %v4673_v46 = vsel %vm1784_vm1, %v7120_v57, 0.0 }
 0x39d   : > { %v3293_v35 = vmul.f32 1.4142135, %v3229_v45  ;;  %v3543_v54 = vpop.f32.mrf.mxu2  ;;  %v3289_v45 = vmul.f32 1.4142135, %v3225_v8 }
 0x39e   : > { %v1479_v58 = vpop.permute.xlu0 %1478  ;;  %v1546_v5 = vpop.permute.xlu1 %1545  ;;  %v4675_v21 = vsel %vm1784_vm1, %v3543_v54, 0.0  ;;  %v3424_v54 = vld [vmem:[%s7691_s5 + $0x90] sm:$0xf] }
 0x39f   : > { %v3357_v28 = vpack.c.bf16 %v3293_v35, %v3293_v35  ;;  %v2059_v17 = vsel %vm2011_vm4, %v1994_v13, %v1479_v58  ;;  %v3036_v13 = vadd.f32 %v7127_v25, %v2968_v41  ;;  %v3427_v41 = vld [vmem:[%s7691_s5 + $0x9c] sm:$0xf] }
 0x3a0   : > { %v3640_v20 = vpop.f32.mrf.mxu1  ;;  %v2124_v27 = vsel %vm2076_vm5, %v2059_v17, %v1546_v5  ;;  %v3353_v5 = vpack.c.bf16 %v3289_v45, %v3289_v45  ;;  %v4121_v17 = vsel %vm2437_vm0, %v3423_v29, 0  ;;  %v3426_v45 = vld [vmem:[%s7691_s5 + $0x98] sm:$0xf] }
 0x3a1   : > { %4984 = vmatmul.msk.bf16.vlgmr.msrb.gmra.mxu3 %vm1784_vm1, %v3350_v51  ;;  %4991 = vmatmul.msk.bf16.vlgmr.msra.gmra.mxu1 %vm1784_vm1, %v3357_v28  ;;  %v2189_v1 = vsel %vm2141_vm6, %v2124_v27, %v1630_v9  ;;  %v3425_v28 = vld [vmem:[%s7691_s5 + $0x94] sm:$0xf]  ;;  %v4140_v51 = vsel %vm2437_vm0, %v3424_v54, 0  ;;  %v3164_v4 = vmul.f32 0.2, %v3036_v13  ;;  %vm3100_vm4 = vcmp.ge.f32.partialorder %v3036_v13, 0.0 }
 0x3a2   : > { %v4159_v20 = vsel %vm2437_vm0, %v3425_v28, 0  ;;  %4149 = vmatpush.bf16.msrb.mxu1 %v4140_v51 }
 0x3a3   : > { %v3228_v53 = vsel %vm3100_vm4, %v3036_v13, %v3164_v4  ;;  %v4685_v4 = vsel %vm1784_vm1, %v7215_v61, 0.0 }
 0x3a4   : > { %v3505_v47 = vpop.f32.mrf.mxu3 }
 0x3a5   : > { %v4671_v3 = vsel %vm1784_vm1, %v3505_v47, 0.0  ;;  %v3545_v39 = vpop.f32.mrf.mxu2 }
 0x3a6   : > { %v4672_v30 = vadd.f32 %v4671_v3, %v7191_v19  ;;  %v1700_v37 = vpop.permute.xlu0 %1699  ;;  %v2535_v49 = vpop.f32.mrf.mxu0  ;;  %v4064_v19 = vsel %vm2437_vm0, %v3420_v22, 0  ;;  %v5131_v3 = vld [vmem:[%s7688_s2 + $0x23] ss:$0 sm:$0xff] }
 0x3a7   : > { %v2254_v43 = vsel %vm2206_vm7, %v2189_v1, %v1700_v37  ;;  %v2970_v6 = vadd.f32 %v2906_v44, %v2535_v49  ;;  %v1767_v31 = vpop.permute.xlu1 %1766  ;;  %4073 = vmatpush.bf16.msrb.mxu3 %v4064_v19  ;;  %v4679_v44 = vsel %vm1784_vm1, %v7173_v23, 0.0  ;;  %v5132_v49 = vld [vmem:[%s7688_s2 + $0x24] ss:$0 sm:$0xff] }
 0x3a8   : > { %v4674_v24 = vadd.f32 %v4673_v46, %v4672_v30  ;;  %v2319_v50 = vsel %vm2271_vm8, %v2254_v43, %v1767_v31  ;;  %v7256_v52 = vpop.f32.mrf.mxu1  ;;  %v2907_v46 = vmul.f32 %v5131_v3, %v6585_v15  ;;  %v2908_v23 = vmul.f32 %v5132_v49, %v6585_v15 }
 0x3a9   : > { %v3038_v57 = vadd.f32 %v7127_v25, %v2970_v6  ;;  %4949 = vmatmul.msk.bf16.gmra.mxu0 %vm2372_vm9, %v2319_v50  ;;  %v3292_v6 = vmul.f32 1.4142135, %v3228_v53 }
 0x3aa   : > { %v4676_v62 = vadd.f32 %v4675_v21, %v4674_v24  ;;  %4989 = vmatmul.msk.bf16.vlgmr.msrb.gmra.mxu2 %vm1784_vm1, %v3355_v38 }
 0x3ab   : > { %v3166_v35 = vmul.f32 0.2, %v3038_v57  ;;  %vm3102_vm3 = vcmp.ge.f32.partialorder %v3038_v57, 0.0  ;;  %4168 = vmatpush.bf16.msrb.mxu2 %v4159_v20  ;;  %v3356_v19 = vpack.c.bf16 %v3292_v6, %v3292_v6 }
 0x3ac   : > { %v3507_v18 = vpop.f32.mrf.mxu3 }
 0x3ad   : > { %v3600_v58 = vpop.f32.mrf.mxu2  ;;  %v3230_v55 = vsel %vm3102_vm3, %v3038_v57, %v3166_v35  ;;  %v4178_v35 = vsel %vm2437_vm0, %v3426_v45, 0  ;;  %v4691_v45 = vsel %vm1784_vm1, %v7256_v52, 0.0 }
 0x3ae   : > { %v3294_v14 = vmul.f32 1.4142135, %v3230_v55  ;;  %v2537_v9 = vpop.f32.mrf.mxu0  ;;  %v4681_v8 = vsel %vm1784_vm1, %v3600_v58, 0.0  ;;  %v4197_v58 = vsel %vm2437_vm0, %v3427_v41, 0 }
 0x3af   : > { %v2971_v31 = vadd.f32 %v2907_v46, %v2537_v9  ;;  %4206 = vmatpush.bf16.msra.mxu1 %v4197_v58 }
 0x3b0   : > { %v3697_v48 = vpop.f32.mrf.mxu1  ;;  %v3358_v1 = vpack.c.bf16 %v3294_v14, %v3294_v14 }
 0x3b1   : > { %4987 = vmatmul.msk.bf16.vlgmr.msra.gmra.mxu3 %vm1784_vm1, %v3353_v5  ;;  %v3039_v21 = vadd.f32 %v7127_v25, %v2971_v31 }
 0x3b2   : > { %4130 = vmatpush.bf16.msra.mxu3 %v4121_v17 }
 0x3b3   : > { %v3167_v5 = vmul.f32 0.2, %v3039_v21  ;;  %vm3103_vm6 = vcmp.ge.f32.partialorder %v3039_v21, 0.0 }
 0x3b4   : > { %v3562_v27 = vpop.f32.mrf.mxu3 }
 0x3b5   : > { %v4677_v2 = vsel %vm1784_vm1, %v3562_v27, 0.0  ;;  %v3602_v47 = vpop.f32.mrf.mxu2  ;;  %v3231_v27 = vsel %vm3103_vm6, %v3039_v21, %v3167_v5 }
 0x3b6   : > { %v4678_v39 = vadd.f32 %v4677_v2, %v4676_v62  ;;  %v5133_v62 = vld [vmem:[%s7688_s2 + $0x25] ss:$0 sm:$0xff] }
 0x3b7   : > { %v2909_v28 = vmul.f32 %v5133_v62, %v6585_v15 }
 0x3b8   : > { %v4680_v30 = vadd.f32 %v4679_v44, %v4678_v39  ;;  %v7285_v37 = vpop.f32.mrf.mxu1  ;;  %v5134_v44 = vld [vmem:[%s7688_s2 + $0x26] ss:$0 sm:$0xff] }
 0x3b9   : > { %v2910_v46 = vmul.f32 %v5134_v44, %v6585_v15 }
 0x3ba   : > { %v4682_v43 = vadd.f32 %v4681_v8, %v4680_v30  ;;  %4992 = vmatmul.msk.bf16.vlgmr.msra.gmra.mxu2 %vm1784_vm1, %v3358_v1  ;;  %v3295_v1 = vmul.f32 1.4142135, %v3231_v27 }
 0x3bc   : > { %v3564_v22 = vpop.f32.mrf.mxu3 }
 0x3bd   : > { %v2540_v38 = vpop.f32.mrf.mxu0  ;;  %v3657_v24 = vpop.f32.mrf.mxu2 }
 0x3be   : > { %v2972_v50 = vadd.f32 %v2908_v23, %v2540_v38  ;;  %v4687_v3 = vsel %vm1784_vm1, %v3657_v24, 0.0  ;;  %v5135_v24 = vld [vmem:[%s7688_s2 + $0x27] ss:$0 sm:$0xff] }
 0x3bf   : > { %v2911_v62 = vmul.f32 %v5135_v24, %v6585_v15 }
 0x3c0   : > { %v3040_v57 = vadd.f32 %v7127_v25, %v2972_v50  ;;  %v3754_v10 = vpop.f32.mrf.mxu1 }
 0x3c1   : > { %4990 = vmatmul.msk.bf16.vlgmr.msrb.gmra.mxu3 %vm1784_vm1, %v3356_v19 }
 0x3c2   : > { %vm3104_vm5 = vcmp.ge.f32.partialorder %v3040_v57, 0.0  ;;  %v3168_v18 = vmul.f32 0.2, %v3040_v57  ;;  %4187 = vmatpush.bf16.msrb.mxu3 %v4178_v35 }
 0x3c4   : > { %v3232_v54 = vsel %vm3104_vm5, %v3040_v57, %v3168_v18  ;;  %v3619_v29 = vpop.f32.mrf.mxu3 }
 0x3c5   : > { %v3296_v13 = vmul.f32 1.4142135, %v3232_v54  ;;  %v4683_v48 = vsel %vm1784_vm1, %v3619_v29, 0.0  ;;  %v2542_v51 = vpop.f32.mrf.mxu0  ;;  %v3659_v17 = vpop.f32.mrf.mxu2  ;;  %v3428_v54 = vld [vmem:[%s7691_s5 + $0xa0] sm:$0xf] }
 0x3c6   : > { %v4684_v20 = vadd.f32 %v4683_v48, %v4682_v43  ;;  %v2973_v55 = vadd.f32 %v2909_v28, %v2542_v51  ;;  %v3359_v43 = vpack.c.bf16 %v3295_v1, %v3295_v1  ;;  %v3429_v29 = vld [vmem:[%s7691_s5 + $0xa4] sm:$0xf] }
 0x3c7   : > { %v3360_v14 = vpack.c.bf16 %v3296_v13, %v3296_v13  ;;  %v4216_v13 = vsel %vm2437_vm0, %v3428_v54, 0  ;;  %v4235_v52 = vsel %vm2437_vm0, %v3429_v29, 0 }
 0x3c8   : > { %v4686_v9 = vadd.f32 %v4685_v4, %v4684_v20  ;;  %v3041_v2 = vadd.f32 %v7127_v25, %v2973_v55  ;;  %v7313_v47 = vpop.f32.mrf.mxu1  ;;  %4225 = vmatpush.bf16.msra.mxu2 %v4216_v13 }
 0x3c9   : > { %4994 = vmatmul.msk.bf16.vlgmr.msrb.gmra.mxu1 %vm1784_vm1, %v3360_v14 }
 0x3ca   : > { %vm3105_vm7 = vcmp.ge.f32.partialorder %v3041_v2, 0.0  ;;  %v3169_v39 = vmul.f32 0.2, %v3041_v2  ;;  %v4688_v53 = vadd.f32 %v4687_v3, %v4686_v9 }
 0x3cc   : > { %v3233_v61 = vsel %vm3105_vm7, %v3041_v2, %v3169_v39  ;;  %v3621_v30 = vpop.f32.mrf.mxu3  ;;  %v5136_v39 = vld [vmem:[%s7688_s2 + $0x28] ss:$0 sm:$0xff] }
 0x3cd   : > { %v3297_v49 = vmul.f32 1.4142135, %v3233_v61  ;;  %v3714_v8 = vpop.f32.mrf.mxu2  ;;  %v2912_v61 = vmul.f32 %v5136_v39, %v6585_v15 }
 0x3ce   : > { %v4693_v28 = vsel %vm1784_vm1, %v3714_v8, 0.0  ;;  %v4697_v8 = vsel %vm1784_vm1, %v7285_v37, 0.0 }
 0x3cf   : > { %v3361_v6 = vpack.c.bf16 %v3297_v49, %v3297_v49  ;;  %v2545_v31 = vpop.f32.mrf.mxu0 }
 0x3d0   : > { %v2974_v22 = vadd.f32 %v2910_v46, %v2545_v31  ;;  %v3811_v23 = vpop.f32.mrf.mxu1 }
 0x3d1   : > { %4993 = vmatmul.msk.bf16.vlgmr.msra.gmra.mxu3 %vm1784_vm1, %v3359_v43  ;;  %4995 = vmatmul.msk.bf16.vlgmr.msrb.gmra.mxu2 %vm1784_vm1, %v3361_v6  ;;  %v5137_v23 = vld [vmem:[%s7688_s2 + $0x29] ss:$0 sm:$0xff] }
 0x3d2   : > { %v3042_v38 = vadd.f32 %v7127_v25, %v2974_v22  ;;  %4244 = vmatpush.bf16.msra.mxu3 %v4235_v52  ;;  %v2913_v37 = vmul.f32 %v5137_v23, %v6585_v15 }
 0x3d4   : > { %v3170_v50 = vmul.f32 0.2, %v3042_v38  ;;  %v3676_v19 = vpop.f32.mrf.mxu3  ;;  %vm3106_vm8 = vcmp.ge.f32.partialorder %v3042_v38, 0.0 }
 0x3d5   : > { %v4689_v21 = vsel %vm1784_vm1, %v3676_v19, 0.0  ;;  %v3716_v57 = vpop.f32.mrf.mxu2 }
 0x3d6   : > { %v4690_v10 = vadd.f32 %v4689_v21, %v4688_v53  ;;  %v3234_v18 = vsel %vm3106_vm8, %v3042_v38, %v3170_v50 }
 0x3d7   : > { %v2547_v41 = vpop.f32.mrf.mxu0  ;;  %v3298_v17 = vmul.f32 1.4142135, %v3234_v18 }
 0x3d8   : > { %v4692_v35 = vadd.f32 %v4691_v45, %v4690_v10  ;;  %v2975_v58 = vadd.f32 %v2911_v62, %v2547_v41  ;;  %v7331_v5 = vpop.f32.mrf.mxu1  ;;  %v3430_v45 = vld [vmem:[%s7691_s5 + $0xa8] sm:$0xf]  ;;  %v3431_v41 = vld [vmem:[%s7691_s5 + $0xac] sm:$0xf] }
 0x3d9   : > { %v3362_v27 = vpack.c.bf16 %v3298_v17, %v3298_v17  ;;  %v4273_v54 = vsel %vm2437_vm0, %v3431_v41, 0 }
 0x3da   : > { %v3043_v48 = vadd.f32 %v7127_v25, %v2975_v58  ;;  %v4694_v51 = vadd.f32 %v4693_v28, %v4692_v35  ;;  %v4254_v58 = vsel %vm2437_vm0, %v3430_v45, 0  ;;  %4282 = vmatpush.bf16.msrb.mxu2 %v4273_v54 }
 0x3db   : > { %4263 = vmatpush.bf16.msrb.mxu1 %v4254_v58 }
 0x3dc   : > { %vm3107_vm9 = vcmp.ge.f32.partialorder %v3043_v48, 0.0  ;;  %v3171_v20 = vmul.f32 0.2, %v3043_v48  ;;  %v3678_v55 = vpop.f32.mrf.mxu3 }
 0x3dd   : > { %v3771_v4 = vpop.f32.mrf.mxu2  ;;  %v4703_v55 = vsel %vm1784_vm1, %v7313_v47, 0.0 }
 0x3de   : > { %v3235_v14 = vsel %vm3107_vm9, %v3043_v48, %v3171_v20  ;;  %v4699_v31 = vsel %vm1784_vm1, %v3771_v4, 0.0 }
 0x3df   : > { %v3299_v9 = vmul.f32 1.4142135, %v3235_v14 }
 0x3e0   : > { %v3868_v2 = vpop.f32.mrf.mxu1 }
 0x3e1   : > { %v3363_v3 = vpack.c.bf16 %v3299_v9, %v3299_v9  ;;  %4996 = vmatmul.msk.bf16.vlgmr.msrb.gmra.mxu3 %vm1784_vm1, %v3362_v27  ;;  %v5138_v9 = vld [vmem:[%s7688_s2 + $0x2a] ss:$0 sm:$0xff] }
 0x3e3   : > { %4997 = vmatmul.msk.bf16.vlgmr.msra.gmra.mxu1 %vm1784_vm1, %v3363_v3 }
 0x3e4   : > { %v3733_v44 = vpop.f32.mrf.mxu3 }
 0x3e5   : > { %v4695_v53 = vsel %vm1784_vm1, %v3733_v44, 0.0  ;;  %v3773_v1 = vpop.f32.mrf.mxu2  ;;  %v2914_v44 = vmul.f32 %v5138_v9, %v6585_v15  ;;  %v3435_v9 = vld [vmem:[%s7691_s5 + $0xbc] sm:$0xf] }
 0x3e6   : > { %v4696_v30 = vadd.f32 %v4695_v53, %v4694_v51  ;;  %v2550_v49 = vpop.f32.mrf.mxu0 }
 0x3e7   : > { %v2976_v46 = vadd.f32 %v2912_v61, %v2550_v49  ;;  %v5139_v49 = vld [vmem:[%s7688_s2 + $0x2b] ss:$0 sm:$0xff] }
 0x3e8   : > { %v4698_v43 = vadd.f32 %v4697_v8, %v4696_v30  ;;  %v7352_v6 = vpop.f32.mrf.mxu1  ;;  %v3432_v8 = vld [vmem:[%s7691_s5 + $0xb0] sm:$0xf] }
 0x3e9   : > { %v3044_v22 = vadd.f32 %v7127_v25, %v2976_v46  ;;  %v3433_v46 = vld [vmem:[%s7691_s5 + $0xb4] sm:$0xf] }
 0x3ea   : > { %v4700_v38 = vadd.f32 %v4699_v31, %v4698_v43  ;;  %v4292_v31 = vsel %vm2437_vm0, %v3432_v8, 0 }
 0x3eb   : > { %vm3108_vm12 = vcmp.ge.f32.partialorder %v3044_v22, 0.0  ;;  %v3172_v24 = vmul.f32 0.2, %v3044_v22  ;;  %4301 = vmatpush.bf16.msrb.mxu3 %v4292_v31 }
 0x3ec   : > { %v3735_v50 = vpop.f32.mrf.mxu3 }
 0x3ed   : > { %v3236_v19 = vsel %vm3108_vm12, %v3044_v22, %v3172_v24  ;;  %v3828_v21 = vpop.f32.mrf.mxu2  ;;  %v4311_v22 = vsel %vm2437_vm0, %v3433_v46, 0  ;;  %v2915_v24 = vmul.f32 %v5139_v49, %v6585_v15  ;;  %v5144_v46 = vld [vmem:[%s7688_s2 + $0x30] ss:$0 sm:$0xff] }
 0x3ee   : > { %v3300_v57 = vmul.f32 1.4142135, %v3236_v19  ;;  %v2552_v10 = vpop.f32.mrf.mxu0  ;;  %v4705_v2 = vsel %vm1784_vm1, %v3828_v21, 0.0  ;;  %4320 = vmatpush.bf16.msra.mxu1 %v4311_v22 }
 0x3ef   : > { %v2977_v62 = vadd.f32 %v2913_v37, %v2552_v10 }
 0x3f0   : > { %v3364_v18 = vpack.c.bf16 %v3300_v57, %v3300_v57  ;;  %v3925_v35 = vpop.f32.mrf.mxu1 }
 0x3f1   : > { %v3045_v29 = vadd.f32 %v7127_v25, %v2977_v62  ;;  %v4709_v62 = vsel %vm1784_vm1, %v7331_v5, 0.0 }
 0x3f2   : > { %4998 = vmatmul.msk.bf16.vlgmr.msra.gmra.mxu2 %vm1784_vm1, %v3364_v18 }
 0x3f3   : > { %vm3109_vm13 = vcmp.ge.f32.partialorder %v3045_v29, 0.0  ;;  %v3173_v28 = vmul.f32 0.2, %v3045_v29 }
 0x3f4   : > { %v3790_v13 = vpop.f32.mrf.mxu3 }
 0x3f5   : > { %v3237_v52 = vsel %vm3109_vm13, %v3045_v29, %v3173_v28  ;;  %v4701_v48 = vsel %vm1784_vm1, %v3790_v13, 0.0  ;;  %v3830_v51 = vpop.f32.mrf.mxu2  ;;  %v5140_v29 = vld [vmem:[%s7688_s2 + $0x2c] ss:$0 sm:$0xff] }
 0x3f6   : > { %v3301_v17 = vmul.f32 1.4142135, %v3237_v52  ;;  %v4702_v20 = vadd.f32 %v4701_v48, %v4700_v38  ;;  %v2916_v51 = vmul.f32 %v5140_v29, %v6585_v15 }
 0x3f8   : > { %v3365_v4 = vpack.c.bf16 %v3301_v17, %v3301_v17  ;;  %v4704_v14 = vadd.f32 %v4703_v55, %v4702_v20  ;;  %v7373_v27 = vpop.f32.mrf.mxu1 }
 0x3fa   : > { %4999 = vmatmul.msk.bf16.vlgmr.msra.gmra.mxu3 %vm1784_vm1, %v3365_v4  ;;  %v4706_v3 = vadd.f32 %v4705_v2, %v4704_v14  ;;  %v3434_v14 = vld [vmem:[%s7691_s5 + $0xb8] sm:$0xf] }
 0x3fb   : > { %v4330_v2 = vsel %vm2437_vm0, %v3434_v14, 0 }
 0x3fc   : > { %v3792_v39 = vpop.f32.mrf.mxu3  ;;  %4339 = vmatpush.bf16.msra.mxu2 %v4330_v2  ;;  %v5089_v2 = vld [vmem:[%s7688_s2 + $0x33] ss:$0 sm:$0xff] }
 0x3fd   : > { %v2555_v53 = vpop.f32.mrf.mxu0  ;;  %v3885_v1 = vpop.f32.mrf.mxu2 }
 0x3fe   : > { %v2978_v61 = vadd.f32 %v2914_v44, %v2555_v53  ;;  %v4711_v58 = vsel %vm1784_vm1, %v3885_v1, 0.0  ;;  %v5141_v44 = vld [vmem:[%s7688_s2 + $0x2d] ss:$0 sm:$0xff] }
 0x3ff   : > { %v2917_v8 = vmul.f32 %v5141_v44, %v6585_v15 }
 0x400   : > { %v3046_v47 = vadd.f32 %v7127_v25, %v2978_v61  ;;  %v3982_v30 = vpop.f32.mrf.mxu1 }
 0x402   : > { %vm3110_vm14 = vcmp.ge.f32.partialorder %v3046_v47, 0.0  ;;  %v3174_v43 = vmul.f32 0.2, %v3046_v47 }
 0x404   : > { %v3238_v23 = vsel %vm3110_vm14, %v3046_v47, %v3174_v43  ;;  %v3847_v38 = vpop.f32.mrf.mxu3  ;;  %v4715_v43 = vsel %vm1784_vm1, %v7352_v6, 0.0 }
 0x405   : > { %v3302_v50 = vmul.f32 1.4142135, %v3238_v23  ;;  %v4707_v19 = vsel %vm1784_vm1, %v3847_v38, 0.0  ;;  %v2557_v21 = vpop.f32.mrf.mxu0  ;;  %v3887_v37 = vpop.f32.mrf.mxu2 }
 0x406   : > { %v4708_v57 = vadd.f32 %v4707_v19, %v4706_v3  ;;  %v2979_v10 = vadd.f32 %v2915_v24, %v2557_v21  ;;  %v4349_v3 = vsel %vm2437_vm0, %v3435_v9, 0  ;;  %v3436_v24 = vld [vmem:[%s7691_s5 + $0xc0] sm:$0xf]  ;;  %v5145_v9 = vld [vmem:[%s7688_s2 + $0x31] ss:$0 sm:$0xff] }
 0x407   : > { %v3366_v45 = vpack.c.bf16 %v3302_v50, %v3302_v50  ;;  %4358 = vmatpush.bf16.msra.mxu3 %v4349_v3  ;;  %v3437_v50 = vld [vmem:[%s7691_s5 + $0xc4] sm:$0xf]  ;;  %v4368_v37 = vsel %vm2437_vm0, %v3436_v24, 0 }
 0x408   : > { %v4710_v41 = vadd.f32 %v4709_v62, %v4708_v57  ;;  %v3047_v18 = vadd.f32 %v7127_v25, %v2979_v10  ;;  %v7398_v35 = vpop.f32.mrf.mxu1  ;;  %v4387_v57 = vsel %vm2437_vm0, %v3437_v50, 0  ;;  %v2920_v62 = vmul.f32 %v5144_v46, %v6585_v15 }
 0x409   : > { %5000 = vmatmul.msk.bf16.vlgmr.msrb.gmra.mxu1 %vm1784_vm1, %v3366_v45  ;;  %v3438_v45 = vld [vmem:[%s7691_s5 + $0xc8] sm:$0xf]  ;;  %v2921_v46 = vmul.f32 %v5145_v9, %v6585_v15 }
 0x40a   : > { %vm3111_vm15 = vcmp.ge.f32.partialorder %v3047_v18, 0.0  ;;  %v3175_v54 = vmul.f32 0.2, %v3047_v18  ;;  %v4712_v28 = vadd.f32 %v4711_v58, %v4710_v41  ;;  %4377 = vmatpush.bf16.msrb.mxu1 %v4368_v37  ;;  %v4406_v41 = vsel %vm2437_vm0, %v3438_v45, 0  ;;  %v3442_v45 = vld [vmem:[%s7691_s5 + $0xd8] sm:$0xf] }
 0x40b   : > { %v2985_v37 = vadd.f32 %v2921_v46, %v6919_v11 }
 0x40c   : > { %v3239_v13 = vsel %vm3111_vm15, %v3047_v18, %v3175_v54  ;;  %v3849_v52 = vpop.f32.mrf.mxu3 }
 0x40d   : > { %v3303_v5 = vmul.f32 1.4142135, %v3239_v13  ;;  %v3942_v48 = vpop.f32.mrf.mxu2  ;;  %v2984_v13 = vadd.f32 %v2920_v62, %v6891_v36  ;;  %v3439_v52 = vld [vmem:[%s7691_s5 + $0xcc] sm:$0xf] }
 0x40e   : > { %v4717_v19 = vsel %vm1784_vm1, %v3942_v48, 0.0 }
 0x40f   : > { %v3367_v17 = vpack.c.bf16 %v3303_v5, %v3303_v5  ;;  %v2560_v20 = vpop.f32.mrf.mxu0 }
 0x410   : > { %v2980_v55 = vadd.f32 %v2916_v51, %v2560_v20  ;;  %v4039_v4 = vpop.f32.mrf.mxu1  ;;  %v5142_v51 = vld [vmem:[%s7688_s2 + $0x2e] ss:$0 sm:$0xff]  ;;  %v3052_v20 = vadd.f32 %v7127_v25, %v2984_v13  ;;  %v3053_v13 = vadd.f32 %v7127_v25, %v2985_v37 }
 0x411   : > { %5001 = vmatmul.msk.bf16.vlgmr.msrb.gmra.mxu2 %vm1784_vm1, %v3367_v17  ;;  %v4425_v17 = vsel %vm2437_vm0, %v3439_v52, 0  ;;  %v2918_v14 = vmul.f32 %v5142_v51, %v6585_v15  ;;  %v4482_v52 = vsel %vm2437_vm0, %v3442_v45, 0 }
 0x412   : > { %v3048_v39 = vadd.f32 %v7127_v25, %v2980_v55  ;;  %4396 = vmatpush.bf16.msrb.mxu2 %v4387_v57  ;;  %vm3116_vm2 = vcmp.ge.f32.partialorder %v3052_v20, 0.0  ;;  %v3440_v57 = vld [vmem:[%s7691_s5 + $0xd0] sm:$0xf]  ;;  %vm3117_vm5 = vcmp.ge.f32.partialorder %v3053_v13, 0.0 }
 0x414   : > { %vm3112_vm10 = vcmp.ge.f32.partialorder %v3048_v39, 0.0  ;;  %v3176_v53 = vmul.f32 0.2, %v3048_v39  ;;  %v3904_v1 = vpop.f32.mrf.mxu3 }
 0x415   : > { %v4713_v61 = vsel %vm1784_vm1, %v3904_v1, 0.0  ;;  %v3944_v47 = vpop.f32.mrf.mxu2  ;;  %v4721_v1 = vsel %vm1784_vm1, %v7373_v27, 0.0  ;;  %v5087_v27 = vld [vmem:[%s7688_s2 + $0x32] ss:$0 sm:$0xff] }
 0x416   : > { %v3240_v30 = vsel %vm3112_vm10, %v3048_v39, %v3176_v53  ;;  %v4714_v49 = vadd.f32 %v4713_v61, %v4712_v28  ;;  %v3180_v53 = vmul.f32 0.2, %v3052_v20 }
 0x417   : > { %v3304_v31 = vmul.f32 1.4142135, %v3240_v30  ;;  %v2562_v22 = vpop.f32.mrf.mxu0 }
 0x418   : > { %v4716_v23 = vadd.f32 %v4715_v43, %v4714_v49  ;;  %v2981_v38 = vadd.f32 %v2917_v8, %v2562_v22  ;;  %v5143_v8 = vld [vmem:[%s7688_s2 + $0x2f] ss:$0 sm:$0xff]  ;;  %v2923_v43 = vmul.f32 %v5089_v2, %v6585_v15  ;;  %v5110_v2 = vld [vmem:[%s7688_s2 + $0x34] ss:$0 sm:$0xff] }
 0x419   : > { %v3368_v21 = vpack.c.bf16 %v3304_v31, %v3304_v31  ;;  %v3244_v31 = vsel %vm3116_vm2, %v3052_v20, %v3180_v53 }
 0x41a   : > { %v3049_v6 = vadd.f32 %v7127_v25, %v2981_v38  ;;  %v4718_v10 = vadd.f32 %v4717_v19, %v4716_v23  ;;  %v2919_v19 = vmul.f32 %v5143_v8, %v6585_v15  ;;  %v2924_v8 = vmul.f32 %v5110_v2, %v6585_v15 }
 0x41b   : > { %5002 = vmatmul.msk.bf16.vlgmr.msrb.gmra.mxu3 %vm1784_vm1, %v3368_v21  ;;  %v3308_v21 = vmul.f32 1.4142135, %v3244_v31 }
 0x41c   : > { %vm3113_vm11 = vcmp.ge.f32.partialorder %v3049_v6, 0.0  ;;  %v3177_v18 = vmul.f32 0.2, %v3049_v6  ;;  %v3906_v58 = vpop.f32.mrf.mxu3  ;;  %4415 = vmatpush.bf16.msrb.mxu3 %v4406_v41 }
 0x41d   : > { %v3999_v54 = vpop.f32.mrf.mxu2 }
 0x41e   : > { %v3241_v29 = vsel %vm3113_vm11, %v3049_v6, %v3177_v18  ;;  %v7442_v28 = vpop.f32.mrf.mxu1  ;;  %v4723_v30 = vsel %vm1784_vm1, %v3999_v54, 0.0  ;;  %v2987_v6 = vadd.f32 %v2923_v43, %v6985_v7  ;;  %v2922_v18 = vmul.f32 %v5087_v27, %v6585_v15 }
 0x41f   : > { %v3305_v5 = vmul.f32 1.4142135, %v3241_v29  ;;  %v4444_v54 = vsel %vm2437_vm0, %v3440_v57, 0  ;;  %v3372_v29 = vpack.c.bf16 %v3308_v21, %v3308_v21  ;;  %v2988_v27 = vadd.f32 %v2924_v8, %v7015_v40  ;;  %v3445_v40 = vld [vmem:[%s7691_s5 + $0xe4] sm:$0xf] }
 0x420   : > { %v3055_v7 = vadd.f32 %v7127_v25, %v2987_v6  ;;  %v2986_v51 = vadd.f32 %v2922_v18, %v6950_v42  ;;  %v4727_v42 = vsel %vm1784_vm1, %v7398_v35, 0.0 }
 0x421   : > { %v3369_v48 = vpack.c.bf16 %v3305_v5, %v3305_v5 }
 0x422   : > { %vm3119_vm6 = vcmp.ge.f32.partialorder %v3055_v7, 0.0 }
 0x423   : > { %5003 = vmatmul.msk.bf16.vlgmr.msra.gmra.mxu1 %vm1784_vm1, %v3369_v48 }
 0x424   : > { %v3961_v55 = vpop.f32.mrf.mxu3  ;;  %4434 = vmatpush.bf16.msra.mxu1 %v4425_v17 }
 0x425   : > { %v4719_v36 = vsel %vm1784_vm1, %v3961_v55, 0.0  ;;  %v4001_v4 = vpop.f32.mrf.mxu2 }
 0x426   : > { %v4720_v3 = vadd.f32 %v4719_v36, %v4718_v10  ;;  %v2565_v39 = vpop.f32.mrf.mxu0  ;;  %v4096_v44 = vpop.f32.mrf.mxu1  ;;  %v3181_v36 = vmul.f32 0.2, %v3053_v13  ;;  %v3183_v4 = vmul.f32 0.2, %v3055_v7 }
 0x427   : > { %v2982_v61 = vadd.f32 %v2918_v14, %v2565_v39 }
 0x428   : > { %v4722_v47 = vadd.f32 %v4721_v1, %v4720_v3  ;;  %v5093_v3 = vld [vmem:[%s7688_s2 + $0x36] ss:$0 sm:$0xff]  ;;  %v7508_v1 = vld [vmem:[%s7690_s4] ss:$0 sm:$0xff] }
 0x429   : > { %v3050_v49 = vadd.f32 %v7127_v25, %v2982_v61  ;;  %v3054_v61 = vadd.f32 %v7508_v1, %v2986_v51  ;;  %v2926_v46 = vmul.f32 %v5093_v3, %v6585_v15  ;;  %v4733_v51 = vsel %vm1784_vm1, %v7442_v28, 0.0 }
 0x42a   : > { %v4724_v22 = vadd.f32 %v4723_v30, %v4722_v47  ;;  %v3245_v30 = vsel %vm3117_vm5, %v3053_v13, %v3181_v36  ;;  %v3444_v13 = vld [vmem:[%s7691_s5 + $0xe0] sm:$0xf] }
 0x42b   : > { %vm3114_vm3 = vcmp.ge.f32.partialorder %v3050_v49, 0.0  ;;  %v3178_v23 = vmul.f32 0.2, %v3050_v49  ;;  %v3309_v31 = vmul.f32 1.4142135, %v3245_v30  ;;  %vm3118_vm7 = vcmp.ge.f32.partialorder %v3054_v61, 0.0 }
 0x42c   : > { %v3963_v38 = vpop.f32.mrf.mxu3 }
 0x42d   : > { %v3242_v24 = vsel %vm3114_vm3, %v3050_v49, %v3178_v23  ;;  %v4056_v50 = vpop.f32.mrf.mxu2  ;;  %v3247_v49 = vsel %vm3119_vm6, %v3055_v7, %v3183_v4  ;;  %v3373_v21 = vpack.c.bf16 %v3309_v31, %v3309_v31  ;;  %vm4829_vm6 = vcmask 7168  }
 0x42e   : > { %v3306_v10 = vmul.f32 1.4142135, %v3242_v24  ;;  %v2567_v62 = vpop.f32.mrf.mxu0  ;;  %v4729_v47 = vsel %vm1784_vm1, %v4056_v50, 0.0  ;;  %v3311_v23 = vmul.f32 1.4142135, %v3247_v49  ;;  %v2990_v50 = vadd.f32 %v2926_v46, %v7079_v16 }
 0x42f   : > { %v2983_v41 = vadd.f32 %v2919_v19, %v2567_v62  ;;  %v3443_v24 = vld [vmem:[%s7691_s5 + $0xdc] sm:$0xf]  ;;  %v5113_v19 = vld [vmem:[%s7688_s2 + $0x35] ss:$0 sm:$0xff]  ;;  %v4539_v16 = vsel %vm2437_vm0, %v3445_v40, 0 }
 0x430   : > { %v3370_v58 = vpack.c.bf16 %v3306_v10, %v3306_v10  ;;  %v4501_v37 = vsel %vm2437_vm0, %v3443_v24, 0  ;;  %v3375_v6 = vpack.c.bf16 %v3311_v23, %v3311_v23  ;;  %v3056_v10 = vadd.f32 %v7508_v1, %v2988_v27  ;;  %v3448_v49 = vld [vmem:[%s7691_s5 + $0xf0] sm:$0xf]  ;;  %v5084_v27 = vld [vmem:[%s7688_s2 + $0x3a] ss:$0 sm:$0xff] }
 0x431   : > { %v3051_v11 = vadd.f32 %v7127_v25, %v2983_v41  ;;  %v3441_v25 = vld [vmem:[%s7691_s5 + $0xd4] sm:$0xf]  ;;  %v3058_v62 = vadd.f32 %v7508_v1, %v2990_v50  ;;  %v2925_v45 = vmul.f32 %v5113_v19, %v6585_v15 }
 0x432   : > { %5004 = vmatmul.msk.bf16.vlgmr.msra.gmra.mxu2 %vm1784_vm1, %v3370_v58  ;;  %v4463_v53 = vsel %vm2437_vm0, %v3441_v25, 0  ;;  %v3184_v58 = vmul.f32 0.2, %v3056_v10  ;;  %vm3120_vm8 = vcmp.ge.f32.partialorder %v3056_v10, 0.0 }
 0x433   : > { %vm3115_vm4 = vcmp.ge.f32.partialorder %v3051_v11, 0.0  ;;  %v3179_v5 = vmul.f32 0.2, %v3051_v11  ;;  %5006 = vmatmul.msk.bf16.vlgmr.msrb.gmra.mxu1 %vm1784_vm1, %v3372_v29  ;;  %4453 = vmatpush.bf16.msra.mxu2 %v4444_v54  ;;  %v2989_v54 = vadd.f32 %v2925_v45, %v7047_v60  ;;  %vm3122_vm9 = vcmp.ge.f32.partialorder %v3058_v62, 0.0 }
 0x434   : > { %v4018_v48 = vpop.f32.mrf.mxu3  ;;  %4491 = vmatpush.bf16.msrb.mxu1 %v4482_v52  ;;  %v3186_v52 = vmul.f32 0.2, %v3058_v62  ;;  %v3248_v36 = vsel %vm3120_vm8, %v3056_v10, %v3184_v58 }
 0x435   : > { %v3243_v17 = vsel %vm3115_vm4, %v3051_v11, %v3179_v5  ;;  %v4725_v20 = vsel %vm1784_vm1, %v4018_v48, 0.0  ;;  %v4058_v55 = vpop.f32.mrf.mxu2  ;;  %v5096_v48 = vld [vmem:[%s7688_s2 + $0x37] ss:$0 sm:$0xff]  ;;  %v3057_v25 = vadd.f32 %v7508_v1, %v2989_v54  ;;  %v3312_v28 = vmul.f32 1.4142135, %v3248_v36 }
 0x436   : > { %v3307_v14 = vmul.f32 1.4142135, %v3243_v17  ;;  %v4726_v9 = vadd.f32 %v4725_v20, %v4724_v22  ;;  %v3182_v22 = vmul.f32 0.2, %v3054_v61  ;;  %v5122_v17 = vld [vmem:[%s7688_s2 + $0x39] ss:$0 sm:$0xff]  ;;  %v2927_v2 = vmul.f32 %v5096_v48, %v6585_v15 }
 0x437   : > { %v4520_v55 = vsel %vm2437_vm0, %v3444_v13, 0  ;;  %vm3121_vm12 = vcmp.ge.f32.partialorder %v3057_v25, 0.0  ;;  %v3376_v8 = vpack.c.bf16 %v3312_v28, %v3312_v28  ;;  %v5086_v13 = vld [vmem:[%s7688_s2 + $0x3b] ss:$0 sm:$0xff]  ;;  %v3451_v36 = vld [vmem:[%s7691_s5 + $0xfc] sm:$0xf] }
 0x438   : > { %v3371_v39 = vpack.c.bf16 %v3307_v14, %v3307_v14  ;;  %v4728_v44 = vadd.f32 %v4727_v42, %v4726_v9  ;;  %v3246_v57 = vsel %vm3118_vm7, %v3054_v61, %v3182_v22  ;;  %v3250_v14 = vsel %vm3122_vm9, %v3058_v62, %v3186_v52  ;;  %v3446_v61 = vld [vmem:[%s7691_s5 + $0xe8] sm:$0xf]  ;;  %v5102_v62 = vld [vmem:[%s7688_s2 + $0x3c] ss:$0 sm:$0xff] }
 0x439   : > { %v3310_v41 = vmul.f32 1.4142135, %v3246_v57  ;;  %v2929_v42 = vmul.f32 %v5122_v17, %v6585_v15  ;;  %v4596_v22 = vsel %vm2437_vm0, %v3448_v49, 0  ;;  %v3447_v57 = vld [vmem:[%s7691_s5 + $0xec] sm:$0xf] }
 0x43a   : > { %5005 = vmatmul.msk.bf16.vlgmr.msra.gmra.mxu3 %vm1784_vm1, %v3371_v39  ;;  %v4730_v35 = vadd.f32 %v4729_v47, %v4728_v44  ;;  %v3314_v39 = vmul.f32 1.4142135, %v3250_v14  ;;  %v2991_v44 = vadd.f32 %v2927_v2, %v7111_v12  ;;  %v4558_v12 = vsel %vm2437_vm0, %v3446_v61, 0 }
 0x43b   : > { %4472 = vmatpush.bf16.msra.mxu3 %v4463_v53  ;;  %v3374_v60 = vpack.c.bf16 %v3310_v41, %v3310_v41  ;;  %v3185_v53 = vmul.f32 0.2, %v3057_v25  ;;  %v2993_v47 = vadd.f32 %v2929_v42, %v7160_v34  ;;  %v2930_v41 = vmul.f32 %v5084_v27, %v6585_v15 }
 0x43c   : > { %v4020_v43 = vpop.f32.mrf.mxu3  ;;  %v3378_v46 = vpack.c.bf16 %v3314_v39, %v3314_v39  ;;  %v4653_v42 = vsel %vm2437_vm0, %v3451_v36, 0 }
 0x43d   : > { %v4113_v38 = vpop.f32.mrf.mxu2  ;;  %v3059_v43 = vadd.f32 %v7508_v1, %v2991_v44  ;;  %v3249_v31 = vsel %vm3121_vm12, %v3057_v25, %v3185_v53  ;;  %v3061_v34 = vadd.f32 %v7508_v1, %v2993_v47  ;;  %v2931_v25 = vmul.f32 %v5086_v13, %v6585_v15  ;;  %v3450_v47 = vld [vmem:[%s7691_s5 + $0xf8] sm:$0xf] }
 0x43e   : > { %v4735_v4 = vsel %vm1784_vm1, %v4113_v38, 0.0  ;;  %v3313_v38 = vmul.f32 1.4142135, %v3249_v31  ;;  %v4634_v31 = vsel %vm2437_vm0, %v3450_v47, 0 }
 0x43f   : > { %v3187_v19 = vmul.f32 0.2, %v3059_v43  ;;  %vm3123_vm13 = vcmp.ge.f32.partialorder %v3059_v43, 0.0  ;;  %vm3125_vm14 = vcmp.ge.f32.partialorder %v3061_v34, 0.0  ;;  %v2995_v53 = vadd.f32 %v2931_v25, %v7130_v26  ;;  %v5128_v26 = vld [vmem:[%s7688_s2 + $0x3f] ss:$0 sm:$0xff] }
 0x442   : > { %5007 = vmatmul.msk.bf16.vlgmr.msrb.gmra.mxu2 %vm1784_vm1, %v3373_v21 }
 0x443   : > { %5009 = vmatmul.msk.bf16.vlgmr.msra.gmra.mxu1 %vm1784_vm1, %v3375_v6  ;;  %4510 = vmatpush.bf16.msrb.mxu2 %v4501_v37  ;;  %v3189_v6 = vmul.f32 0.2, %v3061_v34 }
 0x444   : > { %v4075_v18 = vpop.f32.mrf.mxu3  ;;  %4548 = vmatpush.bf16.msra.mxu1 %v4539_v16  ;;  %v3377_v16 = vpack.c.bf16 %v3313_v38, %v3313_v38 }
 0x445   : > { %v4731_v11 = vsel %vm1784_vm1, %v4075_v18, 0.0  ;;  %v4115_v29 = vpop.f32.mrf.mxu2  ;;  %v3251_v18 = vsel %vm3123_vm13, %v3059_v43, %v3187_v19 }
 0x446   : > { %v4732_v7 = vadd.f32 %v4731_v11, %v4730_v35  ;;  %v4151_v5 = vpop.f32.mrf.mxu1  ;;  %v5120_v35 = vld [vmem:[%s7688_s2 + $0x38] ss:$0 sm:$0xff]  ;;  %v3253_v11 = vsel %vm3125_vm14, %v3061_v34, %v3189_v6  ;;  %v3315_v52 = vmul.f32 1.4142135, %v3251_v18  ;;  %v3063_v34 = vadd.f32 %v7508_v1, %v2995_v53  ;;  %v5126_v6 = vld [vmem:[%s7688_s2 + $0x3e] ss:$0 sm:$0xff] }
 0x447   : > { %v2928_v23 = vmul.f32 %v5120_v35, %v6585_v15  ;;  %v4739_v40 = vsel %vm1784_vm1, %v4151_v5, 0.0  ;;  %v3317_v17 = vmul.f32 1.4142135, %v3253_v11  ;;  %v5106_v35 = vld [vmem:[%s7688_s2 + $0x3d] ss:$0 sm:$0xff] }
 0x448   : > { %v4734_v20 = vadd.f32 %v4733_v51, %v4732_v7  ;;  %v2932_v7 = vmul.f32 %v5102_v62, %v6585_v15  ;;  %v2994_v51 = vadd.f32 %v2930_v41, %v7095_v33  ;;  %v2933_v27 = vmul.f32 %v5106_v35, %v6585_v15 }
 0x449   : > { %v2992_v21 = vadd.f32 %v2928_v23, %v7140_v0  ;;  %v4577_v0 = vsel %vm2437_vm0, %v3447_v57, 0  ;;  %v3381_v28 = vpack.c.bf16 %v3317_v17, %v3317_v17  ;;  %v3191_v19 = vmul.f32 0.2, %v3063_v34 }
 0x44a   : > { %5008 = vmatmul.msk.bf16.vlgmr.msrb.gmra.mxu3 %vm1784_vm1, %v3374_v60  ;;  %v4736_v9 = vadd.f32 %v4735_v4, %v4734_v20  ;;  %v3449_v20 = vld [vmem:[%s7691_s5 + $0xf4] sm:$0xf]  ;;  %v3379_v4 = vpack.c.bf16 %v3315_v52, %v3315_v52  ;;  %v3062_v33 = vadd.f32 %v7508_v1, %v2994_v51  ;;  %vm3127_vm2 = vcmp.ge.f32.partialorder %v3063_v34, 0.0 }
 0x44b   : > { %4529 = vmatpush.bf16.msrb.mxu3 %v4520_v55  ;;  %v3060_v58 = vadd.f32 %v7508_v1, %v2992_v21  ;;  %v2996_v55 = vadd.f32 %v2932_v7, %v7152_v32 }
 0x44c   : > { %v4077_v3 = vpop.f32.mrf.mxu3  ;;  %v3190_v44 = vmul.f32 0.2, %v3062_v33  ;;  %vm3126_vm10 = vcmp.ge.f32.partialorder %v3062_v33, 0.0 }
 0x44d   : > { %v3188_v60 = vmul.f32 0.2, %v3060_v58  ;;  %vm3124_vm15 = vcmp.ge.f32.partialorder %v3060_v58, 0.0  ;;  %v3064_v3 = vadd.f32 %v7508_v1, %v2996_v55 }
 0x44e   : > { %v4153_v30 = vpop.f32.mrf.mxu1 }
 0x44f   : > { %v3252_v2 = vsel %vm3124_vm15, %v3060_v58, %v3188_v60  ;;  %v3192_v30 = vmul.f32 0.2, %v3064_v3  ;;  %vm3128_vm11 = vcmp.ge.f32.partialorder %v3064_v3, 0.0 }
 0x450   : > { %v3316_v32 = vmul.f32 1.4142135, %v3252_v2 }
 0x451   : > { %v3256_v23 = vsel %vm3128_vm11, %v3064_v3, %v3192_v30 }
 0x452   : > { %5010 = vmatmul.msk.bf16.vlgmr.msra.gmra.mxu2 %vm1784_vm1, %v3376_v8  ;;  %v3320_v21 = vmul.f32 1.4142135, %v3256_v23 }
 0x453   : > { %5012 = vmatmul.msk.bf16.vlgmr.msrb.gmra.mxu1 %vm1784_vm1, %v3378_v46  ;;  %4567 = vmatpush.bf16.msra.mxu2 %v4558_v12  ;;  %v3380_v12 = vpack.c.bf16 %v3316_v32, %v3316_v32 }
 0x454   : > { %v4132_v24 = vpop.f32.mrf.mxu3  ;;  %v4170_v50 = vpop.f32.mrf.mxu2  ;;  %4605 = vmatpush.bf16.msrb.mxu1 %v4596_v22  ;;  %v3254_v22 = vsel %vm3126_vm10, %v3062_v33, %v3190_v44  ;;  %v3384_v62 = vpack.c.bf16 %v3320_v21, %v3320_v21 }
 0x455   : > { %v4737_v37 = vsel %vm1784_vm1, %v4132_v24, 0.0  ;;  %v4741_v54 = vsel %vm1784_vm1, %v4170_v50, 0.0  ;;  %v3318_v38 = vmul.f32 1.4142135, %v3254_v22  ;;  %v2935_v24 = vmul.f32 %v5128_v26, %v6585_v15 }
 0x456   : > { %v4738_v10 = vadd.f32 %v4737_v37, %v4736_v9  ;;  %v4615_v9 = vsel %vm2437_vm0, %v3449_v20, 0  ;;  %v2997_v37 = vadd.f32 %v2933_v27, %v7179_v56 }
 0x457   : > { %v2999_v57 = vadd.f32 %v2935_v24, %v7231_v59 }
 0x458   : > { %v4740_v45 = vadd.f32 %v4739_v40, %v4738_v10  ;;  %v3382_v10 = vpack.c.bf16 %v3318_v38, %v3318_v38  ;;  %v3255_v40 = vsel %vm3127_vm2, %v3063_v34, %v3191_v19 }
 0x459   : > { %v3319_v56 = vmul.f32 1.4142135, %v3255_v40 }
 0x45a   : > { %v4742_v29 = vadd.f32 %v4741_v54, %v4740_v45  ;;  %5011 = vmatmul.msk.bf16.vlgmr.msra.gmra.mxu3 %vm1784_vm1, %v3377_v16  ;;  %v3065_v16 = vadd.f32 %v7508_v1, %v2997_v37  ;;  %v3067_v45 = vadd.f32 %v7508_v1, %v2999_v57 }
 0x45b   : > { %4586 = vmatpush.bf16.msra.mxu3 %v4577_v0  ;;  %v2934_v0 = vmul.f32 %v5126_v6, %v6585_v15 }
 0x45c   : > { %v4134_v5 = vpop.f32.mrf.mxu3  ;;  %v4172_v48 = vpop.f32.mrf.mxu2  ;;  %v3193_v41 = vmul.f32 0.2, %v3065_v16  ;;  %vm3129_vm3 = vcmp.ge.f32.partialorder %v3065_v16, 0.0  ;;  %v3195_v58 = vmul.f32 0.2, %v3067_v45  ;;  %vm3131_vm4 = vcmp.ge.f32.partialorder %v3067_v45, 0.0 }
 0x45d   : > { %v2998_v59 = vadd.f32 %v2934_v0, %v7210_v63 }
 0x45e   : > { %v3257_v13 = vsel %vm3129_vm3, %v3065_v16, %v3193_v41  ;;  %v3259_v7 = vsel %vm3131_vm4, %v3067_v45, %v3195_v58 }
 0x45f   : > { %v3066_v52 = vadd.f32 %v7508_v1, %v2998_v59  ;;  %v3321_v15 = vmul.f32 1.4142135, %v3257_v13  ;;  %v3323_v48 = vmul.f32 1.4142135, %v3259_v7 }
 0x460   : > { %v4208_v14 = vpop.f32.mrf.mxu1 }
 0x461   : > { %v4745_v8 = vsel %vm1784_vm1, %v4208_v14, 0.0  ;;  %v3194_v5 = vmul.f32 0.2, %v3066_v52  ;;  %vm3130_vm5 = vcmp.ge.f32.partialorder %v3066_v52, 0.0  ;;  %v3385_v20 = vpack.c.bf16 %v3321_v15, %v3321_v15 }
 0x462   : > { %5013 = vmatmul.msk.bf16.vlgmr.msrb.gmra.mxu2 %vm1784_vm1, %v3379_v4  ;;  %v3387_v36 = vpack.c.bf16 %v3323_v48, %v3323_v48 }
 0x463   : > { %5015 = vmatmul.msk.bf16.vlgmr.msra.gmra.mxu1 %vm1784_vm1, %v3381_v28  ;;  %4624 = vmatpush.bf16.msrb.mxu2 %v4615_v9  ;;  %v3258_v55 = vsel %vm3130_vm5, %v3066_v52, %v3194_v5 }
 0x464   : > { %v4189_v39 = vpop.f32.mrf.mxu3  ;;  %4662 = vmatpush.bf16.msra.mxu1 %v4653_v42  ;;  %v3322_v1 = vmul.f32 1.4142135, %v3258_v55 }
 0x465   : > { %v4743_v61 = vsel %vm1784_vm1, %v4189_v39, 0.0 }
 0x466   : > { %v4744_v49 = vadd.f32 %v4743_v61, %v4742_v29  ;;  %v3383_v29 = vpack.c.bf16 %v3319_v56, %v3319_v56  ;;  %v3386_v9 = vpack.c.bf16 %v3322_v1, %v3322_v1 }
 0x468   : > { %v4210_v46 = vpop.f32.mrf.mxu1  ;;  %v4746_v43 = vadd.f32 %v4745_v8, %v4744_v49 }
 0x46a   : > { %5014 = vmatmul.msk.bf16.vlgmr.msrb.gmra.mxu3 %vm1784_vm1, %v3380_v12 }
 0x46b   : > { %4643 = vmatpush.bf16.msrb.mxu3 %v4634_v31 }
 0x46c   : > { %v4191_v50 = vpop.f32.mrf.mxu3 }
 0x472   : > { %5016 = vmatmul.msk.bf16.vlgmr.msra.gmra.mxu2 %vm1784_vm1, %v3382_v10 }
 0x473   : > { %5018 = vmatmul.msk.bf16.vlgmr.msrb.gmra.mxu1 %vm1784_vm1, %v3384_v62 }
 0x475   : > { %v4227_v18 = vpop.f32.mrf.mxu2 }
 0x476   : > { %v4747_v54 = vsel %vm1784_vm1, %v4227_v18, 0.0  ;;  %v4805_v18 = vld [vmem:[%s7693_s7] sm:$0xf] }
 0x477   : > { %v4748_v11 = vadd.f32 %v4747_v54, %v4746_v43  ;;  %v4814_v58 = vsel %vm2437_vm0, %v4805_v18, 0 }
 0x478   : > { %4823 = vmatpush.bf16.msra.mxu2 %v4814_v58 }
 0x47a   : > { %5017 = vmatmul.msk.bf16.vlgmr.msra.gmra.mxu3 %vm1784_vm1, %v3383_v29 }
 0x47d   : > { %v4229_v51 = vpop.f32.mrf.mxu2  ;;  %v4246_v60 = vpop.f32.mrf.mxu3 }
 0x47e   : > { %v4749_v63 = vsel %vm1784_vm1, %v4246_v60, 0.0 }
 0x47f   : > { %v4750_v17 = vadd.f32 %v4749_v63, %v4748_v11 }
 0x482   : > { %5019 = vmatmul.msk.bf16.vlgmr.msrb.gmra.mxu2 %vm1784_vm1, %v3385_v20 }
 0x483   : > { %5021 = vmatmul.msk.bf16.vlgmr.msra.gmra.mxu1 %vm1784_vm1, %v3387_v36 }
 0x485   : > { %v4248_v25 = vpop.f32.mrf.mxu3 }
 0x486   : > { %v4265_v4 = vpop.f32.mrf.mxu1 }
 0x487   : > { %v4751_v14 = vsel %vm1784_vm1, %v4265_v4, 0.0 }
 0x488   : > { %v4752_v33 = vadd.f32 %v4751_v14, %v4750_v17 }
 0x48a   : > { %5020 = vmatmul.msk.bf16.vlgmr.msrb.gmra.mxu3 %vm1784_vm1, %v3386_v9 }
 0x48e   : > { %v4267_v2 = vpop.f32.mrf.mxu1 }
 0x494   : > { %v4284_v28 = vpop.f32.mrf.mxu2 }
 0x495   : > { %v4753_v42 = vsel %vm1784_vm1, %v4284_v28, 0.0 }
 0x496   : > { %v4754_v3 = vadd.f32 %v4753_v42, %v4752_v33 }
 0x49c   : > { %v4286_v32 = vpop.f32.mrf.mxu2 }
 0x49e   : > { %v4303_v39 = vpop.f32.mrf.mxu3 }
 0x49f   : > { %v4755_v44 = vsel %vm1784_vm1, %v4303_v39, 0.0 }
 0x4a0   : > { %v4756_v53 = vadd.f32 %v4755_v44, %v4754_v3  ;;  %v4322_v61 = vpop.f32.mrf.mxu1 }
 0x4a1   : > { %v4757_v47 = vsel %vm1784_vm1, %v4322_v61, 0.0 }
 0x4a2   : > { %v4758_v30 = vadd.f32 %v4757_v47, %v4756_v53 }
 0x4a6   : > { %v4305_v49 = vpop.f32.mrf.mxu3 }
 0x4a8   : > { %v4324_v35 = vpop.f32.mrf.mxu1 }
 0x4b0   : > { %v4379_v8 = vpop.f32.mrf.mxu1 }
 0x4b1   : > { %v4763_v27 = vsel %vm1784_vm1, %v4379_v8, 0.0 }
 0x4b5   : > { %v4341_v12 = vpop.f32.mrf.mxu2 }
 0x4b6   : > { %v4759_v46 = vsel %vm1784_vm1, %v4341_v12, 0.0 }
 0x4b7   : > { %v4760_v43 = vadd.f32 %v4759_v46, %v4758_v30 }
 0x4b8   : > { %v4381_v26 = vpop.f32.mrf.mxu1 }
 0x4bd   : > { %v4343_v31 = vpop.f32.mrf.mxu2  ;;  %v4360_v22 = vpop.f32.mrf.mxu3 }
 0x4be   : > { %v4761_v34 = vsel %vm1784_vm1, %v4360_v22, 0.0 }
 0x4bf   : > { %v4762_v23 = vadd.f32 %v4761_v34, %v4760_v43  ;;  %v5146_v34 = vld [vmem:[%s7692_s6] ss:$0 sm:$0xff] }
 0x4c0   : > { %v4436_v38 = vpop.f32.mrf.mxu1 }
 0x4c1   : > { %v4764_v24 = vadd.f32 %v4763_v27, %v4762_v23  ;;  %v4769_v5 = vsel %vm1784_vm1, %v4436_v38, 0.0 }
 0x4c5   : > { %v4362_v50 = vpop.f32.mrf.mxu3  ;;  %v4398_v19 = vpop.f32.mrf.mxu2 }
 0x4c6   : > { %v4765_v54 = vsel %vm1784_vm1, %v4398_v19, 0.0 }
 0x4c7   : > { %v4766_v29 = vadd.f32 %v4765_v54, %v4764_v24 }
 0x4c8   : > { %v4438_v21 = vpop.f32.mrf.mxu1 }
 0x4cd   : > { %v4400_v37 = vpop.f32.mrf.mxu2  ;;  %v4417_v57 = vpop.f32.mrf.mxu3 }
 0x4ce   : > { %v4767_v11 = vsel %vm1784_vm1, %v4417_v57, 0.0  ;;  %v5147_v57 = vld [vmem:[#allocation2] ss:$0 sm:$0xff] }
 0x4cf   : > { %v4768_v7 = vadd.f32 %v4767_v11, %v4766_v29 }
 0x4d0   : > { %v4493_v6 = vpop.f32.mrf.mxu1 }
 0x4d1   : > { %v4770_v51 = vadd.f32 %v4769_v5, %v4768_v7  ;;  %v4775_v1 = vsel %vm1784_vm1, %v4493_v6, 0.0 }
 0x4d5   : > { %v4419_v10 = vpop.f32.mrf.mxu3  ;;  %v4455_v40 = vpop.f32.mrf.mxu2 }
 0x4d6   : > { %v4771_v48 = vsel %vm1784_vm1, %v4455_v40, 0.0 }
 0x4d7   : > { %v4772_v63 = vadd.f32 %v4771_v48, %v4770_v51 }
 0x4d8   : > { %v4495_v62 = vpop.f32.mrf.mxu1 }
 0x4dd   : > { %v4457_v16 = vpop.f32.mrf.mxu2  ;;  %v4474_v45 = vpop.f32.mrf.mxu3 }
 0x4de   : > { %v4773_v60 = vsel %vm1784_vm1, %v4474_v45, 0.0 }
 0x4df   : > { %v4774_v55 = vadd.f32 %v4773_v60, %v4772_v63 }
 0x4e0   : > { %v4550_v0 = vpop.f32.mrf.mxu1 }
 0x4e1   : > { %v4776_v4 = vadd.f32 %v4775_v1, %v4774_v55  ;;  %v4781_v3 = vsel %vm1784_vm1, %v4550_v0, 0.0 }
 0x4e5   : > { %v4476_v56 = vpop.f32.mrf.mxu3  ;;  %v4512_v41 = vpop.f32.mrf.mxu2 }
 0x4e6   : > { %v4777_v25 = vsel %vm1784_vm1, %v4512_v41, 0.0 }
 0x4e7   : > { %v4778_v9 = vadd.f32 %v4777_v25, %v4776_v4 }
 0x4e8   : > { %v4552_v59 = vpop.f32.mrf.mxu1 }
 0x4ed   : > { %v4514_v13 = vpop.f32.mrf.mxu2  ;;  %v4531_v52 = vpop.f32.mrf.mxu3 }
 0x4ee   : > { %v4779_v14 = vsel %vm1784_vm1, %v4531_v52, 0.0 }
 0x4ef   : > { %v4780_v28 = vadd.f32 %v4779_v14, %v4778_v9 }
 0x4f0   : > { %v4607_v15 = vpop.f32.mrf.mxu1 }
 0x4f1   : > { %v4782_v39 = vadd.f32 %v4781_v3, %v4780_v28  ;;  %v4787_v35 = vsel %vm1784_vm1, %v4607_v15, 0.0 }
 0x4f5   : > { %v4533_v17 = vpop.f32.mrf.mxu3  ;;  %v4569_v20 = vpop.f32.mrf.mxu2 }
 0x4f6   : > { %v4783_v32 = vsel %vm1784_vm1, %v4569_v20, 0.0 }
 0x4f7   : > { %v4784_v53 = vadd.f32 %v4783_v32, %v4782_v39 }
 0x4f8   : > { %v4609_v36 = vpop.f32.mrf.mxu1 }
 0x4fd   : > { %v4571_v33 = vpop.f32.mrf.mxu2  ;;  %v4588_v2 = vpop.f32.mrf.mxu3 }
 0x4fe   : > { %v4785_v44 = vsel %vm1784_vm1, %v4588_v2, 0.0 }
 0x4ff   : > { %v4786_v30 = vadd.f32 %v4785_v44, %v4784_v53 }
 0x500   : > { %v4664_v42 = vpop.f32.mrf.mxu1 }
 0x501   : > { %v4788_v12 = vadd.f32 %v4787_v35, %v4786_v30  ;;  %v4793_v23 = vsel %vm1784_vm1, %v4664_v42, 0.0 }
 0x505   : > { %v4590_v61 = vpop.f32.mrf.mxu3  ;;  %v4626_v47 = vpop.f32.mrf.mxu2 }
 0x506   : > { %v4789_v8 = vsel %vm1784_vm1, %v4626_v47, 0.0 }
 0x507   : > { %v4790_v26 = vadd.f32 %v4789_v8, %v4788_v12 }
 0x508   : > { %v4666_v49 = vpop.f32.mrf.mxu1 }
 0x50d   : > { %v4628_v46 = vpop.f32.mrf.mxu2  ;;  %v4645_v43 = vpop.f32.mrf.mxu3 }
 0x50e   : > { %v4791_v31 = vsel %vm1784_vm1, %v4645_v43, 0.0 }
 0x50f   : > { %v4792_v22 = vadd.f32 %v4791_v31, %v4790_v26 }
 0x511   : > { %v4794_v27 = vadd.f32 %v4793_v23, %v4792_v22 }
 0x513   : > { %v4799_v38 = vadd.f32 %v5146_v34, %v4794_v27 }
 0x515   : > { %vm4800_vm0 = vcmp.ge.f32.partialorder %v4799_v38, 0.0  ;;  %v4801_v24 = vmul.f32 0.2, %v4799_v38  ;;  %v4647_v50 = vpop.f32.mrf.mxu3 }
 0x517   : > { %v4802_v19 = vsel %vm4800_vm0, %v4799_v38, %v4801_v24 }
 0x518   : > { %v4803_v21 = vmul.f32 1.4142135, %v4802_v19 }
 0x51a   : > { %v4804_v37 = vpack.c.bf16 %v4803_v21, %v4803_v21 }
 0x51c   : > { %5022 = vmatmul.msk.bf16.vlgmr.msra.gmra.mxu2 %vm1784_vm1, %v4804_v37 }
 0x59f   : > { %v4825_v6 = vpop.f32.mrf.mxu2 }
 0x5a0   : > { %v4826_v10 = vadd.f32 %v5147_v57, %v4825_v6 }
 0x5a2   : > { %4830 = vst.msk [vmem:[%s780_s19] sm:$0xff] %vm4829_vm6, %v4826_v10 }
 0x5a7   : > { %v4827_v40 = vpop.f32.mrf.mxu2 }
 0x5a8 PF: > { %p18_p9 = scmp.ge.s32.totalorder %s5253_s14, 4   ;;  %s7736_s11 = smov %s5168_s12 }
 0x5a9   : > { %s7737_s12 = smov %s5262_s17  ;;  %s7738_s13 = smov %s5253_s14 }
 0x5aa   :  { %20 = sbr.rel (!%p18_p9) target bundleno = 5 (0x5), region = 132 }

</bundles_post_ra>
